<compile_context>
chip_gen: v7x
topology: tpu7x:2x2x1
jax: 0.10.0
libtpu: 0.0.40
codegen_flags: <defaults>
</compile_context>

<pallas_src>
import jax
import jax.numpy as jnp
from jax.experimental import pallas as pl
from jax.experimental.pallas import tpu as pltpu


def _leaky_relu(x, slope=0.2):
    return jnp.where(x >= 0, x, slope * x)


def vae_forward_kernel(
    x_ref, eps_ref,
    w_enc_ref, b_enc_ref,
    w_mv_ref, b_mv_ref,          # fused [hidden, 2*latent] head (mu | log_var)
    w_dec1_ref, b_dec1_ref,
    w_dec2_ref, b_dec2_ref,
    recon_ref, mu_ref, logvar_ref,
):
    latent = eps_ref.shape[-1]
    x = x_ref[...]

    # ---- encoder: Linear(in_dim -> hidden) + LeakyReLU(0.2) ----
    h = jnp.dot(x.astype(jnp.bfloat16), w_enc_ref[...],
                preferred_element_type=jnp.float32)
    h = _leaky_relu(h + b_enc_ref[...])

    # ---- fused latent heads: one matmul, then slice mu / log_var ----
    mv = jnp.dot(h.astype(jnp.bfloat16), w_mv_ref[...],
                 preferred_element_type=jnp.float32) + b_mv_ref[...]
    mu = mv[:, :latent]
    log_var = mv[:, latent:]

    # ---- reparameterize: z = eps * exp(0.5 * log_var) + mu ----
    std = jnp.exp(0.5 * log_var)
    z = eps_ref[...] * std + mu

    # ---- decoder: Linear(latent -> hidden) + LeakyReLU(0.2) ----
    d = jnp.dot(z.astype(jnp.bfloat16), w_dec1_ref[...],
                preferred_element_type=jnp.float32)
    d = _leaky_relu(d + b_dec1_ref[...])

    # ---- output layer: Linear(hidden -> in_dim) + Sigmoid + nan_to_num ----
    out = jnp.dot(d.astype(jnp.bfloat16), w_dec2_ref[...],
                  preferred_element_type=jnp.float32) + b_dec2_ref[...]
    # sigmoid via EUP exp + EUP approximate reciprocal (keeps divide off VALU)
    out = pl.reciprocal(1.0 + jnp.exp(-out), approx=True)
    # After a sigmoid the only non-finite possibility is NaN -> 0 (matches
    # torch.nan_to_num for this value range).
    out = jnp.where(jnp.isnan(out), jnp.zeros_like(out), out)

    recon_ref[...] = out.astype(recon_ref.dtype)
    mu_ref[...] = mu.astype(mu_ref.dtype)
    logvar_ref[...] = log_var.astype(logvar_ref.dtype)


def _pick_tb(B):
    """Pick a batch tile: fill the MXU M dim (<=256), prefer grid >= 2 (v7x 2 TCs)."""
    for tb in (256, 128, 64, 32, 16, 8):
        if B % tb == 0 and B // tb >= 2:
            return tb
    for tb in (256, 128, 64, 32, 16, 8):
        if B % tb == 0:
            return tb
    return B


def vae_forward(x, eps, params, *, tb=None):
    """Full VAE forward pass in a single pallas_call.

    x:   [B, in_dim]   float32
    eps: [B, latent]   float32   (reparameterization noise)
    params: bf16 weights ([in, out]) and f32 biases ([1, out]).
    Returns (recon [B, in_dim], mu [B, latent], log_var [B, latent]).
    """
    B, in_dim = x.shape
    hidden = params["w_enc"].shape[1]
    latent = params["w_mu"].shape[1]
    if tb is None:
        tb = _pick_tb(B)
    assert B % tb == 0
    assert tb == B or tb % 8 == 0, "tb must be a multiple of 8 (sublane constraint)"

    # Fuse the mu/var heads into one [hidden, 2*latent] weight + [1, 2*latent] bias.
    w_mv = jnp.concatenate([params["w_mu"], params["w_var"]], axis=1)
    b_mv = jnp.concatenate([params["b_mu"], params["b_var"]], axis=1)

    # Full-extent blocks for weights/biases: constant index_map -> fetched once
    # and kept resident in VMEM across all batch-grid steps.
    # (On v7x with much larger layers, consider pipeline_mode=pl.Buffered(1)
    #  for these replicated blocks to avoid the second buffer.)
    def rep(shape):
        return pl.BlockSpec(shape, lambda i: (0, 0))

    grid = (B // tb,)
    out_shapes = (
        jax.ShapeDtypeStruct((B, in_dim), jnp.float32),   # recon
        jax.ShapeDtypeStruct((B, latent), jnp.float32),   # mu
        jax.ShapeDtypeStruct((B, latent), jnp.float32),   # log_var
    )

    grid_spec = pltpu.PrefetchScalarGridSpec(
        num_scalar_prefetch=0,
        grid=grid,
        in_specs=[
            pl.BlockSpec((tb, in_dim), lambda i: (i, 0)),     # x
            pl.BlockSpec((tb, latent), lambda i: (i, 0)),     # eps
            rep((in_dim, hidden)), rep((1, hidden)),          # encoder linear
            rep((hidden, 2 * latent)), rep((1, 2 * latent)),  # fused mu|var head
            rep((latent, hidden)), rep((1, hidden)),          # decoder linear 1
            rep((hidden, in_dim)), rep((1, in_dim)),          # decoder output linear
        ],
        out_specs=[
            pl.BlockSpec((tb, in_dim), lambda i: (i, 0)),
            pl.BlockSpec((tb, latent), lambda i: (i, 0)),
            pl.BlockSpec((tb, latent), lambda i: (i, 0)),
        ],
    )

    recon, mu, log_var = pl.pallas_call(
        vae_forward_kernel,
        out_shape=out_shapes,
        grid_spec=grid_spec,
        compiler_params=pltpu.CompilerParams(
            dimension_semantics=("parallel",),
        ),
    )(
        x, eps,
        params["w_enc"], params["b_enc"],
        w_mv, b_mv,
        params["w_dec1"], params["b_dec1"],
        params["w_dec2"], params["b_dec2"],
    )
    return recon, mu, log_var


def init_params(key, in_dim, latent_dim, hidden_dim):
    """PyTorch nn.Linear-style init: U(-1/sqrt(fan_in), 1/sqrt(fan_in)).

    Weights stored as [fan_in, fan_out] in bfloat16 (MXU-native); biases as
    [1, fan_out] in float32.
    """
    def linear(key, fan_in, fan_out):
        kw, kb = jax.random.split(key)
        bound = 1.0 / (fan_in ** 0.5)
        w = jax.random.uniform(kw, (fan_in, fan_out), jnp.float32, -bound, bound)
        b = jax.random.uniform(kb, (1, fan_out), jnp.float32, -bound, bound)
        return w.astype(jnp.bfloat16), b

    keys = jax.random.split(key, 5)
    w_enc, b_enc = linear(keys[0], in_dim, hidden_dim)
    w_mu, b_mu = linear(keys[1], hidden_dim, latent_dim)
    w_var, b_var = linear(keys[2], hidden_dim, latent_dim)
    w_dec1, b_dec1 = linear(keys[3], latent_dim, hidden_dim)
    w_dec2, b_dec2 = linear(keys[4], hidden_dim, in_dim)
    return dict(
        w_enc=w_enc, b_enc=b_enc,
        w_mu=w_mu, b_mu=b_mu,
        w_var=w_var, b_var=b_var,
        w_dec1=w_dec1, b_dec1=b_dec1,
        w_dec2=w_dec2, b_dec2=b_dec2,
    )


def vae_forward_ref(x, eps, p):
    """Pure-JAX f32 reference of the PyTorch forward (same bf16 weights, cast up)."""
    f32 = lambda a: a.astype(jnp.float32)
    pre = x @ f32(p["w_enc"]) + p["b_enc"]
    h = jnp.where(pre >= 0, pre, 0.2 * pre)
    mu = h @ f32(p["w_mu"]) + p["b_mu"]
    log_var = h @ f32(p["w_var"]) + p["b_var"]
    z = eps * jnp.exp(0.5 * log_var) + mu
    dpre = z @ f32(p["w_dec1"]) + p["b_dec1"]
    d = jnp.where(dpre >= 0, dpre, 0.2 * dpre)
    out = jax.nn.sigmoid(d @ f32(p["w_dec2"]) + p["b_dec2"])
    out = jnp.nan_to_num(out)
    return out, mu, log_var


if __name__ == "__main__":
    # MLP VAE shapes: x is [B, in_dim].  B=256 with tb=128 fills the MXU M dim
    # and gives a 2-step batch grid (shards across both v7x TensorCores).
    B, IN_DIM, LATENT, HIDDEN = 256, 256, 128, 512

    key = jax.random.PRNGKey(0)
    k_params, k_x, k_eps = jax.random.split(key, 3)

    params = init_params(k_params, IN_DIM, LATENT, HIDDEN)
    x = jax.random.uniform(k_x, (B, IN_DIM), jnp.float32)     # MNIST-like pixels in [0,1)
    eps = jax.random.normal(k_eps, (B, LATENT), jnp.float32)  # reparameterization noise

    recon, mu, log_var = vae_forward(x, eps, params)
    jax.block_until_ready((recon, mu, log_var))

    # Sanity check against the f32 reference (tolerance loosened for the bf16
    # activation casts at the matmul inputs).
    r_ref, mu_ref, lv_ref = vae_forward_ref(x, eps, params)
    assert jnp.allclose(recon, r_ref, atol=2e-2, rtol=2e-2)
    assert jnp.allclose(mu, mu_ref, atol=2e-2, rtol=2e-2)
    assert jnp.allclose(log_var, lv_ref, atol=2e-2, rtol=2e-2)

    print("KERNEL_OK")
</pallas_src>

<mosaic_0001>
module attributes {stable_mosaic.version = 11 : i64} {
  func.func @vae_forward_kernel(%arg0: i32, %arg1: memref<128x256xf32, #tpu.memory_space<vmem>>, %arg2: memref<128x128xf32, #tpu.memory_space<vmem>>, %arg3: memref<256x512xbf16, #tpu.memory_space<vmem>>, %arg4: memref<1x512xf32, #tpu.memory_space<vmem>>, %arg5: memref<512x256xbf16, #tpu.memory_space<vmem>>, %arg6: memref<1x256xf32, #tpu.memory_space<vmem>>, %arg7: memref<128x512xbf16, #tpu.memory_space<vmem>>, %arg8: memref<1x512xf32, #tpu.memory_space<vmem>>, %arg9: memref<512x256xbf16, #tpu.memory_space<vmem>>, %arg10: memref<1x256xf32, #tpu.memory_space<vmem>>, %arg11: memref<128x256xf32, #tpu.memory_space<vmem>>, %arg12: memref<128x128xf32, #tpu.memory_space<vmem>>, %arg13: memref<128x128xf32, #tpu.memory_space<vmem>>) attributes {dimension_semantics = [#tpu.dimension_semantics<parallel>], iteration_bounds = array<i64: 2>, scalar_prefetch = 0 : i64, scratch_operands = 0 : i64, tpu.core_type = #tpu.core_type<tc>, window_params = [{transform_indices = @transform_0, window_bounds = array<i64: 128, 256>}, {transform_indices = @transform_1, window_bounds = array<i64: 128, 128>}, {pipeline_mode = #tpu.pipeline_mode<synchronous>, transform_indices = @transform_2, window_bounds = array<i64: 256, 512>}, {pipeline_mode = #tpu.pipeline_mode<synchronous>, transform_indices = @transform_3, window_bounds = array<i64: 1, 512>}, {pipeline_mode = #tpu.pipeline_mode<synchronous>, transform_indices = @transform_4, window_bounds = array<i64: 512, 256>}, {pipeline_mode = #tpu.pipeline_mode<synchronous>, transform_indices = @transform_5, window_bounds = array<i64: 1, 256>}, {pipeline_mode = #tpu.pipeline_mode<synchronous>, transform_indices = @transform_6, window_bounds = array<i64: 128, 512>}, {pipeline_mode = #tpu.pipeline_mode<synchronous>, transform_indices = @transform_7, window_bounds = array<i64: 1, 512>}, {pipeline_mode = #tpu.pipeline_mode<synchronous>, transform_indices = @transform_8, window_bounds = array<i64: 512, 256>}, {pipeline_mode = #tpu.pipeline_mode<synchronous>, transform_indices = @transform_9, window_bounds = array<i64: 1, 256>}, {transform_indices = @transform_10, window_bounds = array<i64: 128, 256>}, {transform_indices = @transform_11, window_bounds = array<i64: 128, 128>}, {transform_indices = @transform_12, window_bounds = array<i64: 128, 128>}]} {
    %c0 = arith.constant 0 : index
    %c0_0 = arith.constant 0 : index
    %0 = vector.load %arg1[%c0, %c0_0] : memref<128x256xf32, #tpu.memory_space<vmem>>, vector<128x256xf32>
    %1 = arith.truncf %0 : vector<128x256xf32> to vector<128x256xbf16>
    %c0_1 = arith.constant 0 : index
    %c0_2 = arith.constant 0 : index
    %2 = vector.load %arg3[%c0_1, %c0_2] : memref<256x512xbf16, #tpu.memory_space<vmem>>, vector<256x512xbf16>
    %cst = arith.constant dense<0.000000e+00> : vector<128x512xf32>
    %3 = tpu.matmul %1, %2, %cst {dimension_numbers = #tpu.dot_dimension_numbers<[1], [0], [0], [1], [0, 0, 1, 1], [], []>} : vector<128x256xbf16>, vector<256x512xbf16>, vector<128x512xf32> -> vector<128x512xf32>
    %c0_3 = arith.constant 0 : index
    %c0_4 = arith.constant 0 : index
    %4 = vector.load %arg4[%c0_3, %c0_4] : memref<1x512xf32, #tpu.memory_space<vmem>>, vector<1x512xf32>
    %5 = vector.broadcast %4 : vector<1x512xf32> to vector<128x512xf32>
    %6 = arith.addf %3, %5 : vector<128x512xf32>
    %cst_5 = arith.constant 0.000000e+00 : f32
    %7 = vector.broadcast %cst_5 : f32 to vector<128x512xf32>
    %8 = arith.cmpf oge, %6, %7 : vector<128x512xf32>
    %cst_6 = arith.constant 2.000000e-01 : f32
    %9 = vector.broadcast %cst_6 : f32 to vector<128x512xf32>
    %10 = arith.mulf %9, %6 : vector<128x512xf32>
    %11 = arith.select %8, %6, %10 : vector<128x512xi1>, vector<128x512xf32>
    %12 = arith.truncf %11 : vector<128x512xf32> to vector<128x512xbf16>
    %c0_7 = arith.constant 0 : index
    %c0_8 = arith.constant 0 : index
    %13 = vector.load %arg5[%c0_7, %c0_8] : memref<512x256xbf16, #tpu.memory_space<vmem>>, vector<512x256xbf16>
    %cst_9 = arith.constant dense<0.000000e+00> : vector<128x256xf32>
    %14 = tpu.matmul %12, %13, %cst_9 {dimension_numbers = #tpu.dot_dimension_numbers<[1], [0], [0], [1], [0, 0, 1, 1], [], []>} : vector<128x512xbf16>, vector<512x256xbf16>, vector<128x256xf32> -> vector<128x256xf32>
    %c0_10 = arith.constant 0 : index
    %c0_11 = arith.constant 0 : index
    %15 = vector.load %arg6[%c0_10, %c0_11] : memref<1x256xf32, #tpu.memory_space<vmem>>, vector<1x256xf32>
    %16 = vector.broadcast %15 : vector<1x256xf32> to vector<128x256xf32>
    %17 = arith.addf %14, %16 : vector<128x256xf32>
    %18 = vector.extract_strided_slice %17 {offsets = [0, 0], sizes = [128, 128], strides = [1, 1]} : vector<128x256xf32> to vector<128x128xf32>
    %19 = vector.extract_strided_slice %17 {offsets = [0, 128], sizes = [128, 128], strides = [1, 1]} : vector<128x256xf32> to vector<128x128xf32>
    %cst_12 = arith.constant 5.000000e-01 : f32
    %20 = vector.broadcast %cst_12 : f32 to vector<128x128xf32>
    %21 = arith.mulf %20, %19 : vector<128x128xf32>
    %22 = math.exp %21 : vector<128x128xf32>
    %c0_13 = arith.constant 0 : index
    %c0_14 = arith.constant 0 : index
    %23 = vector.load %arg2[%c0_13, %c0_14] : memref<128x128xf32, #tpu.memory_space<vmem>>, vector<128x128xf32>
    %24 = arith.mulf %23, %22 : vector<128x128xf32>
    %25 = arith.addf %24, %18 : vector<128x128xf32>
    %26 = arith.truncf %25 : vector<128x128xf32> to vector<128x128xbf16>
    %c0_15 = arith.constant 0 : index
    %c0_16 = arith.constant 0 : index
    %27 = vector.load %arg7[%c0_15, %c0_16] : memref<128x512xbf16, #tpu.memory_space<vmem>>, vector<128x512xbf16>
    %cst_17 = arith.constant dense<0.000000e+00> : vector<128x512xf32>
    %28 = tpu.matmul %26, %27, %cst_17 {dimension_numbers = #tpu.dot_dimension_numbers<[1], [0], [0], [1], [0, 0, 1, 1], [], []>} : vector<128x128xbf16>, vector<128x512xbf16>, vector<128x512xf32> -> vector<128x512xf32>
    %c0_18 = arith.constant 0 : index
    %c0_19 = arith.constant 0 : index
    %29 = vector.load %arg8[%c0_18, %c0_19] : memref<1x512xf32, #tpu.memory_space<vmem>>, vector<1x512xf32>
    %30 = vector.broadcast %29 : vector<1x512xf32> to vector<128x512xf32>
    %31 = arith.addf %28, %30 : vector<128x512xf32>
    %cst_20 = arith.constant 0.000000e+00 : f32
    %32 = vector.broadcast %cst_20 : f32 to vector<128x512xf32>
    %33 = arith.cmpf oge, %31, %32 : vector<128x512xf32>
    %cst_21 = arith.constant 2.000000e-01 : f32
    %34 = vector.broadcast %cst_21 : f32 to vector<128x512xf32>
    %35 = arith.mulf %34, %31 : vector<128x512xf32>
    %36 = arith.select %33, %31, %35 : vector<128x512xi1>, vector<128x512xf32>
    %37 = arith.truncf %36 : vector<128x512xf32> to vector<128x512xbf16>
    %c0_22 = arith.constant 0 : index
    %c0_23 = arith.constant 0 : index
    %38 = vector.load %arg9[%c0_22, %c0_23] : memref<512x256xbf16, #tpu.memory_space<vmem>>, vector<512x256xbf16>
    %cst_24 = arith.constant dense<0.000000e+00> : vector<128x256xf32>
    %39 = tpu.matmul %37, %38, %cst_24 {dimension_numbers = #tpu.dot_dimension_numbers<[1], [0], [0], [1], [0, 0, 1, 1], [], []>} : vector<128x512xbf16>, vector<512x256xbf16>, vector<128x256xf32> -> vector<128x256xf32>
    %c0_25 = arith.constant 0 : index
    %c0_26 = arith.constant 0 : index
    %40 = vector.load %arg10[%c0_25, %c0_26] : memref<1x256xf32, #tpu.memory_space<vmem>>, vector<1x256xf32>
    %41 = vector.broadcast %40 : vector<1x256xf32> to vector<128x256xf32>
    %42 = arith.addf %39, %41 : vector<128x256xf32>
    %cst_27 = arith.constant 0.000000e+00 : f32
    %43 = vector.broadcast %cst_27 : f32 to vector<128x256xf32>
    %44 = arith.subf %43, %42 : vector<128x256xf32>
    %45 = math.exp %44 : vector<128x256xf32>
    %cst_28 = arith.constant 1.000000e+00 : f32
    %46 = vector.broadcast %cst_28 : f32 to vector<128x256xf32>
    %47 = arith.addf %46, %45 : vector<128x256xf32>
    %48 = tpu.reciprocal %47 {approx = true} : vector<128x256xf32> -> vector<128x256xf32>
    %49 = arith.cmpf one, %48, %48 : vector<128x256xf32>
    %cst_29 = arith.constant 0.000000e+00 : f32
    %50 = vector.broadcast %cst_29 : f32 to vector<128x256xf32>
    %51 = arith.select %49, %50, %48 : vector<128x256xi1>, vector<128x256xf32>
    %c0_30 = arith.constant 0 : index
    %c0_31 = arith.constant 0 : index
    %52 = vector.load %arg11[%c0_30, %c0_31] : memref<128x256xf32, #tpu.memory_space<vmem>>, vector<128x256xf32>
    tpu.vector_store %arg11[%c0_30, %c0_31], %51 {strides = array<i32>} : memref<128x256xf32, #tpu.memory_space<vmem>>, vector<128x256xf32>,
    %c0_32 = arith.constant 0 : index
    %c0_33 = arith.constant 0 : index
    %53 = vector.load %arg12[%c0_32, %c0_33] : memref<128x128xf32, #tpu.memory_space<vmem>>, vector<128x128xf32>
    tpu.vector_store %arg12[%c0_32, %c0_33], %18 {strides = array<i32>} : memref<128x128xf32, #tpu.memory_space<vmem>>, vector<128x128xf32>,
    %c0_34 = arith.constant 0 : index
    %c0_35 = arith.constant 0 : index
    %54 = vector.load %arg13[%c0_34, %c0_35] : memref<128x128xf32, #tpu.memory_space<vmem>>, vector<128x128xf32>
    tpu.vector_store %arg13[%c0_34, %c0_35], %19 {strides = array<i32>} : memref<128x128xf32, #tpu.memory_space<vmem>>, vector<128x128xf32>,
    return
  }
  func.func @transform_0(%arg0: i32) -> (i32, i32) {
    %c0_i32 = arith.constant 0 : i32
    %c0_i32_0 = arith.constant 0 : i32
    return %arg0, %c0_i32 : i32, i32
  }
  func.func @transform_1(%arg0: i32) -> (i32, i32) {
    %c0_i32 = arith.constant 0 : i32
    %c0_i32_0 = arith.constant 0 : i32
    return %arg0, %c0_i32 : i32, i32
  }
  func.func @transform_2(%arg0: i32) -> (i32, i32) {
    %c0_i32 = arith.constant 0 : i32
    %c0_i32_0 = arith.constant 0 : i32
    %c0_i32_1 = arith.constant 0 : i32
    return %c0_i32, %c0_i32_0 : i32, i32
  }
  func.func @transform_3(%arg0: i32) -> (i32, i32) {
    %c0_i32 = arith.constant 0 : i32
    %c0_i32_0 = arith.constant 0 : i32
    %c0_i32_1 = arith.constant 0 : i32
    return %c0_i32, %c0_i32_0 : i32, i32
  }
  func.func @transform_4(%arg0: i32) -> (i32, i32) {
    %c0_i32 = arith.constant 0 : i32
    %c0_i32_0 = arith.constant 0 : i32
    %c0_i32_1 = arith.constant 0 : i32
    return %c0_i32, %c0_i32_0 : i32, i32
  }
  func.func @transform_5(%arg0: i32) -> (i32, i32) {
    %c0_i32 = arith.constant 0 : i32
    %c0_i32_0 = arith.constant 0 : i32
    %c0_i32_1 = arith.constant 0 : i32
    return %c0_i32, %c0_i32_0 : i32, i32
  }
  func.func @transform_6(%arg0: i32) -> (i32, i32) {
    %c0_i32 = arith.constant 0 : i32
    %c0_i32_0 = arith.constant 0 : i32
    %c0_i32_1 = arith.constant 0 : i32
    return %c0_i32, %c0_i32_0 : i32, i32
  }
  func.func @transform_7(%arg0: i32) -> (i32, i32) {
    %c0_i32 = arith.constant 0 : i32
    %c0_i32_0 = arith.constant 0 : i32
    %c0_i32_1 = arith.constant 0 : i32
    return %c0_i32, %c0_i32_0 : i32, i32
  }
  func.func @transform_8(%arg0: i32) -> (i32, i32) {
    %c0_i32 = arith.constant 0 : i32
    %c0_i32_0 = arith.constant 0 : i32
    %c0_i32_1 = arith.constant 0 : i32
    return %c0_i32, %c0_i32_0 : i32, i32
  }
  func.func @transform_9(%arg0: i32) -> (i32, i32) {
    %c0_i32 = arith.constant 0 : i32
    %c0_i32_0 = arith.constant 0 : i32
    %c0_i32_1 = arith.constant 0 : i32
    return %c0_i32, %c0_i32_0 : i32, i32
  }
  func.func @transform_10(%arg0: i32) -> (i32, i32) {
    %c0_i32 = arith.constant 0 : i32
    %c0_i32_0 = arith.constant 0 : i32
    return %arg0, %c0_i32 : i32, i32
  }
  func.func @transform_11(%arg0: i32) -> (i32, i32) {
    %c0_i32 = arith.constant 0 : i32
    %c0_i32_0 = arith.constant 0 : i32
    return %arg0, %c0_i32 : i32, i32
  }
  func.func @transform_12(%arg0: i32) -> (i32, i32) {
    %c0_i32 = arith.constant 0 : i32
    %c0_i32_0 = arith.constant 0 : i32
    return %arg0, %c0_i32 : i32, i32
  }
}

</mosaic_0001>

<bundles_post_ra>
// kernel: tpu_custom_call.1
= control target key start
LH: loop header
LB: loop body
LE: loop exit
PB: predicated region body
PF: predicated region fallthrough
CT: control target
= control target key end

     0   :  { %s6381_s0 = inlined_call_operand.hbm [shape: f32[256,256], index: 0, kind: input, shape index: {}]   ;;  %s6382_s1 = inlined_call_operand.hbm [shape: f32[256,128], index: 1, kind: input, shape index: {}]   ;;  %s6383_s2 = inlined_call_operand.hbm [shape: bf16[256,512], index: 2, kind: input, shape index: {}]   ;;  %s6384_s3 = inlined_call_operand.vmem [shape: f32[1,512], index: 3, kind: input, shape index: {}]   ;;  %s6385_s4 = inlined_call_operand.hbm [shape: bf16[512,256], index: 4, kind: input, shape index: {}]   ;;  %s6386_s5 = inlined_call_operand.vmem [shape: f32[1,256], index: 5, kind: input, shape index: {}]   ;;  %s6387_s6 = inlined_call_operand.hbm [shape: bf16[128,512], index: 6, kind: input, shape index: {}]   ;;  %s6388_s7 = inlined_call_operand.vmem [shape: f32[1,512], index: 7, kind: input, shape index: {}]   ;;  %s6389_s8 = inlined_call_operand.hbm [shape: bf16[512,256], index: 8, kind: input, shape index: {}]   ;;  %s6390_s9 = inlined_call_operand.vmem [shape: f32[1,256], index: 9, kind: input, shape index: {}]   ;;  %s6391_s10 = inlined_call_operand.hbm [shape: f32[256,256], index: 10, kind: output, shape index: {0}]   ;;  %s6392_s11 = inlined_call_operand.hbm [shape: f32[256,128], index: 11, kind: output, shape index: {1}]   ;;  %s6393_s12 = inlined_call_operand.hbm [shape: f32[256,128], index: 12, kind: output, shape index: {2}]  }
   0x1   :  { %6409 = sst [smem:[#allocation27_spill]] %s6381_s0 }
   0x2   :  { %6410 = sst [smem:[#allocation28_spill]] %s6383_s2 }
   0x3   :  { %6411 = sst [smem:[#allocation29_spill]] %s6385_s4 }
   0x4   :  { %6412 = sst [smem:[#allocation30_spill]] %s6387_s6 }
   0x5   :  { %6413 = sst [smem:[#allocation31_spill]] %s6389_s8 }
   0x6   :  { %6414 = sst [smem:[#allocation32_spill]] %s6390_s9 }
   0x7   :  { %6415 = sst [smem:[#allocation33_spill]] %s6391_s10 }
   0x8   :  { %6416 = sst [smem:[#allocation34_spill]] %s6393_s12 }
   0x9   :  { %18 = vsyncpa [#allocation3], 0 }
   0xa   :  { %20 = vsyncpa [#allocation3 + $0x1], 0 }
   0xb   :  { %21 = vsyncpa [#allocation6], 0 }
   0xc   :  { %23 = vsyncpa [#allocation6 + $0x1], 0 }
   0xd   :  { %24 = vsyncpa [#allocation9], 0 }
   0xe   :  { %25 = vsyncpa [#allocation12], 0 }
   0xf   :  { %26 = vsyncpa [#allocation4], 0 }
  0x10   :  { %28 = vsyncpa [#allocation4 + $0x1], 0 }
  0x11   :  { %29 = vsyncpa [#allocation15], 0 }
  0x12   :  { %31 = vsyncpa [#allocation15 + $0x1], 0  ;;  %s5412_s21 = smov 0   ;;  %s5414_s22 = smov 0  }
  0x13   :  { %s5416_s23 = smov 0   ;;  %s5418_s24 = smov 0  }
  0x14 LB: > { %6417 = sst [smem:[#allocation24_spill]] %s5315_s21  ;;  %s5433_s25 = sadd.s32 4294967295, %s5327_s24   ;;  %s5327_s24 = sphi %s5418_s24, %s6458_s24   ;;  %s5323_s23 = sphi %s5416_s23, %s6457_s23   ;;  %s5319_s22 = sphi %s5414_s22, %s6456_s22   ;;  %s5315_s21 = sphi %s5412_s21, %s6455_s21  }
  0x15   : > { %s6394_s26 = sadd.s32 4294967294, %s5327_s24   ;;  %p57_p0 = scmp.ne.s32.totalorder %s5319_s22, %s5315_s21 }
  0x16   : > { %p6396_p1 = scmp.eq.s32.totalorder %s5433_s25, 0  ;;  %p281_p3 = scmp.eq.s32.totalorder %s6394_s26, 1 }
  0x17   : > { %p4012_p5 = scmp.ge.s32.totalorder %s5327_s24, 1  ;;  %p340_p7 = scmp.lt.s32.totalorder %s5327_s24, 3 }
  0x18   : > { %p5444_p4 = por %p6396_p1, %p57_p0  ;;  %p5449_p6 = por %p281_p3, %p57_p0 }
  0x19   : > { %p5454_p8 = pnand %p4012_p5, %p340_p7  ;;  %s5329_s30 = smov [#allocation7]  }
  0x1a   : > { %s6418_s27 = scalar_select %p5444_p4, 1, 0 }
  0x1b   : > { %s6419_s28 = scalar_select %p5449_p6, 1, 0 }
  0x1c   : > { %s6421_s29 = scalar_select %p5454_p8, 1, 0 }
  0x1d   : > { %6420 = sst [smem:[#allocation25_spill]] %s6419_s28  ;;  %s352_s13 = sshll.u32 %s5329_s30, 4  ;;  %s5458_s13 = int_to_ptr.vmem [resolvable:$true] %s352_s13 }
  0x1e   : > { %p4432_p9 = pneg %p5454_p8  ;;  %s5330_s15 = smov [#allocation8]  }
  0x1f   : > { %s368_s16 = sshll.u32 %s5330_s15, 4  ;;  %s6423_s2 = sld [smem:[#allocation28_spill]]  ;;  %s5469_s16 = int_to_ptr.vmem [resolvable:$true] %s368_s16 }
  0x20   : > { %p5465_p11 = pnand %p4432_p9, %p6396_p1 }
  0x22   : > { %p5479_p13 = pneg %p5465_p11 }
  0x25   : > { %s5013_s19 = scalar_lea.hbm %s6423_s2, 8192 }
  0x26   : > { %p5014_p12 = scmp.ne.s32.totalorder %s6423_s2, %s5013_s19  ;;  %p5020_p5 = scmp.lt.u32.totalorder %s5013_s19, %s6423_s2 }
  0x28   : > { %p5016_p0 = pnand %p5479_p13, %p5014_p12 }
  0x2a   : > { %p5017_p3 = pneg %p5016_p0 }
  0x2c   : > { %p5022_p7 = pnand %p5020_p5, %p5017_p3 }
  0x2e   : > { %5025 = shalt.err (!%p5022_p7)
}
  0x2f   : > { %s5026_s17 = scalar_lea.vmem %s5458_s13, 8192  ;;  %p5034_p2 = scmp.lt.s32.totalorder %s5458_s13, %s5458_s13 }
  0x30   : > { %p5027_p9 = scmp.ne.s32.totalorder %s5458_s13, %s5026_s17  ;;  %p5035_p6 = scmp.lt.s32.totalorder %s5026_s17, %s5026_s17 }
  0x32   : > { %p5029_p10 = pnand %p5027_p9, %p5479_p13  ;;  %p5036_p12 = por %p5035_p6, %p5034_p2 }
  0x34   : > { %p5030_p1 = pneg %p5029_p10 }
  0x36   : > { %p5037_p0 = pnand %p5036_p12, %p5030_p1 }
  0x38   : > { %5040 = shalt.err (!%p5037_p0)
}
  0x39   : > { %s6400_s18 = smov 256   ;;  %s6402_s28 = smov 16  }
  0x3a   : > { %4435 = dma.hbm_to_vmem [thread:$0]  (!%p5465_p11), %s6423_s2, 8192, %s5458_s13, [#allocation6], %s6400_s18, %s6400_s18, %s6402_s28  }
  0x3b   : > { %s6425_s4 = sld [smem:[#allocation29_spill]] }
  0x41   : > { %s5041_s17 = scalar_lea.hbm %s6425_s4, 8192 }
  0x42   : > { %p5042_p1 = scmp.ne.s32.totalorder %s6425_s4, %s5041_s17  ;;  %p5048_p10 = scmp.lt.u32.totalorder %s5041_s17, %s6425_s4 }
  0x44   : > { %p5044_p2 = pnand %p5042_p1, %p5479_p13 }
  0x46   : > { %p5045_p6 = pneg %p5044_p2 }
  0x48   : > { %p5050_p3 = pnand %p5048_p10, %p5045_p6 }
  0x4a   : > { %5053 = shalt.err (!%p5050_p3)
}
  0x4b   : > { %s5054_s13 = scalar_lea.vmem %s5469_s16, 8192  ;;  %p5062_p12 = scmp.lt.s32.totalorder %s5469_s16, %s5469_s16 }
  0x4c   : > { %p5055_p5 = scmp.ne.s32.totalorder %s5469_s16, %s5054_s13  ;;  %p5063_p0 = scmp.lt.s32.totalorder %s5054_s13, %s5054_s13 }
  0x4e   : > { %p5057_p7 = pnand %p5055_p5, %p5479_p13  ;;  %p5064_p1 = por %p5063_p0, %p5062_p12 }
  0x50   : > { %p5058_p9 = pneg %p5057_p7 }
  0x52   : > { %p5065_p2 = pnand %p5064_p1, %p5058_p9 }
  0x54   : > { %5068 = shalt.err (!%p5065_p2)
}
  0x55   : > { %s6406_s10 = smov 128   ;;  %s6408_s9 = smov 8  }
  0x56   : > { %4438 = dma.hbm_to_vmem [thread:$0]  (!%p5465_p11), %s6425_s4, 8192, %s5469_s16, [#allocation9], %s6406_s10, %s6406_s10, %s6408_s9  }
  0x57   : > { %s5335_s19 = smov [#allocation10]   ;;  %s5336_s30 = smov [#allocation11]  }
  0x58   : > { %s384_s20 = sshll.u32 %s5335_s19, 4  ;;  %s400_s15 = sshll.u32 %s5336_s30, 4  ;;  %s385_s20 = int_to_ptr.vmem [resolvable:$true] %s384_s20  ;;  %s5529_s15 = int_to_ptr.vmem [resolvable:$true] %s400_s15 }
  0x59   : > { %s6426_s6 = sld [smem:[#allocation30_spill]] }
  0x5f   : > { %s5069_s18 = scalar_lea.hbm %s6426_s6, 4096 }
  0x60   : > { %p5070_p6 = scmp.ne.s32.totalorder %s6426_s6, %s5069_s18  ;;  %p5076_p5 = scmp.lt.u32.totalorder %s5069_s18, %s6426_s6 }
  0x62   : > { %p5072_p10 = pnand %p5070_p6, %p5479_p13 }
  0x64   : > { %p5073_p3 = pneg %p5072_p10 }
  0x66   : > { %p5078_p7 = pnand %p5076_p5, %p5073_p3 }
  0x68   : > { %5081 = shalt.err (!%p5078_p7)
}
  0x69   : > { %s5082_s21 = scalar_lea.vmem %s385_s20, 4096  ;;  %p5090_p1 = scmp.lt.s32.totalorder %s385_s20, %s385_s20 }
  0x6a   : > { %p5083_p9 = scmp.ne.s32.totalorder %s385_s20, %s5082_s21  ;;  %p5091_p2 = scmp.lt.s32.totalorder %s5082_s21, %s5082_s21 }
  0x6c   : > { %p5085_p12 = pnand %p5083_p9, %p5479_p13  ;;  %p5092_p4 = por %p5091_p2, %p5090_p1 }
  0x6e   : > { %p5086_p0 = pneg %p5085_p12 }
  0x70   : > { %p5093_p8 = pnand %p5092_p4, %p5086_p0 }
  0x72   : > { %5096 = shalt.err (!%p5093_p8)
}
  0x73   : > { %s6427_s2 = smov 16   ;;  %s6428_s28 = smov 256  }
  0x74   : > { %4441 = dma.hbm_to_vmem [thread:$0]  (!%p5465_p11), %s6426_s6, 4096, %s385_s20, [#allocation9], %s6428_s28, %s6428_s28, %s6427_s2  }
  0x75   : > { %s6429_s8 = sld [smem:[#allocation31_spill]] }
  0x7b   : > { %s5097_s13 = scalar_lea.hbm %s6429_s8, 8192 }
  0x7c   : > { %p5098_p6 = scmp.ne.s32.totalorder %s6429_s8, %s5097_s13  ;;  %p5104_p10 = scmp.lt.u32.totalorder %s5097_s13, %s6429_s8 }
  0x7e   : > { %p5100_p4 = pnand %p5098_p6, %p5479_p13 }
  0x80   : > { %p5101_p8 = pneg %p5100_p4 }
  0x82   : > { %p5106_p3 = pnand %p5104_p10, %p5101_p8 }
  0x84   : > { %5109 = shalt.err (!%p5106_p3)
}
  0x85   : > { %s5110_s20 = scalar_lea.vmem %s5529_s15, 8192  ;;  %p5118_p12 = scmp.lt.s32.totalorder %s5529_s15, %s5529_s15 }
  0x86   : > { %p5111_p5 = scmp.ne.s32.totalorder %s5529_s15, %s5110_s20  ;;  %p5119_p0 = scmp.lt.s32.totalorder %s5110_s20, %s5110_s20 }
  0x88   : > { %p5113_p7 = pnand %p5111_p5, %p5479_p13  ;;  %p5120_p1 = por %p5119_p0, %p5118_p12 }
  0x8a   : > { %p5114_p9 = pneg %p5113_p7 }
  0x8c   : > { %p5121_p2 = pnand %p5120_p1, %p5114_p9 }
  0x8e   : > { %5124 = shalt.err (!%p5121_p2)
}
  0x8f   : > { %s6430_s10 = smov 128   ;;  %s5579_s26 = sadd.s32 1, %s5327_s24  }
  0x90   : > { %4444 = dma.hbm_to_vmem [thread:$0]  (!%p5465_p11), %s6429_s8, 8192, %s5529_s15, [#allocation12], %s6430_s10, %s6430_s10, %s6408_s9  }
  0x91   : > { %s41_s14 = ssub.s32 %s5327_s24, %s5579_s26  ;;  %s44_s30 = sadd.s32 1, %s5323_s23 }
  0x92   : > { %p42_p13 = scmp.eq.s32.totalorder %s41_s14, 0  ;;  %p51_p6 = scmp.ne.s32.totalorder %s5323_s23, %s5319_s22 }
  0x93   : > { %p52_p4 = scmp.eq.s32.totalorder %s5327_s24, 0  ;;  %p6432_p10 = scmp.eq.s32.totalorder %s5433_s25, 1 }
  0x94   : > { %s5588_s17 = scalar_select %p42_p13, %s5323_s23, %s44_s30  }
  0x95   : > { %p53_p8 = por %p52_p4, %p51_p6  ;;  %p5592_p3 = por %p6432_p10, %p51_p6 }
  0x96   : > { %6431 = sst [smem:[#allocation26_spill]] %s5588_s17  ;;  %p4466_p5 = scmp.lt.s32.totalorder %s5327_s24, 2 }
  0x97   : > { %s5598_s12 = sand.u32 1, %s5323_s23   ;;  %s4272_s16 = sshll.u32 %s5327_s24, 12 }
  0x98   : > { %s4018_s15 = sshll.u32 %s5598_s12, 8  ;;  %s6434_s0 = sld [smem:[#allocation27_spill]] }
  0x99   : > { %s421_s18 = scalar_lea.vmem [#allocation2], %s4018_s15  ;;  %p5609_p11 = pnand %p4466_p5, %p53_p8 }
  0x9a   : > { %s429_s14 = sshll.u32 %s421_s18, 4  ;;  %s4022_s4 = sshll.u32 %s5598_s12, 7  ;;  %s5607_s14 = int_to_ptr.vmem [resolvable:$true] %s429_s14 }
  0x9b   : > { %s418_s6 = scalar_lea.sflag [#allocation3], %s5598_s12  ;;  %p5127_p9 = pneg %p5609_p11 }
  0x9e   : > { %s5605_s19 = scalar_lea.hbm %s6434_s0, %s4272_s16  ;;  %s5130_s20 = scalar_lea.hbm %s6434_s0, 8192 }
  0x9f   : > { %s5125_s21 = scalar_lea.hbm %s5605_s19, 4096  ;;  %p5131_p1 = scmp.lt.u32.totalorder %s5605_s19, %s6434_s0 }
  0xa0   : > { %p5126_p7 = scmp.ne.s32.totalorder %s5605_s19, %s5125_s21  ;;  %p5132_p2 = scmp.lt.u32.totalorder %s5130_s20, %s5125_s21 }
  0xa1   : > { %p5134_p6 = scmp.lt.u32.totalorder %s5125_s21, %s5605_s19 }
  0xa2   : > { %p5128_p12 = pnand %p5127_p9, %p5126_p7  ;;  %p5133_p13 = por %p5132_p2, %p5131_p1 }
  0xa4   : > { %p5129_p0 = pneg %p5128_p12  ;;  %p5135_p4 = por %p5134_p6, %p5133_p13 }
  0xa6   : > { %p5136_p8 = pnand %p5135_p4, %p5129_p0 }
  0xa8   : > { %5139 = shalt.err (!%p5136_p8)
}
  0xa9   : > { %s5140_s9 = scalar_lea.vmem %s5607_s14, 4096  ;;  %s5337_s15 = smov [#allocation2]  }
  0xaa   : > { %p5141_p10 = scmp.ne.s32.totalorder %s5607_s14, %s5140_s9  ;;  %s5145_s16 = sshll.u32 %s5337_s15, 4  ;;  %s5146_s16 = int_to_ptr.vmem [resolvable:$false] %s5145_s16 }
  0xab   : > { %s5147_s8 = scalar_lea.vmem %s5146_s16, 8192  ;;  %p5148_p12 = scmp.lt.s32.totalorder %s5607_s14, %s5146_s16 }
  0xac   : > { %p5143_p5 = pnand %p5141_p10, %p5127_p9  ;;  %p5149_p1 = scmp.lt.s32.totalorder %s5147_s8, %s5140_s9 }
  0xae   : > { %p5144_p7 = pneg %p5143_p5  ;;  %p5150_p2 = por %p5149_p1, %p5148_p12 }
  0xb0   : > { %p5151_p13 = pnand %p5150_p2, %p5144_p7 }
  0xb2   : > { %5154 = shalt.err (!%p5151_p13)
}
  0xb3   : > { %4448 = dma.hbm_to_vmem [thread:$0]  (!%p5609_p11), %s5605_s19, 4096, %s5607_s14, %s418_s6, %s6428_s28, %s6428_s28, %s6427_s2  }
  0xb4   : > { %s4273_s21 = sshll.u32 %s5327_s24, 11  ;;  %s443_s15 = scalar_lea.vmem [#allocation5], %s4022_s4 }
  0xb5   : > { %s5650_s18 = scalar_lea.hbm %s6382_s1, %s4273_s21  ;;  %s450_s16 = sshll.u32 %s443_s15, 4  ;;  %s5654_s16 = int_to_ptr.vmem [resolvable:$true] %s450_s16 }
  0xb6   : > { %s6436_s8 = sand.u32 1, %s5327_s24   ;;  %s5155_s17 = scalar_lea.hbm %s5650_s18, 2048 }
  0xb7   : > { %s5658_s0 = scalar_lea.sflag [#allocation6], %s6436_s8  ;;  %p5156_p0 = scmp.ne.s32.totalorder %s5650_s18, %s5155_s17 }
  0xb8   : > { %s5160_s28 = scalar_lea.hbm %s6382_s1, 4096  ;;  %p5161_p8 = scmp.lt.u32.totalorder %s5650_s18, %s6382_s1 }
  0xb9   : > { %p5158_p6 = pnand %p5156_p0, %p5127_p9  ;;  %p5162_p10 = scmp.lt.u32.totalorder %s5160_s28, %s5155_s17 }
  0xba   : > { %p5164_p7 = scmp.lt.u32.totalorder %s5155_s17, %s5650_s18 }
  0xbb   : > { %p5159_p4 = pneg %p5158_p6  ;;  %p5163_p5 = por %p5162_p10, %p5161_p8 }
  0xbd   : > { %p5165_p12 = por %p5164_p7, %p5163_p5 }
  0xbf   : > { %p5166_p1 = pnand %p5165_p12, %p5159_p4 }
  0xc1   : > { %5169 = shalt.err (!%p5166_p1)
}
  0xc2   : > { %s5170_s4 = scalar_lea.vmem %s5654_s16, 2048  ;;  %s5338_s14 = smov [#allocation5]  }
  0xc3   : > { %p5171_p2 = scmp.ne.s32.totalorder %s5654_s16, %s5170_s4  ;;  %s5175_s21 = sshll.u32 %s5338_s14, 4  ;;  %s5176_s21 = int_to_ptr.vmem [resolvable:$false] %s5175_s21 }
  0xc4   : > { %s5177_s20 = scalar_lea.vmem %s5176_s21, 4096  ;;  %p5178_p6 = scmp.lt.s32.totalorder %s5654_s16, %s5176_s21 }
  0xc5   : > { %p5173_p13 = pnand %p5171_p2, %p5127_p9  ;;  %p5179_p8 = scmp.lt.s32.totalorder %s5177_s20, %s5170_s4 }
  0xc7   : > { %p5174_p0 = pneg %p5173_p13  ;;  %p5180_p10 = por %p5179_p8, %p5178_p6 }
  0xc9   : > { %p5181_p5 = pnand %p5180_p10, %p5174_p0 }
  0xcb   : > { %5184 = shalt.err (!%p5181_p5)
}
  0xcc   : > { %s6437_s17 = smov 8   ;;  %p6438_p9 = scmp.ne.s32.totalorder %s6421_s29, 0 }
  0xcd   : > { %4451 = dma.hbm_to_vmem [thread:$0]  (!%p5609_p11), %s5650_s18, 2048, %s5654_s16, %s5658_s0, %s6430_s10, %s6430_s10, %s6437_s17  }
  0xce   : > { %462 = sbr.rel (%p6438_p9) target bundleno = 1425 (0x591), region = 60  ;;  %s5690_s9 = sand.u32 (!%p6438_p9), 1, %s5319_s22  }
  0xcf   : > { %s4026_s15 = sshll.u32 (!%p6438_p9), %s5690_s9, 8  ;;  %s465_s8 = scalar_lea.sflag (!%p6438_p9), [#allocation3], %s5690_s9 }
  0xd0   : > { %s5696_s30 = scalar_lea.vmem (!%p6438_p9), [#allocation2], %s4026_s15  ;;  %p6439_p4 = scmp.ne.s32.totalorder (!%p6438_p9), %s6418_s27, 0 }
  0xd5   : > { %5286 = dma.done.wait (%p6439_p4), %s465_s8, 4096  }
  0xd6   : > { %5288 = vsyncadd (%p6439_p4), %s465_s8, 4294963200  ;;  %s473_s0 = sand.u32 1, %s5433_s25   ;;  %s5704_s29 = sshll.u32 %s5690_s9, 7 }
  0xd7   : > { %s474_s10 = scalar_lea.sflag [#allocation6], %s473_s0  ;;  %s5709_s18 = scalar_lea.vmem [#allocation5], %s5704_s29 }
  0xd8   : > { %5290 = dma.done.wait (%p6439_p4), %s474_s10, 2048  }
  0xd9   : > { %5292 = vsyncadd (%p6439_p4), %s474_s10, 4294965248  ;;  %p6440_p11 = scmp.eq.s32.totalorder %s5433_s25, 0 }
  0xdb   : > { %5294 = dma.done.wait (%p6440_p11), [#allocation6], 8192   ;;  %p6441_p7 = pmov %p6440_p11 }
  0xdd   : > { %5296 = vsyncadd (%p6441_p7), [#allocation6], 4294959104  ;;  %p6442_p12 = pmov %p6441_p7 }
  0xde   : > { %p6443_p1 = pmov %p6441_p7 }
  0xdf   : > { %5298 = dma.done.wait (%p6442_p12), [#allocation9], 12288  }
  0xe0   : > { %5300 = vsyncadd (%p6443_p1), [#allocation9], 4294955008  ;;  %p6444_p2 = pmov %p6443_p1 }
  0xe1   : > { %p6445_p13 = pmov %p6443_p1 }
  0xe2   : > { %5302 = dma.done.wait (%p6444_p2), [#allocation12], 8192  }
  0xe3   : > { %5304 = vsyncadd (%p6445_p13), [#allocation12], 4294959104  ;;  %v4517_v0 = vld [vmem:[#allocation7 + $0x4] ss:$16 sps:$4 sm:$0xff]   ;;  %v4519_v1 = vld [vmem:[#allocation7] ss:$16 sps:$4 sm:$0xff]  }
  0xe4   : > { %1009 = vmatprep.subr.bf16.mxu1 %v4517_v0  ;;  %v4520_v2 = vld [vmem:[#allocation7 + $0x24] ss:$16 sps:$4 sm:$0xff]   ;;  %v4522_v3 = vld [vmem:[#allocation7 + $0x20] ss:$16 sps:$4 sm:$0xff]   ;;  %v556_v13 = vld [vmem:[%s5696_s30 + $0x8] sm:$0xff]  ;;  %s5923_s28 = scalar_lea.vmem [#allocation14], %s5704_s29 }
  0xe5   : > { %1010 = vmatpush1.bf16.msra.mxu1 %v4519_v1  ;;  %v4523_v4 = vld [vmem:[#allocation7 + $0x44] ss:$16 sps:$4 sm:$0xff]   ;;  %v4525_v5 = vld [vmem:[#allocation7 + $0x40] ss:$16 sps:$4 sm:$0xff]   ;;  %v558_v14 = vld [vmem:[%s5696_s30 + $0x18] sm:$0xff]  ;;  %s5928_s12 = scalar_lea.vmem [#allocation16], %s5704_s29 }
  0xe6   : > { %1011 = vmatprep.subr.bf16.mxu1 %v4520_v2  ;;  %v4526_v6 = vld [vmem:[#allocation7 + $0x64] ss:$16 sps:$4 sm:$0xff]   ;;  %v4528_v7 = vld [vmem:[#allocation7 + $0x60] ss:$16 sps:$4 sm:$0xff]   ;;  %v5729_v15 = vpack.c.bf16 %v558_v14, %v556_v13  ;;  %v4567_v40 = vld [vmem:[#allocation7 + $0xc] ss:$16 sps:$4 sm:$0xff]  }
  0xe7   : > { %v4529_v8 = vld [vmem:[#allocation7 + $0x84] ss:$16 sps:$4 sm:$0xff]   ;;  %v4531_v9 = vld [vmem:[#allocation7 + $0x80] ss:$16 sps:$4 sm:$0xff]   ;;  %v560_v41 = vld [vmem:[%s5696_s30 + $0x28] sm:$0xff]  ;;  %s4276_s14 = sshll.u32 %s5433_s25, 11 }
  0xe8   : > { %v4532_v10 = vld [vmem:[#allocation7 + $0xa4] ss:$16 sps:$4 sm:$0xff]   ;;  %v4534_v11 = vld [vmem:[#allocation7 + $0xa0] ss:$16 sps:$4 sm:$0xff]   ;;  %1041 = vmatprep.mubr.bf16.mxu1 %v5729_v15  ;;  %v562_v42 = vld [vmem:[%s5696_s30 + $0x38] sm:$0xff]  ;;  %s3800_s21 = sshll.u32 %s5923_s28, 4  ;;  %s6183_s8 = scalar_lea.hbm %s6392_s11, %s4276_s14  ;;  %s6185_s21 = int_to_ptr.vmem [resolvable:$true] %s3800_s21 }
  0xe9   : > { %1012 = vmatpush1.bf16.msra.mxu1 %v4522_v3  ;;  %v4535_v12 = vld [vmem:[#allocation7 + $0xc4] ss:$16 sps:$4 sm:$0xff]   ;;  %v4537_v16 = vld [vmem:[#allocation7 + $0xc0] ss:$16 sps:$4 sm:$0xff]   ;;  %v4565_v46 = vld [vmem:[#allocation7 + $0x8] ss:$16 sps:$4 sm:$0xff]   ;;  %v5738_v47 = vpack.c.bf16 %v562_v42, %v560_v41 }
  0xea   : > { %1013 = vmatprep.subr.bf16.mxu1 %v4523_v4  ;;  %v4538_v17 = vld [vmem:[#allocation7 + $0xe4] ss:$16 sps:$4 sm:$0xff]   ;;  %v4540_v18 = vld [vmem:[#allocation7 + $0xe0] ss:$16 sps:$4 sm:$0xff]   ;;  %v4570_v48 = vld [vmem:[#allocation7 + $0x2c] ss:$16 sps:$4 sm:$0xff]  }
  0xeb   : > { %v4541_v19 = vld [vmem:[#allocation7 + $0x104] ss:$16 sps:$4 sm:$0xff]   ;;  %v4543_v20 = vld [vmem:[#allocation7 + $0x100] ss:$16 sps:$4 sm:$0xff]   ;;  %v4568_v49 = vld [vmem:[#allocation7 + $0x28] ss:$16 sps:$4 sm:$0xff]  }
  0xec   : > { %v4544_v21 = vld [vmem:[#allocation7 + $0x124] ss:$16 sps:$4 sm:$0xff]   ;;  %v4546_v22 = vld [vmem:[#allocation7 + $0x120] ss:$16 sps:$4 sm:$0xff]   ;;  %v4573_v54 = vld [vmem:[#allocation7 + $0x4c] ss:$16 sps:$4 sm:$0xff]  }
  0xed   : > { %1014 = vmatpush1.bf16.msra.mxu1 %v4525_v5  ;;  %v4547_v23 = vld [vmem:[#allocation7 + $0x144] ss:$16 sps:$4 sm:$0xff]   ;;  %v4549_v24 = vld [vmem:[#allocation7 + $0x140] ss:$16 sps:$4 sm:$0xff]   ;;  %v564_v55 = vld [vmem:[%s5696_s30 + $0x48] sm:$0xff]  ;;  %s5185_s29 = scalar_lea.vmem %s6185_s21, 2048 }
  0xee   : > { %1015 = vmatprep.subr.bf16.mxu1 %v4526_v6  ;;  %v4550_v25 = vld [vmem:[#allocation7 + $0x164] ss:$16 sps:$4 sm:$0xff]   ;;  %v4552_v26 = vld [vmem:[#allocation7 + $0x160] ss:$16 sps:$4 sm:$0xff]   ;;  %v566_v56 = vld [vmem:[%s5696_s30 + $0x58] sm:$0xff]  ;;  %p5186_p0 = scmp.ne.s32.totalorder %s6185_s21, %s5185_s29  ;;  %s5340_s10 = smov [#allocation14]  }
  0xef   : > { %v4553_v27 = vld [vmem:[#allocation7 + $0x184] ss:$16 sps:$4 sm:$0xff]   ;;  %v4555_v28 = vld [vmem:[#allocation7 + $0x180] ss:$16 sps:$4 sm:$0xff]   ;;  %v4571_v59 = vld [vmem:[#allocation7 + $0x48] ss:$16 sps:$4 sm:$0xff]   ;;  %v5748_v62 = vpack.c.bf16 %v566_v56, %v564_v55 }
  0xf0   : > { %v4556_v29 = vld [vmem:[#allocation7 + $0x1a4] ss:$16 sps:$4 sm:$0xff]   ;;  %v4558_v30 = vld [vmem:[#allocation7 + $0x1a0] ss:$16 sps:$4 sm:$0xff]   ;;  %v4576_v60 = vld [vmem:[#allocation7 + $0x6c] ss:$16 sps:$4 sm:$0xff]   ;;  %p5187_p6 = pnand %p5186_p0, %p5592_p3 }
  0xf1   : > { %1016 = vmatpush1.bf16.msra.mxu1 %v4528_v7  ;;  %v4559_v31 = vld [vmem:[#allocation7 + $0x1c4] ss:$16 sps:$4 sm:$0xff]   ;;  %v4561_v32 = vld [vmem:[#allocation7 + $0x1c0] ss:$16 sps:$4 sm:$0xff]   ;;  %v4574_v1 = vld [vmem:[#allocation7 + $0x68] ss:$16 sps:$4 sm:$0xff]  }
  0xf2   : > { %1017 = vmatprep.subr.bf16.mxu1 %v4529_v8  ;;  %v4562_v33 = vld [vmem:[#allocation7 + $0x1e4] ss:$16 sps:$4 sm:$0xff]   ;;  %v4615_v35 = vld [vmem:[#allocation8] ss:$8 sps:$4 sm:$0xff]   ;;  %v4618_v43 = vld [vmem:[#allocation8 + $0x10] ss:$8 sps:$4 sm:$0xff]   ;;  %p5188_p8 = pneg %p5187_p6 }
  0xf3   : > { %v4613_v34 = vld [vmem:[#allocation8 + $0x4] ss:$8 sps:$4 sm:$0xff]   ;;  %v4616_v36 = vld [vmem:[#allocation8 + $0x14] ss:$8 sps:$4 sm:$0xff]   ;;  %v4564_v37 = vld [vmem:[#allocation7 + $0x1e0] ss:$16 sps:$4 sm:$0xff]  }
  0xf4   : > { %v555_v38 = vld [vmem:[%s5696_s30] sm:$0xff]  ;;  %v557_v39 = vld [vmem:[%s5696_s30 + $0x10] sm:$0xff]  ;;  %1855 = vmatprep.subr.bf16.mxu0 %v4613_v34  ;;  %v4579_v4 = vld [vmem:[#allocation7 + $0x8c] ss:$16 sps:$4 sm:$0xff]  }
  0xf5   : > { %1018 = vmatpush1.bf16.msra.mxu1 %v4531_v9  ;;  %1856 = vmatpush1.bf16.msra.mxu0 %v4615_v35  ;;  %v5736_v44 = vpack.c.bf16 %v557_v39, %v555_v38  ;;  %v4619_v45 = vld [vmem:[#allocation8 + $0x24] ss:$8 sps:$4 sm:$0xff]   ;;  %v4621_v51 = vld [vmem:[#allocation8 + $0x20] ss:$8 sps:$4 sm:$0xff]   ;;  %v561_v52 = vld [vmem:[%s5696_s30 + $0x30] sm:$0xff] }
  0xf6   : > { %1019 = vmatprep.subr.bf16.mxu1 %v4532_v10  ;;  %1857 = vmatprep.subr.bf16.mxu0 %v4616_v36  ;;  %v559_v50 = vld [vmem:[%s5696_s30 + $0x20] sm:$0xff]  ;;  %v4622_v53 = vld [vmem:[#allocation8 + $0x34] ss:$8 sps:$4 sm:$0xff]   ;;  %v4624_v57 = vld [vmem:[#allocation8 + $0x30] ss:$8 sps:$4 sm:$0xff]  }
  0xf7   : > { %v5746_v58 = vpack.c.bf16 %v561_v52, %v559_v50  ;;  %v4625_v61 = vld [vmem:[#allocation8 + $0x44] ss:$8 sps:$4 sm:$0xff]   ;;  %v4627_v63 = vld [vmem:[#allocation8 + $0x40] ss:$8 sps:$4 sm:$0xff]   ;;  %v4628_v0 = vld [vmem:[#allocation8 + $0x54] ss:$8 sps:$4 sm:$0xff]  }
  0xf8   : > { %v563_v2 = vld [vmem:[%s5696_s30 + $0x40] sm:$0xff]  ;;  %v565_v3 = vld [vmem:[%s5696_s30 + $0x50] sm:$0xff]  ;;  %v568_v5 = vld [vmem:[%s5696_s30 + $0x68] sm:$0xff] }
  0xf9   : > { %1020 = vmatpush1.bf16.msra.mxu1 %v4534_v11  ;;  %1858 = vmatpush1.bf16.msra.mxu0 %v4618_v43  ;;  %v570_v6 = vld [vmem:[%s5696_s30 + $0x78] sm:$0xff]  ;;  %v4631_v8 = vld [vmem:[#allocation8 + $0x64] ss:$8 sps:$4 sm:$0xff]   ;;  %v5756_v10 = vpack.c.bf16 %v565_v3, %v563_v2  ;;  %v4633_v13 = vld [vmem:[#allocation8 + $0x60] ss:$8 sps:$4 sm:$0xff]  }
  0xfa   : > { %1021 = vmatprep.subr.bf16.mxu1 %v4535_v12  ;;  %1859 = vmatprep.subr.bf16.mxu0 %v4619_v45  ;;  %v4630_v7 = vld [vmem:[#allocation8 + $0x50] ss:$8 sps:$4 sm:$0xff]   ;;  %v4582_v11 = vld [vmem:[#allocation7 + $0xac] ss:$16 sps:$4 sm:$0xff]   ;;  %v5758_v12 = vpack.c.bf16 %v570_v6, %v568_v5  ;;  %v4645_v42 = vld [vmem:[#allocation8 + $0xa0] ss:$8 sps:$4 sm:$0xff]  }
  0xfb   : > { %v4577_v9 = vld [vmem:[#allocation7 + $0x88] ss:$16 sps:$4 sm:$0xff]   ;;  %v4634_v14 = vld [vmem:[#allocation8 + $0x74] ss:$8 sps:$4 sm:$0xff]  }
  0xfc   : > { %v576_v34 = vld [vmem:[%s5696_s30 + $0xa8] sm:$0xff]  ;;  %v578_v35 = vld [vmem:[%s5696_s30 + $0xb8] sm:$0xff] }
  0xfd   : > { %1022 = vmatpush1.bf16.msra.mxu1 %v4537_v16  ;;  %1860 = vmatpush1.bf16.msra.mxu0 %v4621_v51  ;;  %v4580_v16 = vld [vmem:[#allocation7 + $0xa8] ss:$16 sps:$4 sm:$0xff]   ;;  %v5778_v41 = vpack.c.bf16 %v578_v35, %v576_v34  ;;  %v4646_v43 = vld [vmem:[#allocation8 + $0xb4] ss:$8 sps:$4 sm:$0xff]   ;;  %v4709_v35 = vld [vmem:[#allocation10] ss:$16 sps:$4 sm:$0xff]  }
  0xfe   : > { %1023 = vmatprep.subr.bf16.mxu1 %v4538_v17  ;;  %1861 = vmatprep.subr.bf16.mxu0 %v4622_v53  ;;  %v567_v17 = vld [vmem:[%s5696_s30 + $0x60] sm:$0xff]  ;;  %v4642_v36 = vld [vmem:[#allocation8 + $0x90] ss:$8 sps:$4 sm:$0xff]   ;;  %v580_v50 = vld [vmem:[%s5696_s30 + $0xc8] sm:$0xff] }
  0xff   : > { %v4589_v38 = vld [vmem:[#allocation7 + $0x108] ss:$16 sps:$4 sm:$0xff]   ;;  %v4649_v53 = vld [vmem:[#allocation8 + $0xc4] ss:$8 sps:$4 sm:$0xff]  }
 0x100   : > { %v4592_v45 = vld [vmem:[#allocation7 + $0x128] ss:$16 sps:$4 sm:$0xff]   ;;  %v4600_v56 = vld [vmem:[#allocation7 + $0x16c] ss:$16 sps:$4 sm:$0xff]  }
 0x101   : > { %1024 = vmatpush1.bf16.msra.mxu1 %v4540_v18  ;;  %1862 = vmatpush1.bf16.msra.mxu0 %v4624_v57  ;;  %v569_v18 = vld [vmem:[%s5696_s30 + $0x70] sm:$0xff]  ;;  %v582_v51 = vld [vmem:[%s5696_s30 + $0xd8] sm:$0xff] }
 0x102   : > { %1025 = vmatprep.subr.bf16.mxu1 %v4541_v19  ;;  %1863 = vmatprep.subr.bf16.mxu0 %v4625_v61  ;;  %v4585_v19 = vld [vmem:[#allocation7 + $0xcc] ss:$16 sps:$4 sm:$0xff]   ;;  %v4648_v52 = vld [vmem:[#allocation8 + $0xb0] ss:$8 sps:$4 sm:$0xff]   ;;  %v5788_v57 = vpack.c.bf16 %v582_v51, %v580_v50  ;;  %v579_v61 = vld [vmem:[%s5696_s30 + $0xc0] sm:$0xff] }
 0x103   : > { %v586_v2 = vld [vmem:[%s5696_s30 + $0xf8] sm:$0xff] }
 0x104   : > { %v4601_v3 = vld [vmem:[#allocation7 + $0x188] ss:$16 sps:$4 sm:$0xff]   ;;  %v4606_v5 = vld [vmem:[#allocation7 + $0x1ac] ss:$16 sps:$4 sm:$0xff]  }
 0x105   : > { %1026 = vmatpush1.bf16.msra.mxu1 %v4543_v20  ;;  %1864 = vmatpush1.bf16.msra.mxu0 %v4627_v63  ;;  %v572_v20 = vld [vmem:[%s5696_s30 + $0x88] sm:$0xff]  ;;  %v581_v63 = vld [vmem:[%s5696_s30 + $0xd0] sm:$0xff] }
 0x106   : > { %1027 = vmatprep.subr.bf16.mxu1 %v4544_v21  ;;  %1865 = vmatprep.subr.bf16.mxu0 %v4628_v0  ;;  %v574_v21 = vld [vmem:[%s5696_s30 + $0x98] sm:$0xff] }
 0x107   : > { %v4603_v0 = vld [vmem:[#allocation7 + $0x18c] ss:$16 sps:$4 sm:$0xff]  }
 0x109   : > { %1028 = vmatpush1.bf16.msra.mxu1 %v4546_v22  ;;  %1866 = vmatpush1.bf16.msra.mxu0 %v4630_v7  ;;  %v4636_v22 = vld [vmem:[#allocation8 + $0x70] ss:$8 sps:$4 sm:$0xff]  }
 0x10a   : > { %1029 = vmatprep.subr.bf16.mxu1 %v4547_v23  ;;  %1867 = vmatprep.subr.bf16.mxu0 %v4631_v8  ;;  %v4637_v23 = vld [vmem:[#allocation8 + $0x84] ss:$8 sps:$4 sm:$0xff]   ;;  %v4604_v7 = vld [vmem:[#allocation7 + $0x1a8] ss:$16 sps:$4 sm:$0xff]  }
 0x10b   : > { %v583_v8 = vld [vmem:[%s5696_s30 + $0xe0] sm:$0xff] }
 0x10d   : > { %1030 = vmatpush1.bf16.msra.mxu1 %v4549_v24  ;;  %v4583_v24 = vld [vmem:[#allocation7 + $0xc8] ss:$16 sps:$4 sm:$0xff]   ;;  %1868 = vmatpush1.bf16.msra.mxu0 %v4633_v13 }
 0x10e   : > { %1031 = vmatprep.subr.bf16.mxu1 %v4550_v25  ;;  %v5766_v25 = vpack.c.bf16 %v569_v18, %v567_v17  ;;  %1869 = vmatprep.subr.bf16.mxu0 %v4634_v14  ;;  %v4607_v14 = vld [vmem:[#allocation7 + $0x1c8] ss:$16 sps:$4 sm:$0xff]   ;;  %v4652_v18 = vld [vmem:[#allocation8 + $0xd4] ss:$8 sps:$4 sm:$0xff]  }
 0x10f   : > { %v4610_v17 = vld [vmem:[#allocation7 + $0x1e8] ss:$16 sps:$4 sm:$0xff]  }
 0x111   : > { %1032 = vmatpush1.bf16.msra.mxu1 %v4552_v26  ;;  %v4588_v26 = vld [vmem:[#allocation7 + $0xec] ss:$16 sps:$4 sm:$0xff]   ;;  %1870 = vmatpush1.bf16.msra.mxu0 %v4636_v22 }
 0x112   : > { %1033 = vmatprep.subr.bf16.mxu1 %v4553_v27  ;;  %v5768_v27 = vpack.c.bf16 %v574_v21, %v572_v20  ;;  %1871 = vmatprep.subr.bf16.mxu0 %v4637_v23  ;;  %v4655_v20 = vld [vmem:[#allocation8 + $0xe4] ss:$8 sps:$4 sm:$0xff]   ;;  %v5819_v21 = vld [vmem:[%s6384_s3] sm:$0xf] }
 0x115   : > { %1034 = vmatpush1.bf16.msra.mxu1 %v4555_v28  ;;  %v4639_v28 = vld [vmem:[#allocation8 + $0x80] ss:$8 sps:$4 sm:$0xff]  }
 0x116   : > { %1035 = vmatprep.subr.bf16.mxu1 %v4556_v29  ;;  %v4640_v29 = vld [vmem:[#allocation8 + $0x94] ss:$8 sps:$4 sm:$0xff]   ;;  %1872 = vmatpush1.bf16.msra.mxu0 %v4639_v28 }
 0x117   : > { %1873 = vmatprep.subr.bf16.mxu0 %v4640_v29 }
 0x119   : > { %1036 = vmatpush1.bf16.msra.mxu1 %v4558_v30  ;;  %v4586_v30 = vld [vmem:[#allocation7 + $0xe8] ss:$16 sps:$4 sm:$0xff]  }
 0x11a   : > { %1037 = vmatprep.subr.bf16.mxu1 %v4559_v31  ;;  %v571_v31 = vld [vmem:[%s5696_s30 + $0x80] sm:$0xff]  ;;  %1874 = vmatpush1.bf16.msra.mxu0 %v4642_v36 }
 0x11d   : > { %1038 = vmatpush1.bf16.msra.mxu1 %v4561_v32  ;;  %v573_v32 = vld [vmem:[%s5696_s30 + $0x90] sm:$0xff] }
 0x11e   : > { %1039 = vmatprep.subr.bf16.mxu1 %v4562_v33  ;;  %v4591_v33 = vld [vmem:[#allocation7 + $0x10c] ss:$16 sps:$4 sm:$0xff]   ;;  %v5776_v39 = vpack.c.bf16 %v573_v32, %v571_v31 }
 0x121   : > { %1040 = vmatpush1.bf16.msra.mxu1 %v4564_v37  ;;  %v4643_v37 = vld [vmem:[#allocation8 + $0xa4] ss:$8 sps:$4 sm:$0xff]  }
 0x122   : > { %1122 = vmatprep.subr.bf16.mxu1 %v4567_v40  ;;  %v4594_v40 = vld [vmem:[#allocation7 + $0x12c] ss:$16 sps:$4 sm:$0xff]   ;;  %1875 = vmatprep.subr.bf16.mxu0 %v4643_v37  ;;  %v4711_v37 = vld [vmem:[#allocation10 + $0x4] ss:$16 sps:$4 sm:$0xff]  }
 0x123   : > { %1876 = vmatpush1.bf16.msra.mxu0 %v4645_v42 }
 0x124   : > { %1042 = vmatmul.mubr.bf16.vlgmr.msra.gmra.mrb[0].mxu1 %v5736_v44  ;;  %1877 = vmatprep.subr.bf16.mxu0 %v4646_v43 }
 0x125   : > { %1123 = vmatpush1.bf16.msra.mxu1 %v4565_v46  ;;  %1051 = vmatprep.mubr.bf16.mxu1 %v5738_v47  ;;  %v575_v46 = vld [vmem:[%s5696_s30 + $0xa0] sm:$0xff] }
 0x126   : > { %1124 = vmatprep.subr.bf16.mxu1 %v4570_v48  ;;  %v577_v48 = vld [vmem:[%s5696_s30 + $0xb0] sm:$0xff] }
 0x127   : > { %v5786_v55 = vpack.c.bf16 %v577_v48, %v575_v46  ;;  %1878 = vmatpush1.bf16.msra.mxu0 %v4648_v52  ;;  %v4712_v48 = vld [vmem:[#allocation10 + $0x20] ss:$16 sps:$4 sm:$0xff]  }
 0x128   : > { %1879 = vmatprep.subr.bf16.mxu0 %v4649_v53  ;;  %v4661_v52 = vld [vmem:[#allocation8 + $0x100] ss:$8 sps:$4 sm:$0xff]   ;;  %v4717_v53 = vld [vmem:[#allocation10 + $0x44] ss:$16 sps:$4 sm:$0xff]  }
 0x129   : > { %1125 = vmatpush1.bf16.msra.mxu1 %v4568_v49  ;;  %v4597_v49 = vld [vmem:[#allocation7 + $0x14c] ss:$16 sps:$4 sm:$0xff]  }
 0x12a   : > { %1126 = vmatprep.subr.bf16.mxu1 %v4573_v54  ;;  %v4595_v54 = vld [vmem:[#allocation7 + $0x148] ss:$16 sps:$4 sm:$0xff]  }
 0x12c   : > { %1052 = vmatmul.mubr.bf16.gmra.mrb[4].mxu1 %v5746_v58 }
 0x12d   : > { %1127 = vmatpush1.bf16.msra.mxu1 %v4571_v59  ;;  %1061 = vmatprep.mubr.bf16.mxu1 %v5748_v62  ;;  %v4651_v59 = vld [vmem:[#allocation8 + $0xc0] ss:$8 sps:$4 sm:$0xff]  }
 0x12e   : > { %1128 = vmatprep.subr.bf16.mxu1 %v4576_v60  ;;  %v4598_v60 = vld [vmem:[#allocation7 + $0x168] ss:$16 sps:$4 sm:$0xff]   ;;  %1880 = vmatpush1.bf16.msra.mxu0 %v4651_v59 }
 0x12f   : > { %1881 = vmatprep.subr.bf16.mxu0 %v4652_v18 }
 0x131   : > { %1129 = vmatpush1.bf16.msra.mxu1 %v4574_v1  ;;  %v584_v1 = vld [vmem:[%s5696_s30 + $0xe8] sm:$0xff] }
 0x132   : > { %1130 = vmatprep.subr.bf16.mxu1 %v4579_v4  ;;  %v599_v4 = vpack.c.bf16 %v581_v63, %v579_v61  ;;  %v602_v6 = vpack.c.bf16 %v586_v2, %v584_v1  ;;  %v4664_v61 = vld [vmem:[#allocation8 + $0x110] ss:$8 sps:$4 sm:$0xff]  }
 0x133   : > { %v4715_v1 = vld [vmem:[#allocation10 + $0x40] ss:$16 sps:$4 sm:$0xff]  }
 0x134   : > { %1062 = vmatmul.mubr.bf16.gmra.mrb[8].mxu1 %v5756_v10 }
 0x135   : > { %1131 = vmatpush1.bf16.msra.mxu1 %v4577_v9  ;;  %1071 = vmatprep.mubr.bf16.mxu1 %v5758_v12  ;;  %v585_v9 = vld [vmem:[%s5696_s30 + $0xf0] sm:$0xff]  ;;  %s6189_s30 = scalar_lea.sflag [#allocation15], %s473_s0 }
 0x136   : > { %1132 = vmatprep.subr.bf16.mxu1 %v4582_v11  ;;  %v4609_v11 = vld [vmem:[#allocation7 + $0x1cc] ss:$16 sps:$4 sm:$0xff]   ;;  %v601_v13 = vpack.c.bf16 %v585_v9, %v583_v8 }
 0x139   : > { %1133 = vmatpush1.bf16.msra.mxu1 %v4580_v16  ;;  %v4612_v16 = vld [vmem:[#allocation7 + $0x1ec] ss:$16 sps:$4 sm:$0xff]  }
 0x13a   : > { %1134 = vmatprep.subr.bf16.mxu1 %v4585_v19  ;;  %v4654_v19 = vld [vmem:[#allocation8 + $0xd0] ss:$8 sps:$4 sm:$0xff]  }
 0x13b   : > { %1882 = vmatpush1.bf16.msra.mxu0 %v4654_v19  ;;  %v4667_v19 = vld [vmem:[#allocation8 + $0x120] ss:$8 sps:$4 sm:$0xff]  }
 0x13c   : > { %1072 = vmatmul.mubr.bf16.gmra.mrb[12].mxu1 %v5766_v25  ;;  %1883 = vmatprep.subr.bf16.mxu0 %v4655_v20  ;;  %v4723_v20 = vld [vmem:[#allocation10 + $0x84] ss:$16 sps:$4 sm:$0xff]  }
 0x13d   : > { %1135 = vmatpush1.bf16.msra.mxu1 %v4583_v24  ;;  %1081 = vmatprep.mubr.bf16.mxu1 %v5768_v27 }
 0x13e   : > { %1136 = vmatprep.subr.bf16.mxu1 %v4588_v26 }
 0x141   : > { %1137 = vmatpush1.bf16.msra.mxu1 %v4586_v30 }
 0x142   : > { %1138 = vmatprep.subr.bf16.mxu1 %v4591_v33 }
 0x144   : > { %1082 = vmatmul.mubr.bf16.gmra.mrb[16].mxu1 %v5776_v39 }
 0x145   : > { %1139 = vmatpush1.bf16.msra.mxu1 %v4589_v38  ;;  %1091 = vmatprep.mubr.bf16.mxu1 %v5778_v41 }
 0x146   : > { %1140 = vmatprep.subr.bf16.mxu1 %v4594_v40 }
 0x149   : > { %1141 = vmatpush1.bf16.msra.mxu1 %v4592_v45 }
 0x14a   : > { %1142 = vmatprep.subr.bf16.mxu1 %v4597_v49 }
 0x14c   : > { %1092 = vmatmul.mubr.bf16.gmra.mrb[20].mxu1 %v5786_v55 }
 0x14d   : > { %1143 = vmatpush1.bf16.msra.mxu1 %v4595_v54  ;;  %1101 = vmatprep.mubr.bf16.mxu1 %v5788_v57 }
 0x14e   : > { %1144 = vmatprep.subr.bf16.mxu1 %v4600_v56  ;;  %v4666_v56 = vld [vmem:[#allocation8 + $0x114] ss:$8 sps:$4 sm:$0xff]  }
 0x151   : > { %1145 = vmatpush1.bf16.msra.mxu1 %v4598_v60 }
 0x152   : > { %1146 = vmatprep.subr.bf16.mxu1 %v4603_v0 }
 0x154   : > { %1102 = vmatmul.mubr.bf16.gmra.mrb[24].mxu1 %v599_v4 }
 0x155   : > { %1147 = vmatpush1.bf16.msra.mxu1 %v4601_v3  ;;  %1111 = vmatprep.mubr.bf16.mxu1 %v602_v6  ;;  %v4720_v3 = vld [vmem:[#allocation10 + $0x64] ss:$16 sps:$4 sm:$0xff]  }
 0x156   : > { %1148 = vmatprep.subr.bf16.mxu1 %v4606_v5  ;;  %v4669_v5 = vld [vmem:[#allocation8 + $0x124] ss:$8 sps:$4 sm:$0xff]  }
 0x159   : > { %1149 = vmatpush1.bf16.msra.mxu1 %v4604_v7 }
 0x15a   : > { %1150 = vmatprep.subr.bf16.mxu1 %v4609_v11 }
 0x15c   : > { %1112 = vmatmul.mubr.bf16.gmra.mrb[28].mxu1 %v601_v13 }
 0x15d   : > { %1151 = vmatpush1.bf16.msra.mxu1 %v4607_v14  ;;  %1154 = vmatprep.mubr.bf16.mxu1 %v5729_v15  ;;  %v4657_v15 = vld [vmem:[#allocation8 + $0xe0] ss:$8 sps:$4 sm:$0xff]  }
 0x15e   : > { %1152 = vmatprep.subr.bf16.mxu1 %v4612_v16  ;;  %1884 = vmatpush1.bf16.msra.mxu0 %v4657_v15  ;;  %v4718_v14 = vld [vmem:[#allocation10 + $0x60] ss:$16 sps:$4 sm:$0xff]  }
 0x161   : > { %1153 = vmatpush1.bf16.msra.mxu1 %v4610_v17 }
 0x162   : > { %2399 = vmatprep.subr.bf16.mxu1 %v4711_v37 }
 0x164   : > { %1155 = vmatmul.mubr.bf16.vlgmr.msra.gmra.mrb[32].mxu1 %v5736_v44  ;;  %v4658_v44 = vld [vmem:[#allocation8 + $0xf4] ss:$8 sps:$4 sm:$0xff]  }
 0x165   : > { %1164 = vmatprep.mubr.bf16.mxu1 %v5738_v47  ;;  %v4660_v47 = vld [vmem:[#allocation8 + $0xf0] ss:$8 sps:$4 sm:$0xff]   ;;  %1885 = vmatprep.subr.bf16.mxu0 %v4658_v44 }
 0x166   : > { %1886 = vmatpush1.bf16.msra.mxu0 %v4660_v47  ;;  %2400 = vmatpush1.bf16.msra.mxu1 %v4709_v35  ;;  %v4672_v47 = vld [vmem:[#allocation8 + $0x134] ss:$8 sps:$4 sm:$0xff]  }
 0x16c   : > { %1165 = vmatmul.mubr.bf16.gmra.mrb[36].mxu1 %v5746_v58  ;;  %v4663_v58 = vld [vmem:[#allocation8 + $0x104] ss:$8 sps:$4 sm:$0xff]  }
 0x16d   : > { %1174 = vmatprep.mubr.bf16.mxu1 %v5748_v62  ;;  %1968 = vmatprep.subr.bf16.mxu0 %v4663_v58  ;;  %v669_v62 = vlaneseq }
 0x174   : > { %1175 = vmatmul.mubr.bf16.gmra.mrb[40].mxu1 %v5756_v10  ;;  %v5811_v10 = vshrl.u32 %v669_v62, 7 }
 0x175   : > { %1184 = vmatprep.mubr.bf16.mxu1 %v5758_v12 }
 0x176   : > { %v5814_v12 = vsub.s32 0, %v5811_v10  ;;  %v5822_v22 = vsub.s32 1, %v5811_v10 }
 0x178   : > { %v5826_v23 = vrot.slane %v5819_v21, %v5814_v12  ;;  %v5830_v24 = vrot.slane %v5819_v21, %v5822_v22 }
 0x17c   : > { %1185 = vmatmul.mubr.bf16.gmra.mrb[44].mxu1 %v5766_v25 }
 0x17d   : > { %1194 = vmatprep.mubr.bf16.mxu1 %v5768_v27 }
 0x184   : > { %1195 = vmatmul.mubr.bf16.gmra.mrb[48].mxu1 %v5776_v39 }
 0x185   : > { %1204 = vmatprep.mubr.bf16.mxu1 %v5778_v41  ;;  %v4714_v41 = vld [vmem:[#allocation10 + $0x24] ss:$16 sps:$4 sm:$0xff]  }
 0x186   : > { %2401 = vmatprep.subr.bf16.mxu1 %v4714_v41 }
 0x187   : > { %2402 = vmatpush1.bf16.msra.mxu1 %v4712_v48 }
 0x188   : > { %2403 = vmatprep.subr.bf16.mxu1 %v4717_v53 }
 0x18b   : > { %2404 = vmatpush1.bf16.msra.mxu1 %v4715_v1 }
 0x18c   : > { %1205 = vmatmul.mubr.bf16.gmra.mrb[52].mxu1 %v5786_v55  ;;  %2405 = vmatprep.subr.bf16.mxu1 %v4720_v3 }
 0x18d   : > { %1214 = vmatprep.mubr.bf16.mxu1 %v5788_v57 }
 0x18f   : > { %2406 = vmatpush1.bf16.msra.mxu1 %v4718_v14 }
 0x190   : > { %2407 = vmatprep.subr.bf16.mxu1 %v4723_v20 }
 0x194   : > { %1215 = vmatmul.mubr.bf16.gmra.mrb[56].mxu1 %v599_v4 }
 0x195   : > { %1224 = vmatprep.mubr.bf16.mxu1 %v602_v6 }
 0x19c   : > { %1225 = vmatmul.mubr.bf16.gmra.mrb[60].mxu1 %v601_v13 }
 0x1f7   : > { %v1043_v25 = vpop.f32.mrb[0].mxu1 }
 0x1f8   : > { %v1044_v26 = vadd.f32 %v1043_v25, %v5826_v23  ;;  %v1045_v27 = vpop.f32.mrb[1].mxu1 }
 0x1f9   : > { %v1046_v28 = vadd.f32 %v1045_v27, %v5830_v24  ;;  %v1047_v29 = vpop.f32.mrb[2].mxu1 }
 0x1fa   : > { %v1299_v30 = vmul.f32 0.2, %v1044_v26  ;;  %v1048_v31 = vadd.f32 %v1047_v29, %v5826_v23  ;;  %v1049_v32 = vpop.f32.mrb[3].mxu1  ;;  %vm1235_vm0 = vcmp.ge.f32.partialorder %v1044_v26, 0.0 }
 0x1fb   : > { %v1300_v33 = vmul.f32 0.2, %v1046_v28  ;;  %v1050_v34 = vadd.f32 %v1049_v32, %v5830_v24  ;;  %vm1236_vm2 = vcmp.ge.f32.partialorder %v1046_v28, 0.0  ;;  %v4675_v32 = vld [vmem:[#allocation8 + $0x144] ss:$8 sps:$4 sm:$0xff]  }
 0x1fc   : > { %vm1239_vm1 = vcmp.ge.f32.partialorder %v1048_v31, 0.0  ;;  %v1303_v36 = vmul.f32 0.2, %v1048_v31  ;;  %v1363_v39 = vsel %vm1235_vm0, %v1044_v26, %v1299_v30  ;;  %v4670_v30 = vld [vmem:[#allocation8 + $0x130] ss:$8 sps:$4 sm:$0xff]  }
 0x1fd   : > { %v1304_v38 = vmul.f32 0.2, %v1050_v34  ;;  %vm1240_vm3 = vcmp.ge.f32.partialorder %v1050_v34, 0.0  ;;  %v1364_v43 = vsel %vm1236_vm2, %v1046_v28, %v1300_v33  ;;  %v4721_v28 = vld [vmem:[#allocation10 + $0x80] ss:$16 sps:$4 sm:$0xff]  }
 0x1fe   : > { %v1367_v40 = vsel %vm1239_vm1, %v1048_v31, %v1303_v36  ;;  %2408 = vmatpush1.bf16.msra.mxu1 %v4721_v28  ;;  %v4685_v28 = vld [vmem:[#allocation8 + $0x180] ss:$8 sps:$4 sm:$0xff]  }
 0x1ff   : > { %v1053_v42 = vpop.f32.mrb[4].mxu1  ;;  %v1368_v45 = vsel %vm1240_vm3, %v1050_v34, %v1304_v38  ;;  %v1427_v46 = vpack.c.bf16 %v1367_v40, %v1363_v39 }
 0x200   : > { %v1054_v49 = vadd.f32 %v1053_v42, %v5826_v23  ;;  %v1055_v50 = vpop.f32.mrb[5].mxu1  ;;  %v1428_v51 = vpack.c.bf16 %v1368_v45, %v1364_v43  ;;  %v4673_v42 = vld [vmem:[#allocation8 + $0x140] ss:$8 sps:$4 sm:$0xff]  }
 0x201   : > { %v1056_v54 = vadd.f32 %v1055_v50, %v5830_v24  ;;  %v1057_v55 = vpop.f32.mrb[6].mxu1 }
 0x202   : > { %v1307_v57 = vmul.f32 0.2, %v1054_v49  ;;  %v1058_v59 = vadd.f32 %v1057_v55, %v5826_v23  ;;  %v1059_v60 = vpop.f32.mrb[7].mxu1  ;;  %1887 = vmatprep.mubr.bf16.mxu0 %v1428_v51  ;;  %vm1243_vm4 = vcmp.ge.f32.partialorder %v1054_v49, 0.0 }
 0x203   : > { %v1308_v63 = vmul.f32 0.2, %v1056_v54  ;;  %v1060_v0 = vadd.f32 %v1059_v60, %v5830_v24  ;;  %1888 = vmatmul.mubr.bf16.vlgmr.msra.gmra.mrb[0].mxu0 %v1427_v46  ;;  %vm1244_vm5 = vcmp.ge.f32.partialorder %v1056_v54, 0.0  ;;  %v4678_v46 = vld [vmem:[#allocation8 + $0x154] ss:$8 sps:$4 sm:$0xff]  }
 0x204   : > { %vm1247_vm6 = vcmp.ge.f32.partialorder %v1058_v59, 0.0  ;;  %v1311_v2 = vmul.f32 0.2, %v1058_v59  ;;  %1969 = vmatpush1.bf16.msra.mxu0 %v4661_v52  ;;  %v1371_v6 = vsel %vm1243_vm4, %v1054_v49, %v1307_v57 }
 0x205   : > { %vm1248_vm7 = vcmp.ge.f32.partialorder %v1060_v0, 0.0  ;;  %v1312_v4 = vmul.f32 0.2, %v1060_v0  ;;  %1970 = vmatprep.subr.bf16.mxu0 %v4666_v56  ;;  %v1372_v9 = vsel %vm1244_vm5, %v1056_v54, %v1308_v63  ;;  %v4676_v54 = vld [vmem:[#allocation8 + $0x150] ss:$8 sps:$4 sm:$0xff]  }
 0x206   : > { %v1375_v7 = vsel %vm1247_vm6, %v1058_v59, %v1311_v2  ;;  %v4681_v56 = vld [vmem:[#allocation8 + $0x164] ss:$8 sps:$4 sm:$0xff]  }
 0x207   : > { %v1063_v8 = vpop.f32.mrb[8].mxu1  ;;  %v1376_v11 = vsel %vm1248_vm7, %v1060_v0, %v1312_v4  ;;  %v1431_v13 = vpack.c.bf16 %v1375_v7, %v1371_v6  ;;  %v4679_v4 = vld [vmem:[#allocation8 + $0x160] ss:$8 sps:$4 sm:$0xff]   ;;  %v4684_v7 = vld [vmem:[#allocation8 + $0x174] ss:$8 sps:$4 sm:$0xff]  }
 0x208   : > { %v1064_v16 = vadd.f32 %v1063_v8, %v5826_v23  ;;  %v1065_v17 = vpop.f32.mrb[9].mxu1  ;;  %1971 = vmatpush1.bf16.msra.mxu0 %v4664_v61  ;;  %v1432_v18 = vpack.c.bf16 %v1376_v11, %v1372_v9 }
 0x209   : > { %v1066_v15 = vadd.f32 %v1065_v17, %v5830_v24  ;;  %v1067_v44 = vpop.f32.mrb[10].mxu1  ;;  %1972 = vmatprep.subr.bf16.mxu0 %v4669_v5  ;;  %v4682_v17 = vld [vmem:[#allocation8 + $0x170] ss:$8 sps:$4 sm:$0xff]  }
 0x20a   : > { %v1315_v58 = vmul.f32 0.2, %v1064_v16  ;;  %v1068_v62 = vadd.f32 %v1067_v44, %v5826_v23  ;;  %v1069_v25 = vpop.f32.mrb[11].mxu1  ;;  %1897 = vmatprep.mubr.bf16.mxu0 %v1432_v18  ;;  %vm1251_vm8 = vcmp.ge.f32.partialorder %v1064_v16, 0.0 }
 0x20b   : > { %v1316_v26 = vmul.f32 0.2, %v1066_v15  ;;  %v1070_v27 = vadd.f32 %v1069_v25, %v5830_v24  ;;  %1898 = vmatmul.mubr.bf16.gmra.mrb[4].mxu0 %v1431_v13  ;;  %vm1252_vm9 = vcmp.ge.f32.partialorder %v1066_v15, 0.0 }
 0x20c   : > { %vm1255_vm10 = vcmp.ge.f32.partialorder %v1068_v62, 0.0  ;;  %v1319_v29 = vmul.f32 0.2, %v1068_v62  ;;  %1973 = vmatpush1.bf16.msra.mxu0 %v4667_v19  ;;  %v1379_v33 = vsel %vm1251_vm8, %v1064_v16, %v1315_v58  ;;  %v4687_v19 = vld [vmem:[#allocation8 + $0x184] ss:$8 sps:$4 sm:$0xff]  }
 0x20d   : > { %vm1256_vm11 = vcmp.ge.f32.partialorder %v1070_v27, 0.0  ;;  %v1320_v31 = vmul.f32 0.2, %v1070_v27  ;;  %1974 = vmatprep.subr.bf16.mxu0 %v4672_v47  ;;  %v1380_v36 = vsel %vm1252_vm9, %v1066_v15, %v1316_v26 }
 0x20e   : > { %v1383_v34 = vsel %vm1255_vm10, %v1068_v62, %v1319_v29 }
 0x20f   : > { %v1073_v35 = vpop.f32.mrb[12].mxu1  ;;  %v1384_v37 = vsel %vm1256_vm11, %v1070_v27, %v1320_v31  ;;  %v1435_v38 = vpack.c.bf16 %v1383_v34, %v1379_v33  ;;  %v4690_v31 = vld [vmem:[#allocation8 + $0x194] ss:$8 sps:$4 sm:$0xff]  }
 0x210   : > { %v1074_v39 = vadd.f32 %v1073_v35, %v5826_v23  ;;  %v1075_v40 = vpop.f32.mrb[13].mxu1  ;;  %1975 = vmatpush1.bf16.msra.mxu0 %v4670_v30  ;;  %v1436_v41 = vpack.c.bf16 %v1384_v37, %v1380_v36 }
 0x211   : > { %v1076_v43 = vadd.f32 %v1075_v40, %v5830_v24  ;;  %v1077_v45 = vpop.f32.mrb[14].mxu1  ;;  %1976 = vmatprep.subr.bf16.mxu0 %v4675_v32  ;;  %v4693_v40 = vld [vmem:[#allocation8 + $0x1a4] ss:$8 sps:$4 sm:$0xff]  }
 0x212   : > { %v1323_v48 = vmul.f32 0.2, %v1074_v39  ;;  %v1078_v49 = vadd.f32 %v1077_v45, %v5826_v23  ;;  %v1079_v50 = vpop.f32.mrb[15].mxu1  ;;  %1907 = vmatprep.mubr.bf16.mxu0 %v1436_v41  ;;  %vm1259_vm12 = vcmp.ge.f32.partialorder %v1074_v39, 0.0 }
 0x213   : > { %v1324_v51 = vmul.f32 0.2, %v1076_v43  ;;  %v1080_v52 = vadd.f32 %v1079_v50, %v5830_v24  ;;  %1908 = vmatmul.mubr.bf16.gmra.mrb[8].mxu0 %v1435_v38  ;;  %vm1260_vm13 = vcmp.ge.f32.partialorder %v1076_v43, 0.0  ;;  %v4688_v38 = vld [vmem:[#allocation8 + $0x190] ss:$8 sps:$4 sm:$0xff]  }
 0x214   : > { %vm1263_vm14 = vcmp.ge.f32.partialorder %v1078_v49, 0.0  ;;  %v1327_v53 = vmul.f32 0.2, %v1078_v49  ;;  %1977 = vmatpush1.bf16.msra.mxu0 %v4673_v42  ;;  %v1387_v57 = vsel %vm1259_vm12, %v1074_v39, %v1323_v48 }
 0x215   : > { %vm1264_vm15 = vcmp.ge.f32.partialorder %v1080_v52, 0.0  ;;  %v1328_v55 = vmul.f32 0.2, %v1080_v52  ;;  %1978 = vmatprep.subr.bf16.mxu0 %v4678_v46  ;;  %v1388_v61 = vsel %vm1260_vm13, %v1076_v43, %v1324_v51 }
 0x216   : > { %v1391_v59 = vsel %vm1263_vm14, %v1078_v49, %v1327_v53 }
 0x217   : > { %v1083_v60 = vpop.f32.mrb[16].mxu1  ;;  %v1392_v63 = vsel %vm1264_vm15, %v1080_v52, %v1328_v55  ;;  %v1439_v0 = vpack.c.bf16 %v1391_v59, %v1387_v57  ;;  %v4691_v52 = vld [vmem:[#allocation8 + $0x1a0] ss:$8 sps:$4 sm:$0xff]   ;;  %v4696_v55 = vld [vmem:[#allocation8 + $0x1b4] ss:$8 sps:$4 sm:$0xff]  }
 0x218   : > { %v1084_v1 = vadd.f32 %v1083_v60, %v5826_v23  ;;  %v1085_v2 = vpop.f32.mrb[17].mxu1  ;;  %1979 = vmatpush1.bf16.msra.mxu0 %v4676_v54  ;;  %v1440_v3 = vpack.c.bf16 %v1392_v63, %v1388_v61 }
 0x219   : > { %v1086_v5 = vadd.f32 %v1085_v2, %v5830_v24  ;;  %v1087_v6 = vpop.f32.mrb[18].mxu1  ;;  %1980 = vmatprep.subr.bf16.mxu0 %v4681_v56  ;;  %v4699_v2 = vld [vmem:[#allocation8 + $0x1c4] ss:$8 sps:$4 sm:$0xff]  }
 0x21a   : > { %v1331_v8 = vmul.f32 0.2, %v1084_v1  ;;  %v1088_v9 = vadd.f32 %v1087_v6, %v5826_v23  ;;  %v1089_v11 = vpop.f32.mrb[19].mxu1  ;;  %1917 = vmatprep.mubr.bf16.mxu0 %v1440_v3  ;;  %vm1267_vm0 = vcmp.ge.f32.partialorder %v1084_v1, 0.0 }
 0x21b   : > { %v1332_v13 = vmul.f32 0.2, %v1086_v5  ;;  %v1090_v14 = vadd.f32 %v1089_v11, %v5830_v24  ;;  %1918 = vmatmul.mubr.bf16.gmra.mrb[12].mxu0 %v1439_v0  ;;  %vm1268_vm1 = vcmp.ge.f32.partialorder %v1086_v5, 0.0  ;;  %v4694_v0 = vld [vmem:[#allocation8 + $0x1b0] ss:$8 sps:$4 sm:$0xff]  }
 0x21c   : > { %vm1271_vm2 = vcmp.ge.f32.partialorder %v1088_v9, 0.0  ;;  %v1335_v16 = vmul.f32 0.2, %v1088_v9  ;;  %1981 = vmatpush1.bf16.msra.mxu0 %v4679_v4  ;;  %v1395_v20 = vsel %vm1267_vm0, %v1084_v1, %v1331_v8 }
 0x21d   : > { %vm1272_vm3 = vcmp.ge.f32.partialorder %v1090_v14, 0.0  ;;  %v1336_v18 = vmul.f32 0.2, %v1090_v14  ;;  %1982 = vmatprep.subr.bf16.mxu0 %v4684_v7  ;;  %v1396_v47 = vsel %vm1268_vm1, %v1086_v5, %v1332_v13 }
 0x21e   : > { %v1399_v15 = vsel %vm1271_vm2, %v1088_v9, %v1335_v16  ;;  %v679_v16 = vsub.s32 2, %v5811_v10 }
 0x21f   : > { %v1093_v44 = vpop.f32.mrb[20].mxu1  ;;  %v1400_v58 = vsel %vm1272_vm3, %v1090_v14, %v1336_v18  ;;  %v1443_v62 = vpack.c.bf16 %v1399_v15, %v1395_v20  ;;  %v4697_v14 = vld [vmem:[#allocation8 + $0x1c0] ss:$8 sps:$4 sm:$0xff]   ;;  %v683_v20 = vsub.s32 3, %v5811_v10  ;;  %v4852_v10 = vld [vmem:[#allocation11 + $0x1f4] ss:$8 sps:$4 sm:$0xff]  }
 0x220   : > { %v1094_v25 = vadd.f32 %v1093_v44, %v5826_v23  ;;  %v1095_v26 = vpop.f32.mrb[21].mxu1  ;;  %1983 = vmatpush1.bf16.msra.mxu0 %v4682_v17  ;;  %v1444_v27 = vpack.c.bf16 %v1400_v58, %v1396_v47 }
 0x221   : > { %v1096_v29 = vadd.f32 %v1095_v26, %v5830_v24  ;;  %v1097_v30 = vpop.f32.mrb[22].mxu1  ;;  %1984 = vmatprep.subr.bf16.mxu0 %v4687_v19  ;;  %v4702_v19 = vld [vmem:[#allocation8 + $0x1d4] ss:$8 sps:$4 sm:$0xff]   ;;  %v5871_v26 = vrot.slane %v5819_v21, %v679_v16 }
 0x222   : > { %v1339_v32 = vmul.f32 0.2, %v1094_v25  ;;  %v1098_v33 = vadd.f32 %v1097_v30, %v5826_v23  ;;  %v1099_v34 = vpop.f32.mrb[23].mxu1  ;;  %1927 = vmatprep.mubr.bf16.mxu0 %v1444_v27  ;;  %vm1275_vm4 = vcmp.ge.f32.partialorder %v1094_v25, 0.0  ;;  %v4700_v27 = vld [vmem:[#allocation8 + $0x1d0] ss:$8 sps:$4 sm:$0xff]  }
 0x223   : > { %v1340_v35 = vmul.f32 0.2, %v1096_v29  ;;  %v1100_v36 = vadd.f32 %v1099_v34, %v5830_v24  ;;  %1928 = vmatmul.mubr.bf16.gmra.mrb[16].mxu0 %v1443_v62  ;;  %vm1276_vm5 = vcmp.ge.f32.partialorder %v1096_v29, 0.0 }
 0x224   : > { %vm1279_vm6 = vcmp.ge.f32.partialorder %v1098_v33, 0.0  ;;  %v1343_v37 = vmul.f32 0.2, %v1098_v33  ;;  %1985 = vmatpush1.bf16.msra.mxu0 %v4685_v28  ;;  %v1403_v41 = vsel %vm1275_vm4, %v1094_v25, %v1339_v32 }
 0x225   : > { %vm1280_vm7 = vcmp.ge.f32.partialorder %v1100_v36, 0.0  ;;  %v1344_v39 = vmul.f32 0.2, %v1100_v36  ;;  %1986 = vmatprep.subr.bf16.mxu0 %v4690_v31  ;;  %v1404_v45 = vsel %vm1276_vm5, %v1096_v29, %v1340_v35 }
 0x226   : > { %v1407_v42 = vsel %vm1279_vm6, %v1098_v33, %v1343_v37 }
 0x227   : > { %v1103_v43 = vpop.f32.mrb[24].mxu1  ;;  %v1408_v46 = vsel %vm1280_vm7, %v1100_v36, %v1344_v39  ;;  %v1447_v48 = vpack.c.bf16 %v1407_v42, %v1403_v41  ;;  %v4708_v41 = vld [vmem:[#allocation8 + $0x1f4] ss:$8 sps:$4 sm:$0xff]  }
 0x228   : > { %v1104_v49 = vadd.f32 %v1103_v43, %v5826_v23  ;;  %v1105_v50 = vpop.f32.mrb[25].mxu1  ;;  %1987 = vmatpush1.bf16.msra.mxu0 %v4688_v38  ;;  %v1448_v51 = vpack.c.bf16 %v1408_v46, %v1404_v45  ;;  %v4703_v38 = vld [vmem:[#allocation8 + $0x1e0] ss:$8 sps:$4 sm:$0xff]  }
 0x229   : > { %v1106_v53 = vadd.f32 %v1105_v50, %v5830_v24  ;;  %v1107_v54 = vpop.f32.mrb[26].mxu1  ;;  %1988 = vmatprep.subr.bf16.mxu0 %v4693_v40 }
 0x22a   : > { %v1347_v56 = vmul.f32 0.2, %v1104_v49  ;;  %v1108_v57 = vadd.f32 %v1107_v54, %v5826_v23  ;;  %v1109_v59 = vpop.f32.mrb[27].mxu1  ;;  %1937 = vmatprep.mubr.bf16.mxu0 %v1448_v51  ;;  %vm1283_vm8 = vcmp.ge.f32.partialorder %v1104_v49, 0.0 }
 0x22b   : > { %v1348_v60 = vmul.f32 0.2, %v1106_v53  ;;  %v1110_v61 = vadd.f32 %v1109_v59, %v5830_v24  ;;  %1938 = vmatmul.mubr.bf16.gmra.mrb[20].mxu0 %v1447_v48  ;;  %vm1284_vm9 = vcmp.ge.f32.partialorder %v1106_v53, 0.0 }
 0x22c   : > { %vm1287_vm10 = vcmp.ge.f32.partialorder %v1108_v57, 0.0  ;;  %v1351_v63 = vmul.f32 0.2, %v1108_v57  ;;  %1989 = vmatpush1.bf16.msra.mxu0 %v4691_v52  ;;  %v1411_v3 = vsel %vm1283_vm8, %v1104_v49, %v1347_v56  ;;  %v4706_v49 = vld [vmem:[#allocation8 + $0x1f0] ss:$8 sps:$4 sm:$0xff]  }
 0x22d   : > { %vm1288_vm11 = vcmp.ge.f32.partialorder %v1110_v61, 0.0  ;;  %v1352_v1 = vmul.f32 0.2, %v1110_v61  ;;  %1990 = vmatprep.subr.bf16.mxu0 %v4696_v55  ;;  %v1412_v6 = vsel %vm1284_vm9, %v1106_v53, %v1348_v60 }
 0x22e   : > { %v1415_v4 = vsel %vm1287_vm10, %v1108_v57, %v1351_v63 }
 0x22f   : > { %v1113_v5 = vpop.f32.mrb[28].mxu1  ;;  %v1416_v7 = vsel %vm1288_vm11, %v1110_v61, %v1352_v1  ;;  %v1451_v8 = vpack.c.bf16 %v1415_v4, %v1411_v3 }
 0x230   : > { %v1114_v9 = vadd.f32 %v1113_v5, %v5826_v23  ;;  %v1115_v11 = vpop.f32.mrb[29].mxu1  ;;  %1991 = vmatpush1.bf16.msra.mxu0 %v4694_v0  ;;  %v1452_v13 = vpack.c.bf16 %v1416_v7, %v1412_v6 }
 0x231   : > { %v1116_v17 = vadd.f32 %v1115_v11, %v5830_v24  ;;  %v1117_v18 = vpop.f32.mrb[30].mxu1  ;;  %1992 = vmatprep.subr.bf16.mxu0 %v4699_v2 }
 0x232   : > { %v1355_v15 = vmul.f32 0.2, %v1114_v9  ;;  %v1118_v44 = vadd.f32 %v1117_v18, %v5826_v23  ;;  %v1119_v47 = vpop.f32.mrb[31].mxu1  ;;  %1947 = vmatprep.mubr.bf16.mxu0 %v1452_v13  ;;  %vm1291_vm12 = vcmp.ge.f32.partialorder %v1114_v9, 0.0  ;;  %v5876_v23 = vrot.slane %v5819_v21, %v683_v20 }
 0x233   : > { %v1356_v58 = vmul.f32 0.2, %v1116_v17  ;;  %v1120_v62 = vadd.f32 %v1119_v47, %v5830_v24  ;;  %1948 = vmatmul.mubr.bf16.gmra.mrb[24].mxu0 %v1451_v8  ;;  %vm1292_vm13 = vcmp.ge.f32.partialorder %v1116_v17, 0.0  ;;  %v4705_v24 = vld [vmem:[#allocation8 + $0x1e4] ss:$8 sps:$4 sm:$0xff]  }
 0x234   : > { %vm1295_vm14 = vcmp.ge.f32.partialorder %v1118_v44, 0.0  ;;  %v1359_v25 = vmul.f32 0.2, %v1118_v44  ;;  %1993 = vmatpush1.bf16.msra.mxu0 %v4697_v14  ;;  %v1419_v29 = vsel %vm1291_vm12, %v1114_v9, %v1355_v15 }
 0x235   : > { %vm1296_vm15 = vcmp.ge.f32.partialorder %v1120_v62, 0.0  ;;  %v1360_v28 = vmul.f32 0.2, %v1120_v62  ;;  %1994 = vmatprep.subr.bf16.mxu0 %v4702_v19  ;;  %v1420_v32 = vsel %vm1292_vm13, %v1116_v17, %v1356_v58 }
 0x236   : > { %v1423_v30 = vsel %vm1295_vm14, %v1118_v44, %v1359_v25 }
 0x237   : > { %v1156_v31 = vpop.f32.mrb[32].mxu1  ;;  %v1424_v33 = vsel %vm1296_vm15, %v1120_v62, %v1360_v28  ;;  %v1455_v34 = vpack.c.bf16 %v1423_v30, %v1419_v29 }
 0x238   : > { %v1157_v35 = vadd.f32 %v1156_v31, %v5871_v26  ;;  %v1158_v36 = vpop.f32.mrb[33].mxu1  ;;  %1995 = vmatpush1.bf16.msra.mxu0 %v4700_v27  ;;  %v1456_v37 = vpack.c.bf16 %v1424_v33, %v1420_v32 }
 0x239   : > { %v1159_v39 = vadd.f32 %v1158_v36, %v5876_v23  ;;  %v1160_v40 = vpop.f32.mrb[34].mxu1  ;;  %1996 = vmatprep.subr.bf16.mxu0 %v4705_v24 }
 0x23a   : > { %v1301_v21 = vmul.f32 0.2, %v1157_v35  ;;  %v1161_v42 = vadd.f32 %v1160_v40, %v5871_v26  ;;  %v1162_v43 = vpop.f32.mrb[35].mxu1  ;;  %1957 = vmatprep.mubr.bf16.mxu0 %v1456_v37  ;;  %vm1237_vm0 = vcmp.ge.f32.partialorder %v1157_v35, 0.0 }
 0x23b   : > { %v1302_v45 = vmul.f32 0.2, %v1159_v39  ;;  %v1163_v46 = vadd.f32 %v1162_v43, %v5876_v23  ;;  %1958 = vmatmul.mubr.bf16.gmra.mrb[28].mxu0 %v1455_v34  ;;  %vm1238_vm1 = vcmp.ge.f32.partialorder %v1159_v39, 0.0 }
 0x23c   : > { %vm1241_vm2 = vcmp.ge.f32.partialorder %v1161_v42, 0.0  ;;  %v1305_v48 = vmul.f32 0.2, %v1161_v42  ;;  %1997 = vmatpush1.bf16.msra.mxu0 %v4703_v38  ;;  %v1365_v51 = vsel %vm1237_vm0, %v1157_v35, %v1301_v21 }
 0x23d   : > { %vm1242_vm3 = vcmp.ge.f32.partialorder %v1163_v46, 0.0  ;;  %v1306_v50 = vmul.f32 0.2, %v1163_v46  ;;  %1998 = vmatprep.subr.bf16.mxu0 %v4708_v41  ;;  %v1366_v55 = vsel %vm1238_vm1, %v1159_v39, %v1302_v45 }
 0x23e   : > { %v1369_v52 = vsel %vm1241_vm2, %v1161_v42, %v1305_v48 }
 0x23f   : > { %v1429_v53 = vpack.c.bf16 %v1369_v52, %v1365_v51  ;;  %v1166_v54 = vpop.f32.mrb[36].mxu1  ;;  %v1370_v56 = vsel %vm1242_vm3, %v1163_v46, %v1306_v50 }
 0x240   : > { %v1167_v57 = vadd.f32 %v1166_v54, %v5871_v26  ;;  %v1168_v59 = vpop.f32.mrb[37].mxu1  ;;  %1999 = vmatpush1.bf16.msra.mxu0 %v4706_v49  ;;  %v1430_v60 = vpack.c.bf16 %v1370_v56, %v1366_v55 }
 0x241   : > { %v1169_v61 = vadd.f32 %v1168_v59, %v5876_v23  ;;  %v1170_v63 = vpop.f32.mrb[38].mxu1 }
 0x242   : > { %v1309_v0 = vmul.f32 0.2, %v1167_v57  ;;  %v1171_v1 = vadd.f32 %v1170_v63, %v5871_v26  ;;  %v1172_v2 = vpop.f32.mrb[39].mxu1  ;;  %2000 = vmatprep.mubr.bf16.mxu0 %v1430_v60  ;;  %vm1245_vm4 = vcmp.ge.f32.partialorder %v1167_v57, 0.0 }
 0x243   : > { %v1310_v3 = vmul.f32 0.2, %v1169_v61  ;;  %v1173_v4 = vadd.f32 %v1172_v2, %v5876_v23  ;;  %2001 = vmatmul.mubr.bf16.vlgmr.msra.gmra.mrb[0].mxu0 %v1429_v53  ;;  %vm1246_vm5 = vcmp.ge.f32.partialorder %v1169_v61, 0.0 }
 0x244   : > { %vm1249_vm6 = vcmp.ge.f32.partialorder %v1171_v1, 0.0  ;;  %v1313_v5 = vmul.f32 0.2, %v1171_v1  ;;  %v1373_v7 = vsel %vm1245_vm4, %v1167_v57, %v1309_v0 }
 0x245   : > { %vm1250_vm7 = vcmp.ge.f32.partialorder %v1173_v4, 0.0  ;;  %v1314_v6 = vmul.f32 0.2, %v1173_v4  ;;  %v1374_v11 = vsel %vm1246_vm5, %v1169_v61, %v1310_v3 }
 0x246   : > { %v1377_v8 = vsel %vm1249_vm6, %v1171_v1, %v1313_v5 }
 0x247   : > { %v1176_v9 = vpop.f32.mrb[40].mxu1  ;;  %v1378_v13 = vsel %vm1250_vm7, %v1173_v4, %v1314_v6  ;;  %v1433_v14 = vpack.c.bf16 %v1377_v8, %v1373_v7 }
 0x248   : > { %v1177_v17 = vadd.f32 %v1176_v9, %v5871_v26  ;;  %v1178_v18 = vpop.f32.mrb[41].mxu1  ;;  %v1434_v19 = vpack.c.bf16 %v1378_v13, %v1374_v11 }
 0x249   : > { %v1179_v15 = vadd.f32 %v1178_v18, %v5876_v23  ;;  %v1180_v44 = vpop.f32.mrb[42].mxu1 }
 0x24a   : > { %v1317_v47 = vmul.f32 0.2, %v1177_v17  ;;  %v1181_v58 = vadd.f32 %v1180_v44, %v5871_v26  ;;  %v1182_v62 = vpop.f32.mrb[43].mxu1  ;;  %2010 = vmatprep.mubr.bf16.mxu0 %v1434_v19  ;;  %vm1253_vm8 = vcmp.ge.f32.partialorder %v1177_v17, 0.0 }
 0x24b   : > { %v1318_v25 = vmul.f32 0.2, %v1179_v15  ;;  %v1183_v27 = vadd.f32 %v1182_v62, %v5876_v23  ;;  %2011 = vmatmul.mubr.bf16.gmra.mrb[4].mxu0 %v1433_v14  ;;  %vm1254_vm9 = vcmp.ge.f32.partialorder %v1179_v15, 0.0 }
 0x24c   : > { %vm1257_vm10 = vcmp.ge.f32.partialorder %v1181_v58, 0.0  ;;  %v1321_v28 = vmul.f32 0.2, %v1181_v58  ;;  %v1381_v29 = vsel %vm1253_vm8, %v1177_v17, %v1317_v47 }
 0x24d   : > { %vm1258_vm11 = vcmp.ge.f32.partialorder %v1183_v27, 0.0  ;;  %v1322_v24 = vmul.f32 0.2, %v1183_v27  ;;  %v1382_v32 = vsel %vm1254_vm9, %v1179_v15, %v1318_v25 }
 0x24e   : > { %v1385_v30 = vsel %vm1257_vm10, %v1181_v58, %v1321_v28 }
 0x24f   : > { %v1186_v31 = vpop.f32.mrb[44].mxu1  ;;  %v1386_v33 = vsel %vm1258_vm11, %v1183_v27, %v1322_v24  ;;  %v1437_v34 = vpack.c.bf16 %v1385_v30, %v1381_v29 }
 0x250   : > { %v1187_v35 = vadd.f32 %v1186_v31, %v5871_v26  ;;  %v1188_v36 = vpop.f32.mrb[45].mxu1  ;;  %v1438_v37 = vpack.c.bf16 %v1386_v33, %v1382_v32 }
 0x251   : > { %v1189_v38 = vadd.f32 %v1188_v36, %v5876_v23  ;;  %v1190_v39 = vpop.f32.mrb[46].mxu1 }
 0x252   : > { %v1325_v40 = vmul.f32 0.2, %v1187_v35  ;;  %v1191_v41 = vadd.f32 %v1190_v39, %v5871_v26  ;;  %v1192_v21 = vpop.f32.mrb[47].mxu1  ;;  %2020 = vmatprep.mubr.bf16.mxu0 %v1438_v37  ;;  %vm1261_vm12 = vcmp.ge.f32.partialorder %v1187_v35, 0.0 }
 0x253   : > { %v1326_v42 = vmul.f32 0.2, %v1189_v38  ;;  %v1193_v43 = vadd.f32 %v1192_v21, %v5876_v23  ;;  %2021 = vmatmul.mubr.bf16.gmra.mrb[8].mxu0 %v1437_v34  ;;  %vm1262_vm13 = vcmp.ge.f32.partialorder %v1189_v38, 0.0 }
 0x254   : > { %vm1265_vm14 = vcmp.ge.f32.partialorder %v1191_v41, 0.0  ;;  %v1329_v45 = vmul.f32 0.2, %v1191_v41  ;;  %v1389_v48 = vsel %vm1261_vm12, %v1187_v35, %v1325_v40 }
 0x255   : > { %vm1266_vm15 = vcmp.ge.f32.partialorder %v1193_v43, 0.0  ;;  %v1330_v46 = vmul.f32 0.2, %v1193_v43  ;;  %v1390_v51 = vsel %vm1262_vm13, %v1189_v38, %v1326_v42 }
 0x256   : > { %v1393_v49 = vsel %vm1265_vm14, %v1191_v41, %v1329_v45 }
 0x257   : > { %v1196_v50 = vpop.f32.mrb[48].mxu1  ;;  %v1394_v52 = vsel %vm1266_vm15, %v1193_v43, %v1330_v46  ;;  %v1441_v53 = vpack.c.bf16 %v1393_v49, %v1389_v48 }
 0x258   : > { %v1197_v54 = vadd.f32 %v1196_v50, %v5871_v26  ;;  %v1198_v55 = vpop.f32.mrb[49].mxu1  ;;  %v1442_v56 = vpack.c.bf16 %v1394_v52, %v1390_v51 }
 0x259   : > { %v1199_v57 = vadd.f32 %v1198_v55, %v5876_v23  ;;  %v1200_v59 = vpop.f32.mrb[50].mxu1 }
 0x25a   : > { %v1333_v60 = vmul.f32 0.2, %v1197_v54  ;;  %v1201_v61 = vadd.f32 %v1200_v59, %v5871_v26  ;;  %v1202_v63 = vpop.f32.mrb[51].mxu1  ;;  %2030 = vmatprep.mubr.bf16.mxu0 %v1442_v56  ;;  %vm1269_vm0 = vcmp.ge.f32.partialorder %v1197_v54, 0.0 }
 0x25b   : > { %v1334_v0 = vmul.f32 0.2, %v1199_v57  ;;  %v1203_v1 = vadd.f32 %v1202_v63, %v5876_v23  ;;  %2031 = vmatmul.mubr.bf16.gmra.mrb[12].mxu0 %v1441_v53  ;;  %vm1270_vm1 = vcmp.ge.f32.partialorder %v1199_v57, 0.0 }
 0x25c   : > { %vm1273_vm2 = vcmp.ge.f32.partialorder %v1201_v61, 0.0  ;;  %v1337_v2 = vmul.f32 0.2, %v1201_v61  ;;  %v1397_v4 = vsel %vm1269_vm0, %v1197_v54, %v1333_v60 }
 0x25d   : > { %vm1274_vm3 = vcmp.ge.f32.partialorder %v1203_v1, 0.0  ;;  %v1338_v3 = vmul.f32 0.2, %v1203_v1  ;;  %v1398_v7 = vsel %vm1270_vm1, %v1199_v57, %v1334_v0 }
 0x25e   : > { %v1401_v5 = vsel %vm1273_vm2, %v1201_v61, %v1337_v2 }
 0x25f   : > { %v1206_v6 = vpop.f32.mrb[52].mxu1  ;;  %v1402_v8 = vsel %vm1274_vm3, %v1203_v1, %v1338_v3  ;;  %v1445_v9 = vpack.c.bf16 %v1401_v5, %v1397_v4 }
 0x260   : > { %v1207_v11 = vadd.f32 %v1206_v6, %v5871_v26  ;;  %v1208_v13 = vpop.f32.mrb[53].mxu1  ;;  %v1446_v14 = vpack.c.bf16 %v1402_v8, %v1398_v7  ;;  %v4724_v7 = vld [vmem:[#allocation10 + $0xa0] ss:$16 sps:$4 sm:$0xff]   ;;  %v4729_v8 = vld [vmem:[#allocation10 + $0xc4] ss:$16 sps:$4 sm:$0xff]  }
 0x261   : > { %v1209_v17 = vadd.f32 %v1208_v13, %v5876_v23  ;;  %v1210_v18 = vpop.f32.mrb[54].mxu1  ;;  %v5339_v13 = vmov 0  }
 0x262   : > { %v1341_v19 = vmul.f32 0.2, %v1207_v11  ;;  %v1211_v15 = vadd.f32 %v1210_v18, %v5871_v26  ;;  %v1212_v44 = vpop.f32.mrb[55].mxu1  ;;  %2040 = vmatprep.mubr.bf16.mxu0 %v1446_v14  ;;  %vm1277_vm4 = vcmp.ge.f32.partialorder %v1207_v11, 0.0  ;;  %2431 = vmatprep.mubr.bf16.mxu1 %v5339_v13  ;;  %v4735_v14 = vld [vmem:[#allocation10 + $0xc] ss:$16 sps:$4 sm:$0xff]  }
 0x263   : > { %v1342_v47 = vmul.f32 0.2, %v1209_v17  ;;  %v1213_v58 = vadd.f32 %v1212_v44, %v5876_v23  ;;  %2041 = vmatmul.mubr.bf16.gmra.mrb[16].mxu0 %v1445_v9  ;;  %vm1278_vm5 = vcmp.ge.f32.partialorder %v1209_v17, 0.0  ;;  %v4732_v9 = vld [vmem:[#allocation10 + $0xe4] ss:$16 sps:$4 sm:$0xff]  }
 0x264   : > { %vm1281_vm6 = vcmp.ge.f32.partialorder %v1211_v15, 0.0  ;;  %v1345_v62 = vmul.f32 0.2, %v1211_v15  ;;  %v1405_v27 = vsel %vm1277_vm4, %v1207_v11, %v1341_v19  ;;  %v4730_v11 = vld [vmem:[#allocation10 + $0xe0] ss:$16 sps:$4 sm:$0xff]  }
 0x265   : > { %vm1282_vm7 = vcmp.ge.f32.partialorder %v1213_v58, 0.0  ;;  %v1346_v25 = vmul.f32 0.2, %v1213_v58  ;;  %v1406_v29 = vsel %vm1278_vm5, %v1209_v17, %v1342_v47  ;;  %v1523_v17 = vld [vmem:[%s6386_s5] sm:$0x3] }
 0x266   : > { %v1409_v28 = vsel %vm1281_vm6, %v1211_v15, %v1345_v62  ;;  %v5915_v18 = vrot.slane %v1523_v17, %v5814_v12  ;;  %v5918_v19 = vrot.slane %v1523_v17, %v5822_v22  ;;  %v4738_v17 = vld [vmem:[#allocation10 + $0x2c] ss:$16 sps:$4 sm:$0xff]  }
 0x267   : > { %v1216_v24 = vpop.f32.mrb[56].mxu1  ;;  %v1410_v30 = vsel %vm1282_vm7, %v1213_v58, %v1346_v25  ;;  %v1449_v31 = vpack.c.bf16 %v1409_v28, %v1405_v27 }
 0x268   : > { %v1217_v32 = vadd.f32 %v1216_v24, %v5871_v26  ;;  %v1218_v33 = vpop.f32.mrb[57].mxu1  ;;  %v1450_v34 = vpack.c.bf16 %v1410_v30, %v1406_v29 }
 0x269   : > { %v1219_v35 = vadd.f32 %v1218_v33, %v5876_v23  ;;  %v1220_v36 = vpop.f32.mrb[58].mxu1 }
 0x26a   : > { %v1349_v37 = vmul.f32 0.2, %v1217_v32  ;;  %v1221_v38 = vadd.f32 %v1220_v36, %v5871_v26  ;;  %v1222_v39 = vpop.f32.mrb[59].mxu1  ;;  %2050 = vmatprep.mubr.bf16.mxu0 %v1450_v34  ;;  %vm1285_vm8 = vcmp.ge.f32.partialorder %v1217_v32, 0.0 }
 0x26b   : > { %v1350_v40 = vmul.f32 0.2, %v1219_v35  ;;  %v1223_v41 = vadd.f32 %v1222_v39, %v5876_v23  ;;  %2051 = vmatmul.mubr.bf16.gmra.mrb[20].mxu0 %v1449_v31  ;;  %vm1286_vm9 = vcmp.ge.f32.partialorder %v1219_v35, 0.0 }
 0x26c   : > { %vm1289_vm10 = vcmp.ge.f32.partialorder %v1221_v38, 0.0  ;;  %v1353_v21 = vmul.f32 0.2, %v1221_v38  ;;  %v1413_v43 = vsel %vm1285_vm8, %v1217_v32, %v1349_v37 }
 0x26d   : > { %vm1290_vm11 = vcmp.ge.f32.partialorder %v1223_v41, 0.0  ;;  %v1354_v42 = vmul.f32 0.2, %v1223_v41  ;;  %v1414_v48 = vsel %vm1286_vm9, %v1219_v35, %v1350_v40 }
 0x26e   : > { %v1417_v45 = vsel %vm1289_vm10, %v1221_v38, %v1353_v21 }
 0x26f   : > { %v1226_v46 = vpop.f32.mrb[60].mxu1  ;;  %v1418_v49 = vsel %vm1290_vm11, %v1223_v41, %v1354_v42  ;;  %v1453_v50 = vpack.c.bf16 %v1417_v45, %v1413_v43  ;;  %v2129_v42 = vld [vmem:[%s5709_s18] sm:$0xff] }
 0x270   : > { %v1227_v51 = vadd.f32 %v1226_v46, %v5871_v26  ;;  %v1228_v52 = vpop.f32.mrb[61].mxu1  ;;  %v1454_v53 = vpack.c.bf16 %v1418_v49, %v1414_v48 }
 0x271   : > { %v1229_v54 = vadd.f32 %v1228_v52, %v5876_v23  ;;  %v1230_v55 = vpop.f32.mrb[62].mxu1 }
 0x272   : > { %v1357_v56 = vmul.f32 0.2, %v1227_v51  ;;  %v1231_v57 = vadd.f32 %v1230_v55, %v5871_v26  ;;  %v1232_v59 = vpop.f32.mrb[63].mxu1  ;;  %2060 = vmatprep.mubr.bf16.mxu0 %v1454_v53  ;;  %vm1293_vm12 = vcmp.ge.f32.partialorder %v1227_v51, 0.0  ;;  %v4726_v26 = vld [vmem:[#allocation10 + $0xa4] ss:$16 sps:$4 sm:$0xff]  }
 0x273   : > { %v1358_v60 = vmul.f32 0.2, %v1229_v54  ;;  %v1233_v61 = vadd.f32 %v1232_v59, %v5876_v23  ;;  %2061 = vmatmul.mubr.bf16.gmra.mrb[24].mxu0 %v1453_v50  ;;  %vm1294_vm13 = vcmp.ge.f32.partialorder %v1229_v54, 0.0  ;;  %2409 = vmatprep.subr.bf16.mxu1 %v4726_v26  ;;  %v4727_v23 = vld [vmem:[#allocation10 + $0xc0] ss:$16 sps:$4 sm:$0xff]   ;;  %v2130_v50 = vld [vmem:[%s5709_s18 + $0x8] sm:$0xff] }
 0x274   : > { %vm1297_vm14 = vcmp.ge.f32.partialorder %v1231_v57, 0.0  ;;  %v1361_v63 = vmul.f32 0.2, %v1231_v57  ;;  %v1421_v1 = vsel %vm1293_vm12, %v1227_v51, %v1357_v56  ;;  %2410 = vmatpush1.bf16.msra.mxu1 %v4724_v7  ;;  %v4757_v56 = vld [vmem:[#allocation11] ss:$8 sps:$4 sm:$0xff]  }
 0x275   : > { %vm1298_vm15 = vcmp.ge.f32.partialorder %v1233_v61, 0.0  ;;  %v1362_v0 = vmul.f32 0.2, %v1233_v61  ;;  %v1422_v3 = vsel %vm1294_vm13, %v1229_v54, %v1358_v60  ;;  %2411 = vmatprep.subr.bf16.mxu1 %v4729_v8  ;;  %v4733_v8 = vld [vmem:[#allocation10 + $0x8] ss:$16 sps:$4 sm:$0xff]  }
 0x276   : > { %v1425_v2 = vsel %vm1297_vm14, %v1231_v57, %v1361_v63  ;;  %v4759_v57 = vld [vmem:[#allocation11 + $0x4] ss:$8 sps:$4 sm:$0xff]   ;;  %v4762_v63 = vld [vmem:[#allocation11 + $0x14] ss:$8 sps:$4 sm:$0xff]  }
 0x277   : > { %v1426_v4 = vsel %vm1298_vm15, %v1233_v61, %v1362_v0  ;;  %v1457_v5 = vpack.c.bf16 %v1425_v2, %v1421_v1  ;;  %3245 = vmatprep.subr.bf16.mxu0 %v4759_v57 }
 0x278   : > { %v1458_v6 = vpack.c.bf16 %v1426_v4, %v1422_v3  ;;  %2412 = vmatpush1.bf16.msra.mxu1 %v4727_v23  ;;  %3246 = vmatpush1.bf16.msra.mxu0 %v4757_v56  ;;  %v4760_v4 = vld [vmem:[#allocation11 + $0x10] ss:$8 sps:$4 sm:$0xff]   ;;  %v4769_v56 = vld [vmem:[#allocation11 + $0x40] ss:$8 sps:$4 sm:$0xff]  }
 0x279   : > { %2413 = vmatprep.subr.bf16.mxu1 %v4732_v9  ;;  %3247 = vmatprep.subr.bf16.mxu0 %v4762_v63  ;;  %v2131_v23 = vld [vmem:[%s5709_s18 + $0x10] sm:$0xff] }
 0x27a   : > { %2070 = vmatprep.mubr.bf16.mxu0 %v1458_v6  ;;  %v4765_v6 = vld [vmem:[#allocation11 + $0x24] ss:$8 sps:$4 sm:$0xff]  }
 0x27b   : > { %2071 = vmatmul.mubr.bf16.gmra.mrb[28].mxu0 %v1457_v5 }
 0x27c   : > { %2414 = vmatpush1.bf16.msra.mxu1 %v4730_v11  ;;  %3248 = vmatpush1.bf16.msra.mxu0 %v4760_v4 }
 0x27d   : > { %2512 = vmatprep.subr.bf16.mxu1 %v4735_v14  ;;  %3249 = vmatprep.subr.bf16.mxu0 %v4765_v6 }
 0x316   : > { %v2002_v15 = vpop.f32.mrb[0].mxu0 }
 0x317   : > { %v4278_v44 = vadd.f32 %v2002_v15, %v5915_v18  ;;  %v2004_v47 = vpop.f32.mrb[1].mxu0 }
 0x318   : > { %v4279_v58 = vadd.f32 %v2004_v47, %v5918_v19  ;;  %v2006_v62 = vpop.f32.mrb[2].mxu0 }
 0x319   : > { %3727 = vst [vmem:[%s5923_s28] sm:$0xff] %v4278_v44  ;;  %v4280_v25 = vadd.f32 %v2006_v62, %v5915_v18  ;;  %v2008_v27 = vpop.f32.mrb[3].mxu0  ;;  %v4763_v62 = vld [vmem:[#allocation11 + $0x20] ss:$8 sps:$4 sm:$0xff]  }
 0x31a   : > { %v2081_v28 = vmul.f32 0.5, %v4279_v58  ;;  %3743 = vst [vmem:[%s5928_s12] sm:$0xff] %v4279_v58  ;;  %v4281_v24 = vadd.f32 %v2008_v27, %v5918_v19  ;;  %v2132_v58 = vld [vmem:[%s5709_s18 + $0x18] sm:$0xff]  ;;  %3250 = vmatpush1.bf16.msra.mxu0 %v4763_v62 }
 0x31b   : > { %3728 = vst [vmem:[%s5923_s28 + $0x8] sm:$0xff] %v4280_v25  ;;  %v4750_v62 = vld [vmem:[#allocation10 + $0xac] ss:$16 sps:$4 sm:$0xff]  }
 0x31c   : > { %v2097_v29 = vmul.f32 1.442695, %v2081_v28  ;;  %v2082_v30 = vmul.f32 0.5, %v4281_v24  ;;  %3744 = vst [vmem:[%s5928_s12 + $0x8] sm:$0xff] %v4281_v24  ;;  %v4768_v24 = vld [vmem:[#allocation11 + $0x34] ss:$8 sps:$4 sm:$0xff]  }
 0x31d   : > { %3251 = vmatprep.subr.bf16.mxu0 %v4768_v24  ;;  %v2136_v24 = vld [vmem:[%s5709_s18 + $0x38] sm:$0xff] }
 0x31e   : > { %4853 = vpow2.f32 %v2097_v29  ;;  %v2099_v31 = vmul.f32 1.442695, %v2082_v30  ;;  %v2012_v32 = vpop.f32.mrb[4].mxu0 }
 0x31f   : > { %v5935_v33 = vadd.f32 %v2012_v32, %v5915_v18  ;;  %v2014_v34 = vpop.f32.mrb[5].mxu0  ;;  %v4736_v32 = vld [vmem:[#allocation10 + $0x28] ss:$16 sps:$4 sm:$0xff]  }
 0x320   : > { %4855 = vpow2.f32 %v2099_v31  ;;  %v4283_v35 = vadd.f32 %v2014_v34, %v5918_v19  ;;  %v2016_v36 = vpop.f32.mrb[6].mxu0 }
 0x321   : > { %3729 = vst [vmem:[%s5923_s28 + $0x10] sm:$0xff] %v5935_v33  ;;  %v5941_v37 = vadd.f32 %v2016_v36, %v5915_v18  ;;  %v2018_v38 = vpop.f32.mrb[7].mxu0  ;;  %v4741_v36 = vld [vmem:[#allocation10 + $0x4c] ss:$16 sps:$4 sm:$0xff]  }
 0x322   : > { %v2083_v39 = vmul.f32 0.5, %v4283_v35  ;;  %3745 = vst [vmem:[%s5928_s12 + $0x10] sm:$0xff] %v4283_v35  ;;  %v4285_v40 = vadd.f32 %v2018_v38, %v5918_v19 }
 0x323   : > { %3730 = vst [vmem:[%s5923_s28 + $0x18] sm:$0xff] %v5941_v37 }
 0x324   : > { %v2101_v41 = vmul.f32 1.442695, %v2083_v39  ;;  %v2084_v21 = vmul.f32 0.5, %v4285_v40  ;;  %3746 = vst [vmem:[%s5928_s12 + $0x18] sm:$0xff] %v4285_v40  ;;  %v4766_v40 = vld [vmem:[#allocation11 + $0x30] ss:$8 sps:$4 sm:$0xff]  }
 0x325   : > { %3252 = vmatpush1.bf16.msra.mxu0 %v4766_v40 }
 0x326   : > { %4857 = vpow2.f32 %v2101_v41  ;;  %v2103_v43 = vmul.f32 1.442695, %v2084_v21  ;;  %v2022_v45 = vpop.f32.mrb[8].mxu0  ;;  %v4771_v21 = vld [vmem:[#allocation11 + $0x44] ss:$8 sps:$4 sm:$0xff]  }
 0x327   : > { %v5950_v46 = vadd.f32 %v2022_v45, %v5915_v18  ;;  %v2024_v48 = vpop.f32.mrb[9].mxu0  ;;  %v2133_v45 = vld [vmem:[%s5709_s18 + $0x20] sm:$0xff]  ;;  %3253 = vmatprep.subr.bf16.mxu0 %v4771_v21  ;;  %v4753_v21 = vld [vmem:[#allocation10 + $0xcc] ss:$16 sps:$4 sm:$0xff]  }
 0x328   : > { %v4854_v49 = vpop.eup %4853  ;;  %4859 = vpow2.f32 %v2103_v43  ;;  %v4287_v51 = vadd.f32 %v2024_v48, %v5918_v19  ;;  %v2026_v52 = vpop.f32.mrb[10].mxu0  ;;  %v4739_v48 = vld [vmem:[#allocation10 + $0x48] ss:$16 sps:$4 sm:$0xff]  }
 0x329   : > { %v2145_v53 = vmul.f32 %v4854_v49, %v2129_v42  ;;  %3731 = vst [vmem:[%s5923_s28 + $0x20] sm:$0xff] %v5950_v46  ;;  %v5957_v54 = vadd.f32 %v2026_v52, %v5915_v18  ;;  %v2028_v55 = vpop.f32.mrb[11].mxu0  ;;  %3254 = vmatpush1.bf16.msra.mxu0 %v4769_v56 }
 0x32a   : > { %v4856_v59 = vpop.eup %4855  ;;  %v2085_v60 = vmul.f32 0.5, %v4287_v51  ;;  %3747 = vst [vmem:[%s5928_s12 + $0x20] sm:$0xff] %v4287_v51  ;;  %v4289_v61 = vadd.f32 %v2028_v55, %v5918_v19  ;;  %v4744_v51 = vld [vmem:[#allocation10 + $0x6c] ss:$16 sps:$4 sm:$0xff]  }
 0x32b   : > { %v2146_v0 = vmul.f32 %v4856_v59, %v2130_v50  ;;  %3732 = vst [vmem:[%s5923_s28 + $0x28] sm:$0xff] %v5957_v54  ;;  %v2161_v1 = vadd.f32 %v4278_v44, %v2145_v53  ;;  %v2134_v55 = vld [vmem:[%s5709_s18 + $0x28] sm:$0xff] }
 0x32c   : > { %v2105_v2 = vmul.f32 1.442695, %v2085_v60  ;;  %v2086_v3 = vmul.f32 0.5, %v4289_v61  ;;  %3748 = vst [vmem:[%s5928_s12 + $0x28] sm:$0xff] %v4289_v61  ;;  %v4774_v61 = vld [vmem:[#allocation11 + $0x54] ss:$8 sps:$4 sm:$0xff]  }
 0x32d   : > { %v2162_v5 = vadd.f32 %v4280_v25, %v2146_v0  ;;  %3255 = vmatprep.subr.bf16.mxu0 %v4774_v61 }
 0x32e   : > { %4861 = vpow2.f32 %v2105_v2  ;;  %v2107_v26 = vmul.f32 1.442695, %v2086_v3  ;;  %v2032_v7 = vpop.f32.mrb[12].mxu0  ;;  %v4742_v2 = vld [vmem:[#allocation10 + $0x68] ss:$16 sps:$4 sm:$0xff]  }
 0x32f   : > { %v5966_v9 = vadd.f32 %v2032_v7, %v5915_v18  ;;  %v2034_v11 = vpop.f32.mrb[13].mxu0  ;;  %v5968_v14 = vpack.c.bf16 %v2162_v5, %v2161_v1  ;;  %v4747_v5 = vld [vmem:[#allocation10 + $0x8c] ss:$16 sps:$4 sm:$0xff]   ;;  %v4772_v7 = vld [vmem:[#allocation11 + $0x50] ss:$8 sps:$4 sm:$0xff]  }
 0x330   : > { %v4858_v15 = vpop.eup %4857  ;;  %4863 = vpow2.f32 %v2107_v26  ;;  %v4291_v44 = vadd.f32 %v2034_v11, %v5918_v19  ;;  %v2036_v47 = vpop.f32.mrb[14].mxu0  ;;  %3256 = vmatpush1.bf16.msra.mxu0 %v4772_v7  ;;  %v4754_v7 = vld [vmem:[#allocation10 + $0xe8] ss:$16 sps:$4 sm:$0xff]  }
 0x331   : > { %3733 = vst [vmem:[%s5923_s28 + $0x30] sm:$0xff] %v5966_v9  ;;  %v5975_v25 = vadd.f32 %v2036_v47, %v5915_v18  ;;  %v2038_v27 = vpop.f32.mrb[15].mxu0  ;;  %2432 = vmatmul.mubr.bf16.vlgmr.msra.gmra.mrb[64].mxu1 %v5968_v14  ;;  %v2147_v28 = vmul.f32 %v4858_v15, %v2131_v23  ;;  %v4777_v23 = vld [vmem:[#allocation11 + $0x64] ss:$8 sps:$4 sm:$0xff]   ;;  %v2135_v15 = vld [vmem:[%s5709_s18 + $0x30] sm:$0xff] }
 0x332   : > { %v4860_v29 = vpop.eup %4859  ;;  %v2087_v30 = vmul.f32 0.5, %v4291_v44  ;;  %3749 = vst [vmem:[%s5928_s12 + $0x30] sm:$0xff] %v4291_v44  ;;  %v4293_v31 = vadd.f32 %v2038_v27, %v5918_v19  ;;  %2513 = vmatpush1.bf16.msra.mxu1 %v4733_v8  ;;  %2441 = vmatprep.mubr.bf16.mxu1 %v5339_v13  ;;  %v4745_v44 = vld [vmem:[#allocation10 + $0x88] ss:$16 sps:$4 sm:$0xff]  }
 0x333   : > { %3734 = vst [vmem:[%s5923_s28 + $0x38] sm:$0xff] %v5975_v25  ;;  %v2148_v34 = vmul.f32 %v4860_v29, %v2132_v58  ;;  %v2163_v35 = vadd.f32 %v5935_v33, %v2147_v28  ;;  %2514 = vmatprep.subr.bf16.mxu1 %v4738_v17  ;;  %v4775_v29 = vld [vmem:[#allocation11 + $0x60] ss:$8 sps:$4 sm:$0xff]   ;;  %3257 = vmatprep.subr.bf16.mxu0 %v4777_v23 }
 0x334   : > { %v2109_v38 = vmul.f32 1.442695, %v2087_v30  ;;  %v2088_v39 = vmul.f32 0.5, %v4293_v31  ;;  %3750 = vst [vmem:[%s5928_s12 + $0x38] sm:$0xff] %v4293_v31  ;;  %3258 = vmatpush1.bf16.msra.mxu0 %v4775_v29 }
 0x335   : > { %v2164_v41 = vadd.f32 %v5941_v37, %v2148_v34  ;;  %v4780_v34 = vld [vmem:[#allocation11 + $0x74] ss:$8 sps:$4 sm:$0xff]  }
 0x336   : > { %4865 = vpow2.f32 %v2109_v38  ;;  %v2111_v42 = vmul.f32 1.442695, %v2088_v39  ;;  %v2042_v43 = vpop.f32.mrb[16].mxu0  ;;  %2515 = vmatpush1.bf16.msra.mxu1 %v4736_v32  ;;  %v4748_v39 = vld [vmem:[#allocation10 + $0xa8] ss:$16 sps:$4 sm:$0xff]   ;;  %3259 = vmatprep.subr.bf16.mxu0 %v4780_v34 }
 0x337   : > { %v5988_v33 = vadd.f32 %v2042_v43, %v5915_v18  ;;  %v2044_v49 = vpop.f32.mrb[17].mxu0  ;;  %v5990_v50 = vpack.c.bf16 %v2164_v41, %v2163_v35  ;;  %2516 = vmatprep.subr.bf16.mxu1 %v4741_v36  ;;  %v4787_v34 = vld [vmem:[#allocation11 + $0xa0] ss:$8 sps:$4 sm:$0xff]  }
 0x338   : > { %v4862_v52 = vpop.eup %4861  ;;  %4867 = vpow2.f32 %v2111_v42  ;;  %v4295_v37 = vadd.f32 %v2044_v49, %v5918_v19  ;;  %v2046_v53 = vpop.f32.mrb[18].mxu0  ;;  %v4783_v49 = vld [vmem:[#allocation11 + $0x84] ss:$8 sps:$4 sm:$0xff]  }
 0x339   : > { %3735 = vst [vmem:[%s5923_s28 + $0x40] sm:$0xff] %v5988_v33  ;;  %v5997_v57 = vadd.f32 %v2046_v53, %v5915_v18  ;;  %v2048_v59 = vpop.f32.mrb[19].mxu0  ;;  %2442 = vmatmul.mubr.bf16.gmra.mrb[68].mxu1 %v5990_v50  ;;  %v2149_v60 = vmul.f32 %v4862_v52, %v2133_v45  ;;  %v4778_v45 = vld [vmem:[#allocation11 + $0x70] ss:$8 sps:$4 sm:$0xff]  }
 0x33a   : > { %v4864_v63 = vpop.eup %4863  ;;  %v2089_v0 = vmul.f32 0.5, %v4295_v37  ;;  %3751 = vst [vmem:[%s5928_s12 + $0x40] sm:$0xff] %v4295_v37  ;;  %v4297_v1 = vadd.f32 %v2048_v59, %v5918_v19  ;;  %2451 = vmatprep.mubr.bf16.mxu1 %v5339_v13  ;;  %2517 = vmatpush1.bf16.msra.mxu1 %v4739_v48  ;;  %v2137_v37 = vld [vmem:[%s5709_s18 + $0x40] sm:$0xff]  ;;  %v4751_v53 = vld [vmem:[#allocation10 + $0xc8] ss:$16 sps:$4 sm:$0xff]  }
 0x33b   : > { %3736 = vst [vmem:[%s5923_s28 + $0x48] sm:$0xff] %v5997_v57  ;;  %v2150_v3 = vmul.f32 %v4864_v63, %v2134_v55  ;;  %v2165_v4 = vadd.f32 %v5950_v46, %v2149_v60  ;;  %2518 = vmatprep.subr.bf16.mxu1 %v4744_v51  ;;  %v4756_v59 = vld [vmem:[#allocation10 + $0xec] ss:$16 sps:$4 sm:$0xff]   ;;  %3260 = vmatpush1.bf16.msra.mxu0 %v4778_v45 }
 0x33c   : > { %v2113_v6 = vmul.f32 1.442695, %v2089_v0  ;;  %v2090_v26 = vmul.f32 0.5, %v4297_v1  ;;  %3752 = vst [vmem:[%s5928_s12 + $0x48] sm:$0xff] %v4297_v1  ;;  %v2138_v63 = vld [vmem:[%s5709_s18 + $0x48] sm:$0xff]  ;;  %3261 = vmatprep.subr.bf16.mxu0 %v4783_v49 }
 0x33d   : > { %v2166_v8 = vadd.f32 %v5957_v54, %v2150_v3  ;;  %v4781_v0 = vld [vmem:[#allocation11 + $0x80] ss:$8 sps:$4 sm:$0xff]  }
 0x33e   : > { %4869 = vpow2.f32 %v2113_v6  ;;  %v2115_v11 = vmul.f32 1.442695, %v2090_v26  ;;  %v2052_v17 = vpop.f32.mrb[20].mxu0  ;;  %2519 = vmatpush1.bf16.msra.mxu1 %v4742_v2 }
 0x33f   : > { %v6010_v46 = vadd.f32 %v2052_v17, %v5915_v18  ;;  %v2054_v47 = vpop.f32.mrb[21].mxu0  ;;  %v6012_v58 = vpack.c.bf16 %v2166_v8, %v2165_v4  ;;  %2520 = vmatprep.subr.bf16.mxu1 %v4747_v5  ;;  %v4786_v4 = vld [vmem:[#allocation11 + $0x94] ss:$8 sps:$4 sm:$0xff]   ;;  %3262 = vmatpush1.bf16.msra.mxu0 %v4781_v0 }
 0x340   : > { %v4866_v27 = vpop.eup %4865  ;;  %4871 = vpow2.f32 %v2115_v11  ;;  %v4299_v54 = vadd.f32 %v2054_v47, %v5918_v19  ;;  %v2056_v28 = vpop.f32.mrb[22].mxu0  ;;  %3263 = vmatprep.subr.bf16.mxu0 %v4786_v4  ;;  %v4789_v47 = vld [vmem:[#allocation11 + $0xa4] ss:$8 sps:$4 sm:$0xff]  }
 0x341   : > { %3737 = vst [vmem:[%s5923_s28 + $0x50] sm:$0xff] %v6010_v46  ;;  %v6019_v30 = vadd.f32 %v2056_v28, %v5915_v18  ;;  %v2058_v31 = vpop.f32.mrb[23].mxu0  ;;  %2452 = vmatmul.mubr.bf16.gmra.mrb[72].mxu1 %v6012_v58  ;;  %v2151_v32 = vmul.f32 %v4866_v27, %v2135_v15  ;;  %v4784_v15 = vld [vmem:[#allocation11 + $0x90] ss:$8 sps:$4 sm:$0xff]  }
 0x342   : > { %v4868_v35 = vpop.eup %4867  ;;  %v2091_v36 = vmul.f32 0.5, %v4299_v54  ;;  %3753 = vst [vmem:[%s5928_s12 + $0x50] sm:$0xff] %v4299_v54  ;;  %v4301_v38 = vadd.f32 %v2058_v31, %v5918_v19  ;;  %2461 = vmatprep.mubr.bf16.mxu1 %v5339_v13  ;;  %2521 = vmatpush1.bf16.msra.mxu1 %v4745_v44  ;;  %v2139_v54 = vld [vmem:[%s5709_s18 + $0x50] sm:$0xff] }
 0x343   : > { %3738 = vst [vmem:[%s5923_s28 + $0x58] sm:$0xff] %v6019_v30  ;;  %v2152_v40 = vmul.f32 %v4868_v35, %v2136_v24  ;;  %v2167_v41 = vadd.f32 %v5966_v9, %v2151_v32  ;;  %2522 = vmatprep.subr.bf16.mxu1 %v4750_v62  ;;  %3264 = vmatpush1.bf16.msra.mxu0 %v4784_v15 }
 0x344   : > { %v2117_v42 = vmul.f32 1.442695, %v2091_v36  ;;  %v2092_v43 = vmul.f32 0.5, %v4301_v38  ;;  %3754 = vst [vmem:[%s5928_s12 + $0x58] sm:$0xff] %v4301_v38  ;;  %3265 = vmatprep.subr.bf16.mxu0 %v4789_v47 }
 0x345   : > { %v2168_v48 = vadd.f32 %v5975_v25, %v2152_v40 }
 0x346   : > { %4873 = vpow2.f32 %v2117_v42  ;;  %v2119_v51 = vmul.f32 1.442695, %v2092_v43  ;;  %v2062_v52 = vpop.f32.mrb[24].mxu0  ;;  %2523 = vmatpush1.bf16.msra.mxu1 %v4748_v39  ;;  %v4792_v39 = vld [vmem:[#allocation11 + $0xb4] ss:$8 sps:$4 sm:$0xff]  }
 0x347   : > { %v6032_v9 = vadd.f32 %v2062_v52, %v5915_v18  ;;  %v2064_v55 = vpop.f32.mrb[25].mxu0  ;;  %v6034_v56 = vpack.c.bf16 %v2168_v48, %v2167_v41  ;;  %2524 = vmatprep.subr.bf16.mxu1 %v4753_v21  ;;  %3266 = vmatpush1.bf16.msra.mxu0 %v4787_v34  ;;  %v4790_v48 = vld [vmem:[#allocation11 + $0xb0] ss:$8 sps:$4 sm:$0xff]  }
 0x348   : > { %v4870_v60 = vpop.eup %4869  ;;  %4875 = vpow2.f32 %v2119_v51  ;;  %v4303_v25 = vadd.f32 %v2064_v55, %v5918_v19  ;;  %v2066_v61 = vpop.f32.mrb[26].mxu0  ;;  %3267 = vmatprep.subr.bf16.mxu0 %v4792_v39  ;;  %v4795_v51 = vld [vmem:[#allocation11 + $0xc4] ss:$8 sps:$4 sm:$0xff]  }
 0x349   : > { %3739 = vst [vmem:[%s5923_s28 + $0x60] sm:$0xff] %v6032_v9  ;;  %v6041_v1 = vadd.f32 %v2066_v61, %v5915_v18  ;;  %v2068_v2 = vpop.f32.mrb[27].mxu0  ;;  %2462 = vmatmul.mubr.bf16.gmra.mrb[76].mxu1 %v6034_v56  ;;  %v2153_v3 = vmul.f32 %v4870_v60, %v2137_v37  ;;  %v2141_v37 = vld [vmem:[%s5709_s18 + $0x60] sm:$0xff]  ;;  %v2142_v55 = vld [vmem:[%s5709_s18 + $0x68] sm:$0xff] }
 0x34a   : > { %v4872_v5 = vpop.eup %4871  ;;  %v2093_v6 = vmul.f32 0.5, %v4303_v25  ;;  %3755 = vst [vmem:[%s5928_s12 + $0x60] sm:$0xff] %v4303_v25  ;;  %v4305_v26 = vadd.f32 %v2068_v2, %v5918_v19  ;;  %2471 = vmatprep.mubr.bf16.mxu1 %v5339_v13  ;;  %2525 = vmatpush1.bf16.msra.mxu1 %v4751_v53 }
 0x34b   : > { %3740 = vst [vmem:[%s5923_s28 + $0x68] sm:$0xff] %v6041_v1  ;;  %v2154_v8 = vmul.f32 %v4872_v5, %v2138_v63  ;;  %v2169_v23 = vadd.f32 %v5988_v33, %v2153_v3  ;;  %2526 = vmatprep.subr.bf16.mxu1 %v4756_v59  ;;  %3268 = vmatpush1.bf16.msra.mxu0 %v4790_v48  ;;  %v2143_v63 = vld [vmem:[%s5709_s18 + $0x70] sm:$0xff]  ;;  %v2144_v3 = vld [vmem:[%s5709_s18 + $0x78] sm:$0xff] }
 0x34c   : > { %v2121_v11 = vmul.f32 1.442695, %v2093_v6  ;;  %v2094_v17 = vmul.f32 0.5, %v4305_v26  ;;  %3756 = vst [vmem:[%s5928_s12 + $0x68] sm:$0xff] %v4305_v26  ;;  %3269 = vmatprep.subr.bf16.mxu0 %v4795_v51 }
 0x34d   : > { %v2170_v44 = vadd.f32 %v5997_v57, %v2154_v8  ;;  %v2140_v57 = vld [vmem:[%s5709_s18 + $0x58] sm:$0xff]  ;;  %s5189_s18 = sshll.u32 %s5340_s10, 4  ;;  %s5190_s18 = int_to_ptr.vmem [resolvable:$false] %s5189_s18 }
 0x34e   : > { %4877 = vpow2.f32 %v2121_v11  ;;  %v2123_v62 = vmul.f32 1.442695, %v2094_v17  ;;  %v2072_v27 = vpop.f32.mrb[28].mxu0  ;;  %2527 = vmatpush1.bf16.msra.mxu1 %v4754_v7  ;;  %v4799_v11 = vld [vmem:[#allocation11 + $0xe0] ss:$8 sps:$4 sm:$0xff]   ;;  %s5191_s27 = scalar_lea.vmem %s5190_s18, 4096  ;;  %p5192_p10 = scmp.lt.s32.totalorder %s6185_s21, %s5190_s18 }
 0x34f   : > { %v4306_v28 = vadd.f32 %v2072_v27, %v5915_v18  ;;  %v2074_v33 = vpop.f32.mrb[29].mxu0  ;;  %v6054_v24 = vpack.c.bf16 %v2170_v44, %v2169_v23  ;;  %v4801_v23 = vld [vmem:[#allocation11 + $0xe4] ss:$8 sps:$4 sm:$0xff]   ;;  %p5193_p5 = scmp.lt.s32.totalorder %s5191_s27, %s5185_s29 }
 0x350   : > { %v4874_v29 = vpop.eup %4873  ;;  %4879 = vpow2.f32 %v2123_v62  ;;  %v4307_v31 = vadd.f32 %v2074_v33, %v5918_v19  ;;  %v2076_v32 = vpop.f32.mrb[30].mxu0  ;;  %v4807_v17 = vld [vmem:[#allocation11 + $0x104] ss:$8 sps:$4 sm:$0xff]  }
 0x351   : > { %3741 = vst [vmem:[%s5923_s28 + $0x70] sm:$0xff] %v4306_v28  ;;  %v4308_v35 = vadd.f32 %v2076_v32, %v5915_v18  ;;  %v2078_v36 = vpop.f32.mrb[31].mxu0  ;;  %2472 = vmatmul.mubr.bf16.gmra.mrb[80].mxu1 %v6054_v24  ;;  %v2155_v38 = vmul.f32 %v4874_v29, %v2139_v54  ;;  %p5194_p9 = por %p5193_p5, %p5192_p10 }
 0x352   : > { %v4876_v40 = vpop.eup %4875  ;;  %v2095_v41 = vmul.f32 0.5, %v4307_v31  ;;  %3757 = vst [vmem:[%s5928_s12 + $0x70] sm:$0xff] %v4307_v31  ;;  %v4309_v21 = vadd.f32 %v2078_v36, %v5918_v19  ;;  %2481 = vmatprep.mubr.bf16.mxu1 %v5339_v13 }
 0x353   : > { %3742 = vst [vmem:[%s5923_s28 + $0x78] sm:$0xff] %v4308_v35  ;;  %v2156_v42 = vmul.f32 %v4876_v40, %v2140_v57  ;;  %v2171_v18 = vadd.f32 %v6010_v46, %v2155_v38  ;;  %v4793_v46 = vld [vmem:[#allocation11 + $0xc0] ss:$8 sps:$4 sm:$0xff]   ;;  %p5195_p4 = pnand %p5194_p9, %p5188_p8 }
 0x354   : > { %v2125_v43 = vmul.f32 1.442695, %v2095_v41  ;;  %v2096_v45 = vmul.f32 0.5, %v4309_v21  ;;  %3758 = vst [vmem:[%s5928_s12 + $0x78] sm:$0xff] %v4309_v21  ;;  %3270 = vmatpush1.bf16.msra.mxu0 %v4793_v46  ;;  %v4813_v46 = vld [vmem:[#allocation11 + $0x124] ss:$8 sps:$4 sm:$0xff]  }
 0x355   : > { %v2172_v49 = vadd.f32 %v6019_v30, %v2156_v42  ;;  %v4805_v42 = vld [vmem:[#allocation11 + $0x100] ss:$8 sps:$4 sm:$0xff]  }
 0x356   : > { %4881 = vpow2.f32 %v2125_v43  ;;  %v2127_v52 = vmul.f32 1.442695, %v2096_v45  ;;  %v4810_v45 = vld [vmem:[#allocation11 + $0x114] ss:$8 sps:$4 sm:$0xff]  }
 0x357   : > { %v2182_v19 = vpack.c.bf16 %v2172_v49, %v2171_v18 }
 0x358   : > { %v4878_v53 = vpop.eup %4877  ;;  %4883 = vpow2.f32 %v2127_v52 }
 0x359   : > { %2482 = vmatmul.mubr.bf16.gmra.mrb[84].mxu1 %v2182_v19  ;;  %v2157_v59 = vmul.f32 %v4878_v53, %v2141_v37  ;;  %v4808_v53 = vld [vmem:[#allocation11 + $0x110] ss:$8 sps:$4 sm:$0xff]  }
 0x35a   : > { %v4880_v60 = vpop.eup %4879  ;;  %2491 = vmatprep.mubr.bf16.mxu1 %v5339_v13 }
 0x35b   : > { %v2158_v30 = vmul.f32 %v4880_v60, %v2142_v55  ;;  %v2173_v25 = vadd.f32 %v6032_v9, %v2157_v59  ;;  %v4798_v9 = vld [vmem:[#allocation11 + $0xd4] ss:$8 sps:$4 sm:$0xff]  }
 0x35c   : > { %3271 = vmatprep.subr.bf16.mxu0 %v4798_v9 }
 0x35d   : > { %v2174_v61 = vadd.f32 %v6041_v1, %v2158_v30  ;;  %v4796_v1 = vld [vmem:[#allocation11 + $0xd0] ss:$8 sps:$4 sm:$0xff]  }
 0x35e   : > { %3272 = vmatpush1.bf16.msra.mxu0 %v4796_v1 }
 0x35f   : > { %v2183_v0 = vpack.c.bf16 %v2174_v61, %v2173_v25  ;;  %3273 = vmatprep.subr.bf16.mxu0 %v4801_v23 }
 0x360   : > { %v4882_v2 = vpop.eup %4881 }
 0x361   : > { %2492 = vmatmul.mubr.bf16.gmra.mrb[88].mxu1 %v2183_v0  ;;  %v2159_v4 = vmul.f32 %v4882_v2, %v2143_v63 }
 0x362   : > { %v4884_v5 = vpop.eup %4883  ;;  %2501 = vmatprep.mubr.bf16.mxu1 %v5339_v13  ;;  %3274 = vmatpush1.bf16.msra.mxu0 %v4799_v11 }
 0x363   : > { %v2160_v6 = vmul.f32 %v4884_v5, %v2144_v3  ;;  %v2175_v26 = vadd.f32 %v4306_v28, %v2159_v4  ;;  %v4811_v4 = vld [vmem:[#allocation11 + $0x120] ss:$8 sps:$4 sm:$0xff]  }
 0x365   : > { %v2176_v7 = vadd.f32 %v4308_v35, %v2160_v6 }
 0x367   : > { %v2184_v8 = vpack.c.bf16 %v2176_v7, %v2175_v26  ;;  %v4816_v26 = vld [vmem:[#allocation11 + $0x134] ss:$8 sps:$4 sm:$0xff]  }
 0x369   : > { %2502 = vmatmul.mubr.bf16.gmra.mrb[92].mxu1 %v2184_v8 }
 0x36a   : > { %2544 = vmatprep.mubr.bf16.mxu1 %v5339_v13 }
 0x371   : > { %2545 = vmatmul.mubr.bf16.vlgmr.msra.gmra.mrb[96].mxu1 %v5968_v14  ;;  %v4804_v14 = vld [vmem:[#allocation11 + $0xf4] ss:$8 sps:$4 sm:$0xff]  }
 0x372   : > { %2554 = vmatprep.mubr.bf16.mxu1 %v5339_v13  ;;  %3275 = vmatprep.subr.bf16.mxu0 %v4804_v14  ;;  %v4814_v14 = vld [vmem:[#allocation11 + $0x130] ss:$8 sps:$4 sm:$0xff]  }
 0x379   : > { %2555 = vmatmul.mubr.bf16.gmra.mrb[100].mxu1 %v5990_v50  ;;  %v4802_v50 = vld [vmem:[#allocation11 + $0xf0] ss:$8 sps:$4 sm:$0xff]  }
 0x37a   : > { %2564 = vmatprep.mubr.bf16.mxu1 %v5339_v13  ;;  %3276 = vmatpush1.bf16.msra.mxu0 %v4802_v50 }
 0x37b   : > { %3358 = vmatprep.subr.bf16.mxu0 %v4807_v17  ;;  %v4819_v17 = vld [vmem:[#allocation11 + $0x144] ss:$8 sps:$4 sm:$0xff]  }
 0x381   : > { %2565 = vmatmul.mubr.bf16.gmra.mrb[104].mxu1 %v6012_v58  ;;  %v6092_v58 = vld [vmem:[%s6388_s7] sm:$0xf] }
 0x382   : > { %2574 = vmatprep.mubr.bf16.mxu1 %v5339_v13  ;;  %v6100_v15 = vrot.slane %v6092_v58, %v5822_v22 }
 0x389   : > { %2575 = vmatmul.mubr.bf16.gmra.mrb[108].mxu1 %v6034_v56  ;;  %v6096_v56 = vrot.slane %v6092_v58, %v5814_v12 }
 0x38a   : > { %2584 = vmatprep.mubr.bf16.mxu1 %v5339_v13 }
 0x391   : > { %2585 = vmatmul.mubr.bf16.gmra.mrb[112].mxu1 %v6054_v24 }
 0x392   : > { %2594 = vmatprep.mubr.bf16.mxu1 %v5339_v13 }
 0x399   : > { %2595 = vmatmul.mubr.bf16.gmra.mrb[116].mxu1 %v2182_v19 }
 0x39a   : > { %2604 = vmatprep.mubr.bf16.mxu1 %v5339_v13 }
 0x3a1   : > { %2605 = vmatmul.mubr.bf16.gmra.mrb[120].mxu1 %v2183_v0 }
 0x3a2   : > { %2614 = vmatprep.mubr.bf16.mxu1 %v5339_v13 }
 0x3a9   : > { %2615 = vmatmul.mubr.bf16.gmra.mrb[124].mxu1 %v2184_v8 }
 0x404   : > { %v2433_v44 = vpop.f32.mrb[64].mxu1 }
 0x405   : > { %v2434_v47 = vadd.f32 %v2433_v44, %v6096_v56  ;;  %v2435_v62 = vpop.f32.mrb[65].mxu1 }
 0x406   : > { %v2436_v13 = vadd.f32 %v2435_v62, %v6100_v15  ;;  %v2437_v27 = vpop.f32.mrb[66].mxu1 }
 0x407   : > { %v2689_v54 = vmul.f32 0.2, %v2434_v47  ;;  %v2438_v28 = vadd.f32 %v2437_v27, %v6096_v56  ;;  %v2439_v33 = vpop.f32.mrb[67].mxu1  ;;  %vm2625_vm0 = vcmp.ge.f32.partialorder %v2434_v47, 0.0 }
 0x408   : > { %v2690_v24 = vmul.f32 0.2, %v2436_v13  ;;  %v2440_v29 = vadd.f32 %v2439_v33, %v6100_v15  ;;  %vm2626_vm1 = vcmp.ge.f32.partialorder %v2436_v13, 0.0 }
 0x409   : > { %vm2629_vm2 = vcmp.ge.f32.partialorder %v2438_v28, 0.0  ;;  %v2693_v31 = vmul.f32 0.2, %v2438_v28  ;;  %v2753_v57 = vsel %vm2625_vm0, %v2434_v47, %v2689_v54 }
 0x40a   : > { %vm2630_vm3 = vcmp.ge.f32.partialorder %v2440_v29, 0.0  ;;  %v2694_v32 = vmul.f32 0.2, %v2440_v29  ;;  %v2754_v38 = vsel %vm2626_vm1, %v2436_v13, %v2690_v24 }
 0x40b   : > { %v2757_v34 = vsel %vm2629_vm2, %v2438_v28, %v2693_v31 }
 0x40c   : > { %v2817_v35 = vpack.c.bf16 %v2757_v34, %v2753_v57  ;;  %v2443_v36 = vpop.f32.mrb[68].mxu1  ;;  %v2758_v39 = vsel %vm2630_vm3, %v2440_v29, %v2694_v32  ;;  %v4817_v29 = vld [vmem:[#allocation11 + $0x140] ss:$8 sps:$4 sm:$0xff]   ;;  %v4822_v57 = vld [vmem:[#allocation11 + $0x154] ss:$8 sps:$4 sm:$0xff]  }
 0x40d   : > { %v2444_v40 = vadd.f32 %v2443_v36, %v6096_v56  ;;  %v2445_v41 = vpop.f32.mrb[69].mxu1  ;;  %v2818_v21 = vpack.c.bf16 %v2758_v39, %v2754_v38 }
 0x40e   : > { %v2446_v18 = vadd.f32 %v2445_v41, %v6100_v15  ;;  %v2447_v43 = vpop.f32.mrb[70].mxu1  ;;  %v4820_v41 = vld [vmem:[#allocation11 + $0x150] ss:$8 sps:$4 sm:$0xff]  }
 0x40f   : > { %v2697_v48 = vmul.f32 0.2, %v2444_v40  ;;  %v2448_v49 = vadd.f32 %v2447_v43, %v6096_v56  ;;  %v2449_v51 = vpop.f32.mrb[71].mxu1  ;;  %3277 = vmatprep.mubr.bf16.mxu0 %v2818_v21  ;;  %vm2633_vm4 = vcmp.ge.f32.partialorder %v2444_v40, 0.0 }
 0x410   : > { %v2698_v52 = vmul.f32 0.2, %v2446_v18  ;;  %v2450_v37 = vadd.f32 %v2449_v51, %v6100_v15  ;;  %3278 = vmatmul.mubr.bf16.vlgmr.msra.gmra.mrb[32].mxu0 %v2817_v35  ;;  %vm2634_vm5 = vcmp.ge.f32.partialorder %v2446_v18, 0.0 }
 0x411   : > { %vm2637_vm6 = vcmp.ge.f32.partialorder %v2448_v49, 0.0  ;;  %v2701_v19 = vmul.f32 0.2, %v2448_v49  ;;  %3359 = vmatpush1.bf16.msra.mxu0 %v4805_v42  ;;  %v2761_v59 = vsel %vm2633_vm4, %v2444_v40, %v2697_v48  ;;  %v4825_v42 = vld [vmem:[#allocation11 + $0x164] ss:$8 sps:$4 sm:$0xff]  }
 0x412   : > { %vm2638_vm7 = vcmp.ge.f32.partialorder %v2450_v37, 0.0  ;;  %v2702_v55 = vmul.f32 0.2, %v2450_v37  ;;  %3360 = vmatprep.subr.bf16.mxu0 %v4810_v45  ;;  %v2762_v25 = vsel %vm2634_vm5, %v2446_v18, %v2698_v52 }
 0x413   : > { %v2765_v60 = vsel %vm2637_vm6, %v2448_v49, %v2701_v19 }
 0x414   : > { %v2453_v30 = vpop.f32.mrb[72].mxu1  ;;  %v2766_v61 = vsel %vm2638_vm7, %v2450_v37, %v2702_v55  ;;  %v2821_v63 = vpack.c.bf16 %v2765_v60, %v2761_v59  ;;  %v4828_v59 = vld [vmem:[#allocation11 + $0x174] ss:$8 sps:$4 sm:$0xff]  }
 0x415   : > { %v2454_v0 = vadd.f32 %v2453_v30, %v6096_v56  ;;  %v2455_v2 = vpop.f32.mrb[73].mxu1  ;;  %3361 = vmatpush1.bf16.msra.mxu0 %v4808_v53  ;;  %v2822_v3 = vpack.c.bf16 %v2766_v61, %v2762_v25  ;;  %v4823_v53 = vld [vmem:[#allocation11 + $0x160] ss:$8 sps:$4 sm:$0xff]  }
 0x416   : > { %v2456_v5 = vadd.f32 %v2455_v2, %v6100_v15  ;;  %v2457_v6 = vpop.f32.mrb[74].mxu1  ;;  %3362 = vmatprep.subr.bf16.mxu0 %v4813_v46  ;;  %v4826_v2 = vld [vmem:[#allocation11 + $0x170] ss:$8 sps:$4 sm:$0xff]  }
 0x417   : > { %v2705_v7 = vmul.f32 0.2, %v2454_v0  ;;  %v2458_v8 = vadd.f32 %v2457_v6, %v6096_v56  ;;  %v2459_v9 = vpop.f32.mrb[75].mxu1  ;;  %3287 = vmatprep.mubr.bf16.mxu0 %v2822_v3  ;;  %vm2641_vm8 = vcmp.ge.f32.partialorder %v2454_v0, 0.0 }
 0x418   : > { %v2706_v1 = vmul.f32 0.2, %v2456_v5  ;;  %v2460_v23 = vadd.f32 %v2459_v9, %v6100_v15  ;;  %3288 = vmatmul.mubr.bf16.gmra.mrb[36].mxu0 %v2821_v63  ;;  %vm2642_vm9 = vcmp.ge.f32.partialorder %v2456_v5, 0.0 }
 0x419   : > { %vm2645_vm10 = vcmp.ge.f32.partialorder %v2458_v8, 0.0  ;;  %v2709_v11 = vmul.f32 0.2, %v2458_v8  ;;  %3363 = vmatpush1.bf16.msra.mxu0 %v4811_v4  ;;  %v2769_v44 = vsel %vm2641_vm8, %v2454_v0, %v2705_v7  ;;  %v4831_v4 = vld [vmem:[#allocation11 + $0x184] ss:$8 sps:$4 sm:$0xff]  }
 0x41a   : > { %vm2646_vm11 = vcmp.ge.f32.partialorder %v2460_v23, 0.0  ;;  %v2710_v50 = vmul.f32 0.2, %v2460_v23  ;;  %3364 = vmatprep.subr.bf16.mxu0 %v4816_v26  ;;  %v2770_v13 = vsel %vm2642_vm9, %v2456_v5, %v2706_v1 }
 0x41b   : > { %v2773_v47 = vsel %vm2645_vm10, %v2458_v8, %v2709_v11 }
 0x41c   : > { %v2463_v62 = vpop.f32.mrb[76].mxu1  ;;  %v2774_v27 = vsel %vm2646_vm11, %v2460_v23, %v2710_v50  ;;  %v2825_v54 = vpack.c.bf16 %v2773_v47, %v2769_v44  ;;  %v4834_v44 = vld [vmem:[#allocation11 + $0x194] ss:$8 sps:$4 sm:$0xff]  }
 0x41d   : > { %v2464_v28 = vadd.f32 %v2463_v62, %v6096_v56  ;;  %v2465_v33 = vpop.f32.mrb[77].mxu1  ;;  %3365 = vmatpush1.bf16.msra.mxu0 %v4814_v14  ;;  %v2826_v24 = vpack.c.bf16 %v2774_v27, %v2770_v13  ;;  %v4829_v14 = vld [vmem:[#allocation11 + $0x180] ss:$8 sps:$4 sm:$0xff]  }
 0x41e   : > { %v2466_v31 = vadd.f32 %v2465_v33, %v6100_v15  ;;  %v2467_v32 = vpop.f32.mrb[78].mxu1  ;;  %3366 = vmatprep.subr.bf16.mxu0 %v4819_v17  ;;  %v4832_v33 = vld [vmem:[#allocation11 + $0x190] ss:$8 sps:$4 sm:$0xff]  }
 0x41f   : > { %v2713_v34 = vmul.f32 0.2, %v2464_v28  ;;  %v2468_v35 = vadd.f32 %v2467_v32, %v6096_v56  ;;  %v2469_v36 = vpop.f32.mrb[79].mxu1  ;;  %3297 = vmatprep.mubr.bf16.mxu0 %v2826_v24  ;;  %vm2649_vm12 = vcmp.ge.f32.partialorder %v2464_v28, 0.0 }
 0x420   : > { %v2714_v38 = vmul.f32 0.2, %v2466_v31  ;;  %v2470_v39 = vadd.f32 %v2469_v36, %v6100_v15  ;;  %3298 = vmatmul.mubr.bf16.gmra.mrb[40].mxu0 %v2825_v54  ;;  %vm2650_vm13 = vcmp.ge.f32.partialorder %v2466_v31, 0.0 }
 0x421   : > { %vm2653_vm14 = vcmp.ge.f32.partialorder %v2468_v35, 0.0  ;;  %v2717_v40 = vmul.f32 0.2, %v2468_v35  ;;  %3367 = vmatpush1.bf16.msra.mxu0 %v4817_v29  ;;  %v2777_v18 = vsel %vm2649_vm12, %v2464_v28, %v2713_v34  ;;  %v4837_v29 = vld [vmem:[#allocation11 + $0x1a4] ss:$8 sps:$4 sm:$0xff]  }
 0x422   : > { %vm2654_vm15 = vcmp.ge.f32.partialorder %v2470_v39, 0.0  ;;  %v2718_v21 = vmul.f32 0.2, %v2470_v39  ;;  %3368 = vmatprep.subr.bf16.mxu0 %v4822_v57  ;;  %v2778_v48 = vsel %vm2650_vm13, %v2466_v31, %v2714_v38 }
 0x423   : > { %v2781_v43 = vsel %vm2653_vm14, %v2468_v35, %v2717_v40 }
 0x424   : > { %v2473_v45 = vpop.f32.mrb[80].mxu1  ;;  %v2782_v49 = vsel %vm2654_vm15, %v2470_v39, %v2718_v21  ;;  %v2829_v51 = vpack.c.bf16 %v2781_v43, %v2777_v18  ;;  %v4840_v18 = vld [vmem:[#allocation11 + $0x1b4] ss:$8 sps:$4 sm:$0xff]  }
 0x425   : > { %v2474_v52 = vadd.f32 %v2473_v45, %v6096_v56  ;;  %v2475_v37 = vpop.f32.mrb[81].mxu1  ;;  %3369 = vmatpush1.bf16.msra.mxu0 %v4820_v41  ;;  %v2830_v19 = vpack.c.bf16 %v2782_v49, %v2778_v48  ;;  %v4835_v41 = vld [vmem:[#allocation11 + $0x1a0] ss:$8 sps:$4 sm:$0xff]  }
 0x426   : > { %v2476_v55 = vadd.f32 %v2475_v37, %v6100_v15  ;;  %v2477_v46 = vpop.f32.mrb[82].mxu1  ;;  %3370 = vmatprep.subr.bf16.mxu0 %v4825_v42  ;;  %v4838_v37 = vld [vmem:[#allocation11 + $0x1b0] ss:$8 sps:$4 sm:$0xff]  }
 0x427   : > { %v2721_v60 = vmul.f32 0.2, %v2474_v52  ;;  %v2478_v30 = vadd.f32 %v2477_v46, %v6096_v56  ;;  %v2479_v25 = vpop.f32.mrb[83].mxu1  ;;  %3307 = vmatprep.mubr.bf16.mxu0 %v2830_v19  ;;  %vm2657_vm0 = vcmp.ge.f32.partialorder %v2474_v52, 0.0 }
 0x428   : > { %v2722_v61 = vmul.f32 0.2, %v2476_v55  ;;  %v2480_v63 = vadd.f32 %v2479_v25, %v6100_v15  ;;  %3308 = vmatmul.mubr.bf16.gmra.mrb[44].mxu0 %v2829_v51  ;;  %vm2658_vm1 = vcmp.ge.f32.partialorder %v2476_v55, 0.0 }
 0x429   : > { %vm2661_vm2 = vcmp.ge.f32.partialorder %v2478_v30, 0.0  ;;  %v2725_v0 = vmul.f32 0.2, %v2478_v30  ;;  %3371 = vmatpush1.bf16.msra.mxu0 %v4823_v53  ;;  %v2785_v5 = vsel %vm2657_vm0, %v2474_v52, %v2721_v60  ;;  %v4843_v53 = vld [vmem:[#allocation11 + $0x1c4] ss:$8 sps:$4 sm:$0xff]  }
 0x42a   : > { %vm2662_vm3 = vcmp.ge.f32.partialorder %v2480_v63, 0.0  ;;  %v2726_v3 = vmul.f32 0.2, %v2480_v63  ;;  %3372 = vmatprep.subr.bf16.mxu0 %v4828_v59  ;;  %v2786_v7 = vsel %vm2658_vm1, %v2476_v55, %v2722_v61 }
 0x42b   : > { %v2789_v6 = vsel %vm2661_vm2, %v2478_v30, %v2725_v0 }
 0x42c   : > { %v2483_v26 = vpop.f32.mrb[84].mxu1  ;;  %v2790_v8 = vsel %vm2662_vm3, %v2480_v63, %v2726_v3  ;;  %v2833_v9 = vpack.c.bf16 %v2789_v6, %v2785_v5  ;;  %v4846_v5 = vld [vmem:[#allocation11 + $0x1d4] ss:$8 sps:$4 sm:$0xff]  }
 0x42d   : > { %v2484_v1 = vadd.f32 %v2483_v26, %v6096_v56  ;;  %v2485_v23 = vpop.f32.mrb[85].mxu1  ;;  %3373 = vmatpush1.bf16.msra.mxu0 %v4826_v2  ;;  %v2834_v11 = vpack.c.bf16 %v2790_v8, %v2786_v7  ;;  %v4841_v2 = vld [vmem:[#allocation11 + $0x1c0] ss:$8 sps:$4 sm:$0xff]  }
 0x42e   : > { %v2486_v50 = vadd.f32 %v2485_v23, %v6100_v15  ;;  %v2487_v17 = vpop.f32.mrb[86].mxu1  ;;  %3374 = vmatprep.subr.bf16.mxu0 %v4831_v4  ;;  %v6137_v23 = vrot.slane %v6092_v58, %v679_v16 }
 0x42f   : > { %v2729_v47 = vmul.f32 0.2, %v2484_v1  ;;  %v2488_v62 = vadd.f32 %v2487_v17, %v6096_v56  ;;  %v2489_v13 = vpop.f32.mrb[87].mxu1  ;;  %3317 = vmatprep.mubr.bf16.mxu0 %v2834_v11  ;;  %vm2665_vm4 = vcmp.ge.f32.partialorder %v2484_v1, 0.0  ;;  %v4844_v11 = vld [vmem:[#allocation11 + $0x1d0] ss:$8 sps:$4 sm:$0xff]  }
 0x430   : > { %v2730_v27 = vmul.f32 0.2, %v2486_v50  ;;  %v2490_v54 = vadd.f32 %v2489_v13, %v6100_v15  ;;  %3318 = vmatmul.mubr.bf16.gmra.mrb[48].mxu0 %v2833_v9  ;;  %vm2666_vm5 = vcmp.ge.f32.partialorder %v2486_v50, 0.0 }
 0x431   : > { %vm2669_vm6 = vcmp.ge.f32.partialorder %v2488_v62, 0.0  ;;  %v2733_v28 = vmul.f32 0.2, %v2488_v62  ;;  %3375 = vmatpush1.bf16.msra.mxu0 %v4829_v14  ;;  %v2793_v31 = vsel %vm2665_vm4, %v2484_v1, %v2729_v47 }
 0x432   : > { %vm2670_vm7 = vcmp.ge.f32.partialorder %v2490_v54, 0.0  ;;  %v2734_v24 = vmul.f32 0.2, %v2490_v54  ;;  %3376 = vmatprep.subr.bf16.mxu0 %v4834_v44  ;;  %v2794_v34 = vsel %vm2666_vm5, %v2486_v50, %v2730_v27 }
 0x433   : > { %v2797_v32 = vsel %vm2669_vm6, %v2488_v62, %v2733_v28  ;;  %v4847_v28 = vld [vmem:[#allocation11 + $0x1e0] ss:$8 sps:$4 sm:$0xff]  }
 0x434   : > { %v2493_v57 = vpop.f32.mrb[88].mxu1  ;;  %v2798_v35 = vsel %vm2670_vm7, %v2490_v54, %v2734_v24  ;;  %v2837_v36 = vpack.c.bf16 %v2797_v32, %v2793_v31 }
 0x435   : > { %v2494_v38 = vadd.f32 %v2493_v57, %v6096_v56  ;;  %v2495_v39 = vpop.f32.mrb[89].mxu1  ;;  %3377 = vmatpush1.bf16.msra.mxu0 %v4832_v33  ;;  %v2838_v40 = vpack.c.bf16 %v2798_v35, %v2794_v34  ;;  %v4850_v34 = vld [vmem:[#allocation11 + $0x1f0] ss:$8 sps:$4 sm:$0xff]  }
 0x436   : > { %v2496_v21 = vadd.f32 %v2495_v39, %v6100_v15  ;;  %v2497_v42 = vpop.f32.mrb[90].mxu1  ;;  %3378 = vmatprep.subr.bf16.mxu0 %v4837_v29 }
 0x437   : > { %v2737_v43 = vmul.f32 0.2, %v2494_v38  ;;  %v2498_v45 = vadd.f32 %v2497_v42, %v6096_v56  ;;  %v2499_v48 = vpop.f32.mrb[91].mxu1  ;;  %3327 = vmatprep.mubr.bf16.mxu0 %v2838_v40  ;;  %vm2673_vm8 = vcmp.ge.f32.partialorder %v2494_v38, 0.0 }
 0x438   : > { %v2738_v49 = vmul.f32 0.2, %v2496_v21  ;;  %v2500_v51 = vadd.f32 %v2499_v48, %v6100_v15  ;;  %3328 = vmatmul.mubr.bf16.gmra.mrb[52].mxu0 %v2837_v36  ;;  %vm2674_vm9 = vcmp.ge.f32.partialorder %v2496_v21, 0.0 }
 0x439   : > { %vm2677_vm10 = vcmp.ge.f32.partialorder %v2498_v45, 0.0  ;;  %v2741_v52 = vmul.f32 0.2, %v2498_v45  ;;  %3379 = vmatpush1.bf16.msra.mxu0 %v4835_v41  ;;  %v2801_v55 = vsel %vm2673_vm8, %v2494_v38, %v2737_v43 }
 0x43a   : > { %vm2678_vm11 = vcmp.ge.f32.partialorder %v2500_v51, 0.0  ;;  %v2742_v19 = vmul.f32 0.2, %v2500_v51  ;;  %3380 = vmatprep.subr.bf16.mxu0 %v4840_v18  ;;  %v2802_v60 = vsel %vm2674_vm9, %v2496_v21, %v2738_v49 }
 0x43b   : > { %v2805_v46 = vsel %vm2677_vm10, %v2498_v45, %v2741_v52 }
 0x43c   : > { %v2503_v59 = vpop.f32.mrb[92].mxu1  ;;  %v2806_v30 = vsel %vm2678_vm11, %v2500_v51, %v2742_v19  ;;  %v2841_v25 = vpack.c.bf16 %v2805_v46, %v2801_v55 }
 0x43d   : > { %v2504_v61 = vadd.f32 %v2503_v59, %v6096_v56  ;;  %v2505_v63 = vpop.f32.mrb[93].mxu1  ;;  %3381 = vmatpush1.bf16.msra.mxu0 %v4838_v37  ;;  %v2842_v0 = vpack.c.bf16 %v2806_v30, %v2802_v60 }
 0x43e   : > { %v2506_v3 = vadd.f32 %v2505_v63, %v6100_v15  ;;  %v2507_v4 = vpop.f32.mrb[94].mxu1  ;;  %3382 = vmatprep.subr.bf16.mxu0 %v4843_v53 }
 0x43f   : > { %v2745_v6 = vmul.f32 0.2, %v2504_v61  ;;  %v2508_v26 = vadd.f32 %v2507_v4, %v6096_v56  ;;  %v2509_v7 = vpop.f32.mrb[95].mxu1  ;;  %3337 = vmatprep.mubr.bf16.mxu0 %v2842_v0  ;;  %vm2681_vm12 = vcmp.ge.f32.partialorder %v2504_v61, 0.0  ;;  %v6142_v56 = vrot.slane %v6092_v58, %v683_v20 }
 0x440   : > { %v2746_v8 = vmul.f32 0.2, %v2506_v3  ;;  %v2510_v9 = vadd.f32 %v2509_v7, %v6100_v15  ;;  %3338 = vmatmul.mubr.bf16.gmra.mrb[56].mxu0 %v2841_v25  ;;  %vm2682_vm13 = vcmp.ge.f32.partialorder %v2506_v3, 0.0  ;;  %v4849_v15 = vld [vmem:[#allocation11 + $0x1e4] ss:$8 sps:$4 sm:$0xff]  }
 0x441   : > { %vm2685_vm14 = vcmp.ge.f32.partialorder %v2508_v26, 0.0  ;;  %v2749_v1 = vmul.f32 0.2, %v2508_v26  ;;  %3383 = vmatpush1.bf16.msra.mxu0 %v4841_v2  ;;  %v2809_v50 = vsel %vm2681_vm12, %v2504_v61, %v2745_v6 }
 0x442   : > { %vm2686_vm15 = vcmp.ge.f32.partialorder %v2510_v9, 0.0  ;;  %v2750_v14 = vmul.f32 0.2, %v2510_v9  ;;  %3384 = vmatprep.subr.bf16.mxu0 %v4846_v5  ;;  %v2810_v47 = vsel %vm2682_vm13, %v2506_v3, %v2746_v8 }
 0x443   : > { %v2813_v17 = vsel %vm2685_vm14, %v2508_v26, %v2749_v1 }
 0x444   : > { %v2546_v44 = vpop.f32.mrb[96].mxu1  ;;  %v2814_v62 = vsel %vm2686_vm15, %v2510_v9, %v2750_v14  ;;  %v2845_v13 = vpack.c.bf16 %v2813_v17, %v2809_v50 }
 0x445   : > { %v2547_v27 = vadd.f32 %v2546_v44, %v6137_v23  ;;  %v2548_v16 = vpop.f32.mrb[97].mxu1  ;;  %3385 = vmatpush1.bf16.msra.mxu0 %v4844_v11  ;;  %v2846_v54 = vpack.c.bf16 %v2814_v62, %v2810_v47 }
 0x446   : > { %v2549_v33 = vadd.f32 %v2548_v16, %v6142_v56  ;;  %v2550_v24 = vpop.f32.mrb[98].mxu1  ;;  %3386 = vmatprep.subr.bf16.mxu0 %v4849_v15 }
 0x447   : > { %v2691_v20 = vmul.f32 0.2, %v2547_v27  ;;  %v2551_v58 = vadd.f32 %v2550_v24, %v6137_v23  ;;  %v2552_v29 = vpop.f32.mrb[99].mxu1  ;;  %3347 = vmatprep.mubr.bf16.mxu0 %v2846_v54  ;;  %vm2627_vm0 = vcmp.ge.f32.partialorder %v2547_v27, 0.0 }
 0x448   : > { %v2692_v31 = vmul.f32 0.2, %v2549_v33  ;;  %v2553_v32 = vadd.f32 %v2552_v29, %v6142_v56  ;;  %3348 = vmatmul.mubr.bf16.gmra.mrb[60].mxu0 %v2845_v13  ;;  %vm2628_vm1 = vcmp.ge.f32.partialorder %v2549_v33, 0.0 }
 0x449   : > { %vm2631_vm2 = vcmp.ge.f32.partialorder %v2551_v58, 0.0  ;;  %v2695_v57 = vmul.f32 0.2, %v2551_v58  ;;  %3387 = vmatpush1.bf16.msra.mxu0 %v4847_v28  ;;  %v2755_v36 = vsel %vm2627_vm0, %v2547_v27, %v2691_v20 }
 0x44a   : > { %vm2632_vm3 = vcmp.ge.f32.partialorder %v2553_v32, 0.0  ;;  %v2696_v35 = vmul.f32 0.2, %v2553_v32  ;;  %3388 = vmatprep.subr.bf16.mxu0 %v4852_v10  ;;  %v2756_v41 = vsel %vm2628_vm1, %v2549_v33, %v2692_v31 }
 0x44b   : > { %v2759_v38 = vsel %vm2631_vm2, %v2551_v58, %v2695_v57 }
 0x44c   : > { %v2819_v39 = vpack.c.bf16 %v2759_v38, %v2755_v36  ;;  %v2556_v40 = vpop.f32.mrb[100].mxu1  ;;  %v2760_v21 = vsel %vm2632_vm3, %v2553_v32, %v2696_v35 }
 0x44d   : > { %v2557_v42 = vadd.f32 %v2556_v40, %v6137_v23  ;;  %v2558_v18 = vpop.f32.mrb[101].mxu1  ;;  %3389 = vmatpush1.bf16.msra.mxu0 %v4850_v34  ;;  %v2820_v43 = vpack.c.bf16 %v2760_v21, %v2756_v41 }
 0x44e   : > { %v2559_v45 = vadd.f32 %v2558_v18, %v6142_v56  ;;  %v2560_v48 = vpop.f32.mrb[102].mxu1 }
 0x44f   : > { %v2699_v49 = vmul.f32 0.2, %v2557_v42  ;;  %v2561_v51 = vadd.f32 %v2560_v48, %v6137_v23  ;;  %v2562_v52 = vpop.f32.mrb[103].mxu1  ;;  %3390 = vmatprep.mubr.bf16.mxu0 %v2820_v43  ;;  %vm2635_vm4 = vcmp.ge.f32.partialorder %v2557_v42, 0.0 }
 0x450   : > { %v2700_v37 = vmul.f32 0.2, %v2559_v45  ;;  %v2563_v19 = vadd.f32 %v2562_v52, %v6142_v56  ;;  %3391 = vmatmul.mubr.bf16.vlgmr.msra.gmra.mrb[32].mxu0 %v2819_v39  ;;  %vm2636_vm5 = vcmp.ge.f32.partialorder %v2559_v45, 0.0 }
 0x451   : > { %vm2639_vm6 = vcmp.ge.f32.partialorder %v2561_v51, 0.0  ;;  %v2703_v53 = vmul.f32 0.2, %v2561_v51  ;;  %v2763_v46 = vsel %vm2635_vm4, %v2557_v42, %v2699_v49 }
 0x452   : > { %vm2640_vm7 = vcmp.ge.f32.partialorder %v2563_v19, 0.0  ;;  %v2704_v55 = vmul.f32 0.2, %v2563_v19  ;;  %v2764_v30 = vsel %vm2636_vm5, %v2559_v45, %v2700_v37 }
 0x453   : > { %v2767_v59 = vsel %vm2639_vm6, %v2561_v51, %v2703_v53 }
 0x454   : > { %v2566_v60 = vpop.f32.mrb[104].mxu1  ;;  %v2768_v25 = vsel %vm2640_vm7, %v2563_v19, %v2704_v55  ;;  %v2823_v61 = vpack.c.bf16 %v2767_v59, %v2763_v46 }
 0x455   : > { %v2567_v63 = vadd.f32 %v2566_v60, %v6137_v23  ;;  %v2568_v0 = vpop.f32.mrb[105].mxu1  ;;  %v2824_v2 = vpack.c.bf16 %v2768_v25, %v2764_v30 }
 0x456   : > { %v2569_v3 = vadd.f32 %v2568_v0, %v6142_v56  ;;  %v2570_v4 = vpop.f32.mrb[106].mxu1 }
 0x457   : > { %v2707_v5 = vmul.f32 0.2, %v2567_v63  ;;  %v2571_v6 = vadd.f32 %v2570_v4, %v6137_v23  ;;  %v2572_v26 = vpop.f32.mrb[107].mxu1  ;;  %3400 = vmatprep.mubr.bf16.mxu0 %v2824_v2  ;;  %vm2643_vm8 = vcmp.ge.f32.partialorder %v2567_v63, 0.0 }
 0x458   : > { %v2708_v7 = vmul.f32 0.2, %v2569_v3  ;;  %v2573_v8 = vadd.f32 %v2572_v26, %v6142_v56  ;;  %3401 = vmatmul.mubr.bf16.gmra.mrb[36].mxu0 %v2823_v61  ;;  %vm2644_vm9 = vcmp.ge.f32.partialorder %v2569_v3, 0.0 }
 0x459   : > { %vm2647_vm10 = vcmp.ge.f32.partialorder %v2571_v6, 0.0  ;;  %v2711_v9 = vmul.f32 0.2, %v2571_v6  ;;  %v2771_v11 = vsel %vm2643_vm8, %v2567_v63, %v2707_v5 }
 0x45a   : > { %vm2648_vm11 = vcmp.ge.f32.partialorder %v2573_v8, 0.0  ;;  %v2712_v1 = vmul.f32 0.2, %v2573_v8  ;;  %v2772_v50 = vsel %vm2644_vm9, %v2569_v3, %v2708_v7 }
 0x45b   : > { %v2775_v14 = vsel %vm2647_vm10, %v2571_v6, %v2711_v9 }
 0x45c   : > { %v2576_v15 = vpop.f32.mrb[108].mxu1  ;;  %v2776_v17 = vsel %vm2648_vm11, %v2573_v8, %v2712_v1  ;;  %v2827_v44 = vpack.c.bf16 %v2775_v14, %v2771_v11 }
 0x45d   : > { %v2577_v47 = vadd.f32 %v2576_v15, %v6137_v23  ;;  %v2578_v62 = vpop.f32.mrb[109].mxu1  ;;  %v2828_v13 = vpack.c.bf16 %v2776_v17, %v2772_v50 }
 0x45e   : > { %v2579_v27 = vadd.f32 %v2578_v62, %v6142_v56  ;;  %v2580_v16 = vpop.f32.mrb[110].mxu1 }
 0x45f   : > { %v2715_v54 = vmul.f32 0.2, %v2577_v47  ;;  %v2581_v28 = vadd.f32 %v2580_v16, %v6137_v23  ;;  %v2582_v33 = vpop.f32.mrb[111].mxu1  ;;  %3410 = vmatprep.mubr.bf16.mxu0 %v2828_v13  ;;  %vm2651_vm12 = vcmp.ge.f32.partialorder %v2577_v47, 0.0 }
 0x460   : > { %v2716_v24 = vmul.f32 0.2, %v2579_v27  ;;  %v2583_v10 = vadd.f32 %v2582_v33, %v6142_v56  ;;  %3411 = vmatmul.mubr.bf16.gmra.mrb[40].mxu0 %v2827_v44  ;;  %vm2652_vm13 = vcmp.ge.f32.partialorder %v2579_v27, 0.0 }
 0x461   : > { %vm2655_vm14 = vcmp.ge.f32.partialorder %v2581_v28, 0.0  ;;  %v2719_v20 = vmul.f32 0.2, %v2581_v28  ;;  %v2779_v29 = vsel %vm2651_vm12, %v2577_v47, %v2715_v54 }
 0x462   : > { %vm2656_vm15 = vcmp.ge.f32.partialorder %v2583_v10, 0.0  ;;  %v2720_v58 = vmul.f32 0.2, %v2583_v10  ;;  %v2780_v57 = vsel %vm2652_vm13, %v2579_v27, %v2716_v24 }
 0x463   : > { %v2783_v31 = vsel %vm2655_vm14, %v2581_v28, %v2719_v20 }
 0x464   : > { %v2586_v32 = vpop.f32.mrb[112].mxu1  ;;  %v2784_v34 = vsel %vm2656_vm15, %v2583_v10, %v2720_v58  ;;  %v2831_v35 = vpack.c.bf16 %v2783_v31, %v2779_v29 }
 0x465   : > { %v2587_v36 = vadd.f32 %v2586_v32, %v6137_v23  ;;  %v2588_v38 = vpop.f32.mrb[113].mxu1  ;;  %v2832_v39 = vpack.c.bf16 %v2784_v34, %v2780_v57 }
 0x466   : > { %v2589_v40 = vadd.f32 %v2588_v38, %v6142_v56  ;;  %v2590_v41 = vpop.f32.mrb[114].mxu1 }
 0x467   : > { %v2723_v21 = vmul.f32 0.2, %v2587_v36  ;;  %v2591_v42 = vadd.f32 %v2590_v41, %v6137_v23  ;;  %v2592_v18 = vpop.f32.mrb[115].mxu1  ;;  %3420 = vmatprep.mubr.bf16.mxu0 %v2832_v39  ;;  %vm2659_vm0 = vcmp.ge.f32.partialorder %v2587_v36, 0.0 }
 0x468   : > { %v2724_v43 = vmul.f32 0.2, %v2589_v40  ;;  %v2593_v45 = vadd.f32 %v2592_v18, %v6142_v56  ;;  %3421 = vmatmul.mubr.bf16.gmra.mrb[44].mxu0 %v2831_v35  ;;  %vm2660_vm1 = vcmp.ge.f32.partialorder %v2589_v40, 0.0 }
 0x469   : > { %vm2663_vm2 = vcmp.ge.f32.partialorder %v2591_v42, 0.0  ;;  %v2727_v48 = vmul.f32 0.2, %v2591_v42  ;;  %v2787_v51 = vsel %vm2659_vm0, %v2587_v36, %v2723_v21 }
 0x46a   : > { %vm2664_vm3 = vcmp.ge.f32.partialorder %v2593_v45, 0.0  ;;  %v2728_v49 = vmul.f32 0.2, %v2593_v45  ;;  %v2788_v19 = vsel %vm2660_vm1, %v2589_v40, %v2724_v43 }
 0x46b   : > { %v2791_v52 = vsel %vm2663_vm2, %v2591_v42, %v2727_v48 }
 0x46c   : > { %v2596_v37 = vpop.f32.mrb[116].mxu1  ;;  %v2792_v53 = vsel %vm2664_vm3, %v2593_v45, %v2728_v49  ;;  %v2835_v55 = vpack.c.bf16 %v2791_v52, %v2787_v51 }
 0x46d   : > { %v2597_v46 = vadd.f32 %v2596_v37, %v6137_v23  ;;  %v2598_v59 = vpop.f32.mrb[117].mxu1  ;;  %v2836_v60 = vpack.c.bf16 %v2792_v53, %v2788_v19 }
 0x46e   : > { %v2599_v30 = vadd.f32 %v2598_v59, %v6142_v56  ;;  %v2600_v25 = vpop.f32.mrb[118].mxu1 }
 0x46f   : > { %v2731_v61 = vmul.f32 0.2, %v2597_v46  ;;  %v2601_v63 = vadd.f32 %v2600_v25, %v6137_v23  ;;  %v2602_v0 = vpop.f32.mrb[119].mxu1  ;;  %3430 = vmatprep.mubr.bf16.mxu0 %v2836_v60  ;;  %vm2667_vm4 = vcmp.ge.f32.partialorder %v2597_v46, 0.0 }
 0x470   : > { %v2732_v2 = vmul.f32 0.2, %v2599_v30  ;;  %v2603_v3 = vadd.f32 %v2602_v0, %v6142_v56  ;;  %3431 = vmatmul.mubr.bf16.gmra.mrb[48].mxu0 %v2835_v55  ;;  %vm2668_vm5 = vcmp.ge.f32.partialorder %v2599_v30, 0.0 }
 0x471   : > { %vm2671_vm6 = vcmp.ge.f32.partialorder %v2601_v63, 0.0  ;;  %v2735_v4 = vmul.f32 0.2, %v2601_v63  ;;  %v2795_v6 = vsel %vm2667_vm4, %v2597_v46, %v2731_v61 }
 0x472   : > { %vm2672_vm7 = vcmp.ge.f32.partialorder %v2603_v3, 0.0  ;;  %v2736_v5 = vmul.f32 0.2, %v2603_v3  ;;  %v2796_v8 = vsel %vm2668_vm5, %v2599_v30, %v2732_v2 }
 0x473   : > { %v2799_v26 = vsel %vm2671_vm6, %v2601_v63, %v2735_v4 }
 0x474   : > { %v2606_v7 = vpop.f32.mrb[120].mxu1  ;;  %v2800_v9 = vsel %vm2672_vm7, %v2603_v3, %v2736_v5  ;;  %v2839_v1 = vpack.c.bf16 %v2799_v26, %v2795_v6 }
 0x475   : > { %v2607_v11 = vadd.f32 %v2606_v7, %v6137_v23  ;;  %v2608_v14 = vpop.f32.mrb[121].mxu1  ;;  %v2840_v15 = vpack.c.bf16 %v2800_v9, %v2796_v8 }
 0x476   : > { %v2609_v50 = vadd.f32 %v2608_v14, %v6142_v56  ;;  %v2610_v17 = vpop.f32.mrb[122].mxu1 }
 0x477   : > { %v2739_v44 = vmul.f32 0.2, %v2607_v11  ;;  %v2611_v47 = vadd.f32 %v2610_v17, %v6137_v23  ;;  %v2612_v62 = vpop.f32.mrb[123].mxu1  ;;  %3440 = vmatprep.mubr.bf16.mxu0 %v2840_v15  ;;  %vm2675_vm8 = vcmp.ge.f32.partialorder %v2607_v11, 0.0 }
 0x478   : > { %v2740_v13 = vmul.f32 0.2, %v2609_v50  ;;  %v2613_v27 = vadd.f32 %v2612_v62, %v6142_v56  ;;  %3441 = vmatmul.mubr.bf16.gmra.mrb[52].mxu0 %v2839_v1  ;;  %vm2676_vm9 = vcmp.ge.f32.partialorder %v2609_v50, 0.0 }
 0x479   : > { %vm2679_vm10 = vcmp.ge.f32.partialorder %v2611_v47, 0.0  ;;  %v2743_v16 = vmul.f32 0.2, %v2611_v47  ;;  %v2803_v28 = vsel %vm2675_vm8, %v2607_v11, %v2739_v44 }
 0x47a   : > { %vm2680_vm11 = vcmp.ge.f32.partialorder %v2613_v27, 0.0  ;;  %v2744_v54 = vmul.f32 0.2, %v2613_v27  ;;  %v2804_v10 = vsel %vm2676_vm9, %v2609_v50, %v2740_v13 }
 0x47b   : > { %v2807_v33 = vsel %vm2679_vm10, %v2611_v47, %v2743_v16 }
 0x47c   : > { %v2616_v24 = vpop.f32.mrb[124].mxu1  ;;  %v2808_v20 = vsel %vm2680_vm11, %v2613_v27, %v2744_v54  ;;  %v2843_v58 = vpack.c.bf16 %v2807_v33, %v2803_v28 }
 0x47d   : > { %v2617_v29 = vadd.f32 %v2616_v24, %v6137_v23  ;;  %v2618_v31 = vpop.f32.mrb[125].mxu1  ;;  %v2844_v32 = vpack.c.bf16 %v2808_v20, %v2804_v10 }
 0x47e   : > { %v2619_v57 = vadd.f32 %v2618_v31, %v6142_v56  ;;  %v2620_v34 = vpop.f32.mrb[126].mxu1 }
 0x47f   : > { %v2747_v35 = vmul.f32 0.2, %v2617_v29  ;;  %v2621_v36 = vadd.f32 %v2620_v34, %v6137_v23  ;;  %v2622_v38 = vpop.f32.mrb[127].mxu1  ;;  %3450 = vmatprep.mubr.bf16.mxu0 %v2844_v32  ;;  %vm2683_vm12 = vcmp.ge.f32.partialorder %v2617_v29, 0.0 }
 0x480   : > { %v2748_v39 = vmul.f32 0.2, %v2619_v57  ;;  %v2623_v40 = vadd.f32 %v2622_v38, %v6142_v56  ;;  %3451 = vmatmul.mubr.bf16.gmra.mrb[56].mxu0 %v2843_v58  ;;  %vm2684_vm13 = vcmp.ge.f32.partialorder %v2619_v57, 0.0 }
 0x481   : > { %vm2687_vm14 = vcmp.ge.f32.partialorder %v2621_v36, 0.0  ;;  %v2751_v41 = vmul.f32 0.2, %v2621_v36  ;;  %v2811_v42 = vsel %vm2683_vm12, %v2617_v29, %v2747_v35 }
 0x482   : > { %vm2688_vm15 = vcmp.ge.f32.partialorder %v2623_v40, 0.0  ;;  %v2752_v21 = vmul.f32 0.2, %v2623_v40  ;;  %v2812_v23 = vsel %vm2684_vm13, %v2619_v57, %v2748_v39 }
 0x483   : > { %v2815_v18 = vsel %vm2687_vm14, %v2621_v36, %v2751_v41 }
 0x484   : > { %v2816_v43 = vsel %vm2688_vm15, %v2623_v40, %v2752_v21  ;;  %v2847_v45 = vpack.c.bf16 %v2815_v18, %v2811_v42 }
 0x485   : > { %v2848_v48 = vpack.c.bf16 %v2816_v43, %v2812_v23 }
 0x487   : > { %3460 = vmatprep.mubr.bf16.mxu0 %v2848_v48 }
 0x488   : > { %3461 = vmatmul.mubr.bf16.gmra.mrb[60].mxu0 %v2847_v45 }
 0x489   : > { %5198 = shalt.err (!%p5195_p4)
}
 0x48a   : > { %s5199_s0 = scalar_lea.hbm %s6183_s8, 2048  ;;  %s5203_s2 = scalar_lea.hbm %s6392_s11, 4096 }
 0x48b   : > { %p5200_p11 = scmp.ne.s32.totalorder %s6183_s8, %s5199_s0  ;;  %p5204_p1 = scmp.lt.u32.totalorder %s6183_s8, %s6392_s11 }
 0x48c   : > { %p5205_p2 = scmp.lt.u32.totalorder %s5203_s2, %s5199_s0  ;;  %p5207_p0 = scmp.lt.u32.totalorder %s5199_s0, %s6183_s8 }
 0x48d   : > { %p5201_p7 = pnand %p5200_p11, %p5592_p3 }
 0x48e   : > { %p5206_p13 = por %p5205_p2, %p5204_p1 }
 0x48f   : > { %p5202_p12 = pneg %p5201_p7 }
 0x490   : > { %p5208_p6 = por %p5207_p0, %p5206_p13 }
 0x492   : > { %p5209_p8 = pnand %p5208_p6, %p5202_p12 }
 0x494   : > { %5212 = shalt.err (!%p5209_p8)
}
 0x495   : > { %s5341_s4 = smov 128   ;;  %s5342_s20 = smov 8  }
 0x496   : > { %4427 = dma.vmem_to_hbm [thread:$0]  (%p5592_p3), %s6185_s21, 2048, %s6183_s8, %s6189_s30, %s5341_s4, %s5341_s4, %s5342_s20  }
 0x497   : > { %s6446_s10 = sld [smem:[#allocation34_spill]]  ;;  %s3816_s27 = sshll.u32 %s5928_s12, 4  ;;  %s6224_s27 = int_to_ptr.vmem [resolvable:$true] %s3816_s27 }
 0x498   : > { %s5213_s0 = scalar_lea.vmem %s6224_s27, 2048  ;;  %s5343_s16 = smov [#allocation16]  }
 0x499   : > { %p5214_p10 = scmp.ne.s32.totalorder %s6224_s27, %s5213_s0  ;;  %s5217_s6 = sshll.u32 %s5343_s16, 4  ;;  %s5218_s6 = int_to_ptr.vmem [resolvable:$false] %s5217_s6 }
 0x49a   : > { %s5219_s21 = scalar_lea.vmem %s5218_s6, 4096  ;;  %p5220_p4 = scmp.lt.s32.totalorder %s6224_s27, %s5218_s6 }
 0x49b   : > { %p5215_p5 = pnand %p5214_p10, %p5592_p3  ;;  %p5221_p11 = scmp.lt.s32.totalorder %s5219_s21, %s5213_s0 }
 0x49d   : > { %s6221_s18 = scalar_lea.hbm %s6446_s10, %s4276_s14  ;;  %p5216_p9 = pneg %p5215_p5 }
 0x49e   : > { %p5222_p7 = por %p5221_p11, %p5220_p4 }
 0x4a0   : > { %p5223_p12 = pnand %p5222_p7, %p5216_p9 }
 0x4a2   : > { %5226 = shalt.err (!%p5223_p12)
}
 0x4a3   : > { %s5227_s12 = scalar_lea.hbm %s6221_s18, 2048  ;;  %s5231_s2 = scalar_lea.hbm %s6446_s10, 4096 }
 0x4a4   : > { %p5228_p1 = scmp.ne.s32.totalorder %s6221_s18, %s5227_s12  ;;  %p5232_p0 = scmp.lt.u32.totalorder %s6221_s18, %s6446_s10 }
 0x4a5   : > { %p5233_p6 = scmp.lt.u32.totalorder %s5231_s2, %s5227_s12  ;;  %p5235_p10 = scmp.lt.u32.totalorder %s5227_s12, %s6221_s18 }
 0x4a6   : > { %p5229_p2 = pnand %p5228_p1, %p5592_p3 }
 0x4a7   : > { %p5234_p8 = por %p5233_p6, %p5232_p0 }
 0x4a8   : > { %p5230_p13 = pneg %p5229_p2 }
 0x4a9   : > { %p5236_p5 = por %p5235_p10, %p5234_p8 }
 0x4ab   : > { %p5237_p9 = pnand %p5236_p5, %p5230_p13 }
 0x4ad   : > { %5240 = shalt.err (!%p5237_p9)
}
 0x4ae   : > { %4428 = dma.vmem_to_hbm [thread:$0]  (%p5592_p3), %s6224_s27, 2048, %s6221_s18, %s6189_s30, %s5341_s4, %s5341_s4, %s5342_s20  }
 0x4af   : > { %s6447_s0 = sld [smem:[#allocation32_spill]]  ;;  %s6278_s30 = scalar_lea.vmem [#allocation13], %s4026_s15 }
 0x4b0   : > { %s4275_s15 = sshll.u32 %s5433_s25, 12  ;;  %s3784_s4 = sshll.u32 %s6278_s30, 4  ;;  %s6332_s4 = int_to_ptr.vmem [resolvable:$true] %s3784_s4 }
 0x4b1   : > { %s6448_s27 = sld [smem:[#allocation33_spill]]  ;;  %s3760_s25 = scalar_lea.sflag [#allocation4], %s5690_s9 }
 0x4b2   : > { %s5241_s6 = scalar_lea.vmem %s6332_s4, 4096  ;;  %s5344_s21 = smov [#allocation13]  }
 0x4b3   : > { %p5242_p4 = scmp.ne.s32.totalorder %s6332_s4, %s5241_s6  ;;  %s5245_s12 = sshll.u32 %s5344_s21, 4  ;;  %s5246_s12 = int_to_ptr.vmem [resolvable:$false] %s5245_s12 }
 0x4b4   : > { %s5247_s14 = scalar_lea.vmem %s5246_s12, 8192  ;;  %p5248_p12 = scmp.lt.s32.totalorder %s6332_s4, %s5246_s12 }
 0x4b5   : > { %v2913_v56 = vld [vmem:[%s6447_s0] sm:$0x3]  ;;  %p5243_p11 = pnand %p5242_p4, %p5592_p3  ;;  %p5249_p1 = scmp.lt.s32.totalorder %s5247_s14, %s5241_s6 }
 0x4b6   : > { %v6255_v49 = vrot.slane %v2913_v56, %v5814_v12  ;;  %v6258_v51 = vrot.slane %v2913_v56, %v5822_v22 }
 0x4b7   : > { %s6330_s16 = scalar_lea.hbm %s6448_s27, %s4275_s15  ;;  %p5244_p7 = pneg %p5243_p11 }
 0x4b8   : > { %p5250_p2 = por %p5249_p1, %p5248_p12 }
 0x4ba   : > { %p5251_p13 = pnand %p5250_p2, %p5244_p7 }
 0x523   : > { %v3392_v52 = vpop.f32.mrb[32].mxu0 }
 0x524   : > { %v4310_v37 = vadd.f32 %v3392_v52, %v6255_v49  ;;  %v3394_v19 = vpop.f32.mrb[33].mxu0 }
 0x525   : > { %v4311_v53 = vadd.f32 %v3394_v19, %v6258_v51  ;;  %v3396_v55 = vpop.f32.mrb[34].mxu0 }
 0x526   : > { %v3471_v46 = vsub.f32 0.0, %v4310_v37  ;;  %v4312_v59 = vadd.f32 %v3396_v55, %v6255_v49  ;;  %v3398_v60 = vpop.f32.mrb[35].mxu0 }
 0x527   : > { %v3472_v30 = vsub.f32 0.0, %v4311_v53  ;;  %v4313_v25 = vadd.f32 %v3398_v60, %v6258_v51 }
 0x528   : > { %v3503_v61 = vmul.f32 1.442695, %v3471_v46  ;;  %v3473_v12 = vsub.f32 0.0, %v4312_v59 }
 0x529   : > { %v3505_v63 = vmul.f32 1.442695, %v3472_v30  ;;  %v3474_v0 = vsub.f32 0.0, %v4313_v25 }
 0x52a   : > { %4885 = vpow2.f32 %v3503_v61  ;;  %v3507_v22 = vmul.f32 1.442695, %v3473_v12 }
 0x52b   : > { %4887 = vpow2.f32 %v3505_v63  ;;  %v3509_v2 = vmul.f32 1.442695, %v3474_v0  ;;  %v3402_v3 = vpop.f32.mrb[36].mxu0 }
 0x52c   : > { %4889 = vpow2.f32 %v3507_v22  ;;  %v4314_v4 = vadd.f32 %v3402_v3, %v6255_v49  ;;  %v3404_v5 = vpop.f32.mrb[37].mxu0 }
 0x52d   : > { %4891 = vpow2.f32 %v3509_v2  ;;  %v4315_v6 = vadd.f32 %v3404_v5, %v6258_v51  ;;  %v3406_v26 = vpop.f32.mrb[38].mxu0 }
 0x52e   : > { %v3475_v7 = vsub.f32 0.0, %v4314_v4  ;;  %v4316_v8 = vadd.f32 %v3406_v26, %v6255_v49  ;;  %v3408_v9 = vpop.f32.mrb[39].mxu0 }
 0x52f   : > { %v3476_v1 = vsub.f32 0.0, %v4315_v6  ;;  %v4317_v11 = vadd.f32 %v3408_v9, %v6258_v51 }
 0x530   : > { %v3511_v14 = vmul.f32 1.442695, %v3475_v7  ;;  %v3477_v15 = vsub.f32 0.0, %v4316_v8 }
 0x531   : > { %v3513_v50 = vmul.f32 1.442695, %v3476_v1  ;;  %v3478_v17 = vsub.f32 0.0, %v4317_v11 }
 0x532   : > { %4893 = vpow2.f32 %v3511_v14  ;;  %v3515_v44 = vmul.f32 1.442695, %v3477_v15 }
 0x533   : > { %4895 = vpow2.f32 %v3513_v50  ;;  %v3517_v47 = vmul.f32 1.442695, %v3478_v17  ;;  %v3412_v62 = vpop.f32.mrb[40].mxu0 }
 0x534   : > { %v4886_v13 = vpop.eup %4885  ;;  %4897 = vpow2.f32 %v3515_v44  ;;  %v4318_v27 = vadd.f32 %v3412_v62, %v6255_v49  ;;  %v3414_v16 = vpop.f32.mrb[41].mxu0 }
 0x535   : > { %v4888_v54 = vpop.eup %4887  ;;  %v3567_v28 = vadd.f32 1.0, %v4886_v13  ;;  %4899 = vpow2.f32 %v3517_v47  ;;  %v4319_v33 = vadd.f32 %v3414_v16, %v6258_v51  ;;  %v3416_v24 = vpop.f32.mrb[42].mxu0 }
 0x536   : > { %v4890_v10 = vpop.eup %4889  ;;  %v3568_v20 = vadd.f32 1.0, %v4888_v54  ;;  %v3479_v58 = vsub.f32 0.0, %v4318_v27  ;;  %v4320_v29 = vadd.f32 %v3416_v24, %v6255_v49  ;;  %v3418_v31 = vpop.f32.mrb[43].mxu0 }
 0x537   : > { %v4892_v32 = vpop.eup %4891  ;;  %4901 = vrcp.f32 %v3567_v28  ;;  %v3569_v57 = vadd.f32 1.0, %v4890_v10  ;;  %v3480_v34 = vsub.f32 0.0, %v4319_v33  ;;  %v4321_v35 = vadd.f32 %v3418_v31, %v6258_v51 }
 0x538   : > { %4903 = vrcp.f32 %v3568_v20  ;;  %v3570_v36 = vadd.f32 1.0, %v4892_v32  ;;  %v3519_v38 = vmul.f32 1.442695, %v3479_v58  ;;  %v3481_v39 = vsub.f32 0.0, %v4320_v29 }
 0x539   : > { %4905 = vrcp.f32 %v3569_v57  ;;  %v3521_v40 = vmul.f32 1.442695, %v3480_v34  ;;  %v3482_v41 = vsub.f32 0.0, %v4321_v35 }
 0x53a   : > { %4907 = vrcp.f32 %v3570_v36  ;;  %v3523_v21 = vmul.f32 1.442695, %v3481_v39 }
 0x53b   : > { %4909 = vpow2.f32 %v3519_v38  ;;  %v3525_v42 = vmul.f32 1.442695, %v3482_v41  ;;  %v3422_v18 = vpop.f32.mrb[44].mxu0 }
 0x53c   : > { %v4894_v23 = vpop.eup %4893  ;;  %4911 = vpow2.f32 %v3521_v40  ;;  %v4322_v43 = vadd.f32 %v3422_v18, %v6255_v49  ;;  %v3424_v45 = vpop.f32.mrb[45].mxu0 }
 0x53d   : > { %v4896_v48 = vpop.eup %4895  ;;  %v3571_v56 = vadd.f32 1.0, %v4894_v23  ;;  %4913 = vpow2.f32 %v3523_v21  ;;  %v4323_v52 = vadd.f32 %v3424_v45, %v6258_v51  ;;  %v3426_v37 = vpop.f32.mrb[46].mxu0 }
 0x53e   : > { %v4898_v19 = vpop.eup %4897  ;;  %v3572_v53 = vadd.f32 1.0, %v4896_v48  ;;  %4915 = vpow2.f32 %v3525_v42  ;;  %v3483_v55 = vsub.f32 0.0, %v4322_v43  ;;  %v4324_v46 = vadd.f32 %v3426_v37, %v6255_v49  ;;  %v3428_v59 = vpop.f32.mrb[47].mxu0 }
 0x53f   : > { %v4900_v60 = vpop.eup %4899  ;;  %4917 = vrcp.f32 %v3571_v56  ;;  %v3573_v30 = vadd.f32 1.0, %v4898_v19  ;;  %v3484_v25 = vsub.f32 0.0, %v4323_v52  ;;  %v4325_v61 = vadd.f32 %v3428_v59, %v6258_v51 }
 0x540   : > { %4919 = vrcp.f32 %v3572_v53  ;;  %v3574_v12 = vadd.f32 1.0, %v4900_v60  ;;  %v3527_v63 = vmul.f32 1.442695, %v3483_v55  ;;  %v3485_v0 = vsub.f32 0.0, %v4324_v46 }
 0x541   : > { %v4902_v22 = vpop.eup %4901  ;;  %4921 = vrcp.f32 %v3573_v30  ;;  %v3529_v2 = vmul.f32 1.442695, %v3484_v25  ;;  %v3486_v3 = vsub.f32 0.0, %v4325_v61 }
 0x542   : > { %v4904_v4 = vpop.eup %4903  ;;  %vm3631_vm0 = vcmp.ne.f32.partialorder %v4902_v22, %v4902_v22  ;;  %4923 = vrcp.f32 %v3574_v12  ;;  %v3531_v5 = vmul.f32 1.442695, %v3485_v0 }
 0x543   : > { %v4906_v6 = vpop.eup %4905  ;;  %v3663_v26 = vsel %vm3631_vm0, 0.0, %v4902_v22  ;;  %vm3632_vm1 = vcmp.ne.f32.partialorder %v4904_v4, %v4904_v4  ;;  %4925 = vpow2.f32 %v3527_v63  ;;  %v3533_v7 = vmul.f32 1.442695, %v3486_v3  ;;  %v3432_v8 = vpop.f32.mrb[48].mxu0 }
 0x544   : > { %v4908_v9 = vpop.eup %4907  ;;  %3695 = vst [vmem:[%s6278_s30] sm:$0xff] %v3663_v26  ;;  %v3664_v1 = vsel %vm3632_vm1, 0.0, %v4904_v4  ;;  %vm3633_vm2 = vcmp.ne.f32.partialorder %v4906_v6, %v4906_v6  ;;  %4927 = vpow2.f32 %v3529_v2  ;;  %v4326_v11 = vadd.f32 %v3432_v8, %v6255_v49  ;;  %v3434_v14 = vpop.f32.mrb[49].mxu0 }
 0x545   : > { %v4910_v15 = vpop.eup %4909  ;;  %3696 = vst [vmem:[%s6278_s30 + $0x8] sm:$0xff] %v3664_v1  ;;  %v3665_v50 = vsel %vm3633_vm2, 0.0, %v4906_v6  ;;  %vm3634_vm3 = vcmp.ne.f32.partialorder %v4908_v9, %v4908_v9  ;;  %4929 = vpow2.f32 %v3531_v5  ;;  %v4327_v17 = vadd.f32 %v3434_v14, %v6258_v51  ;;  %v3436_v44 = vpop.f32.mrb[50].mxu0 }
 0x546   : > { %v4912_v47 = vpop.eup %4911  ;;  %3697 = vst [vmem:[%s6278_s30 + $0x10] sm:$0xff] %v3665_v50  ;;  %v3666_v62 = vsel %vm3634_vm3, 0.0, %v4908_v9  ;;  %v3575_v13 = vadd.f32 1.0, %v4910_v15  ;;  %4931 = vpow2.f32 %v3533_v7  ;;  %v3487_v27 = vsub.f32 0.0, %v4326_v11  ;;  %v3438_v16 = vpop.f32.mrb[51].mxu0 }
 0x547   : > { %v4914_v54 = vpop.eup %4913  ;;  %3698 = vst [vmem:[%s6278_s30 + $0x18] sm:$0xff] %v3666_v62  ;;  %v3576_v28 = vadd.f32 1.0, %v4912_v47  ;;  %v3488_v33 = vsub.f32 0.0, %v4327_v17  ;;  %v4328_v24 = vadd.f32 %v3436_v44, %v6255_v49  ;;  %v4329_v10 = vadd.f32 %v3438_v16, %v6258_v51 }
 0x548   : > { %v4916_v20 = vpop.eup %4915  ;;  %4933 = vrcp.f32 %v3575_v13  ;;  %v3577_v58 = vadd.f32 1.0, %v4914_v54  ;;  %v3535_v29 = vmul.f32 1.442695, %v3487_v27 }
 0x549   : > { %v4918_v31 = vpop.eup %4917  ;;  %4935 = vrcp.f32 %v3576_v28  ;;  %v3578_v32 = vadd.f32 1.0, %v4916_v20  ;;  %v3537_v57 = vmul.f32 1.442695, %v3488_v33  ;;  %v3489_v34 = vsub.f32 0.0, %v4328_v24 }
 0x54a   : > { %v4920_v35 = vpop.eup %4919  ;;  %vm3635_vm4 = vcmp.ne.f32.partialorder %v4918_v31, %v4918_v31  ;;  %4937 = vrcp.f32 %v3577_v58  ;;  %v3490_v36 = vsub.f32 0.0, %v4329_v10 }
 0x54b   : > { %v4922_v38 = vpop.eup %4921  ;;  %v3667_v39 = vsel %vm3635_vm4, 0.0, %v4918_v31  ;;  %vm3636_vm5 = vcmp.ne.f32.partialorder %v4920_v35, %v4920_v35  ;;  %4939 = vrcp.f32 %v3578_v32  ;;  %v3539_v40 = vmul.f32 1.442695, %v3489_v34  ;;  %v3442_v41 = vpop.f32.mrb[52].mxu0 }
 0x54c   : > { %v4924_v21 = vpop.eup %4923  ;;  %3699 = vst [vmem:[%s6278_s30 + $0x20] sm:$0xff] %v3667_v39  ;;  %v3668_v42 = vsel %vm3636_vm5, 0.0, %v4920_v35  ;;  %vm3637_vm6 = vcmp.ne.f32.partialorder %v4922_v38, %v4922_v38  ;;  %4941 = vpow2.f32 %v3535_v29  ;;  %v3541_v18 = vmul.f32 1.442695, %v3490_v36  ;;  %v3444_v23 = vpop.f32.mrb[53].mxu0 }
 0x54d   : > { %v4926_v43 = vpop.eup %4925  ;;  %3700 = vst [vmem:[%s6278_s30 + $0x28] sm:$0xff] %v3668_v42  ;;  %v3669_v45 = vsel %vm3637_vm6, 0.0, %v4922_v38  ;;  %vm3638_vm7 = vcmp.ne.f32.partialorder %v4924_v21, %v4924_v21  ;;  %4943 = vpow2.f32 %v3537_v57  ;;  %v4330_v48 = vadd.f32 %v3442_v41, %v6255_v49  ;;  %v3446_v56 = vpop.f32.mrb[54].mxu0 }
 0x54e   : > { %v4928_v52 = vpop.eup %4927  ;;  %3701 = vst [vmem:[%s6278_s30 + $0x30] sm:$0xff] %v3669_v45  ;;  %v3670_v37 = vsel %vm3638_vm7, 0.0, %v4924_v21  ;;  %v3579_v19 = vadd.f32 1.0, %v4926_v43  ;;  %4945 = vpow2.f32 %v3539_v40  ;;  %v4331_v53 = vadd.f32 %v3444_v23, %v6258_v51  ;;  %v3448_v55 = vpop.f32.mrb[55].mxu0 }
 0x54f   : > { %v4930_v46 = vpop.eup %4929  ;;  %3702 = vst [vmem:[%s6278_s30 + $0x38] sm:$0xff] %v3670_v37  ;;  %v3580_v59 = vadd.f32 1.0, %v4928_v52  ;;  %4947 = vpow2.f32 %v3541_v18  ;;  %v3491_v60 = vsub.f32 0.0, %v4330_v48  ;;  %v4332_v30 = vadd.f32 %v3446_v56, %v6255_v49 }
 0x550   : > { %v4932_v25 = vpop.eup %4931  ;;  %4949 = vrcp.f32 %v3579_v19  ;;  %v3581_v61 = vadd.f32 1.0, %v4930_v46  ;;  %v3492_v12 = vsub.f32 0.0, %v4331_v53  ;;  %v4333_v63 = vadd.f32 %v3448_v55, %v6258_v51 }
 0x551   : > { %4951 = vrcp.f32 %v3580_v59  ;;  %v3582_v0 = vadd.f32 1.0, %v4932_v25  ;;  %v3543_v22 = vmul.f32 1.442695, %v3491_v60  ;;  %v3493_v2 = vsub.f32 0.0, %v4332_v30 }
 0x552   : > { %v4934_v3 = vpop.eup %4933  ;;  %4953 = vrcp.f32 %v3581_v61  ;;  %v3545_v4 = vmul.f32 1.442695, %v3492_v12  ;;  %v3494_v5 = vsub.f32 0.0, %v4333_v63 }
 0x553   : > { %v4936_v6 = vpop.eup %4935  ;;  %vm3639_vm8 = vcmp.ne.f32.partialorder %v4934_v3, %v4934_v3  ;;  %4955 = vrcp.f32 %v3582_v0  ;;  %v3547_v26 = vmul.f32 1.442695, %v3493_v2  ;;  %v3452_v7 = vpop.f32.mrb[56].mxu0 }
 0x554   : > { %v4938_v8 = vpop.eup %4937  ;;  %v3671_v9 = vsel %vm3639_vm8, 0.0, %v4934_v3  ;;  %vm3640_vm9 = vcmp.ne.f32.partialorder %v4936_v6, %v4936_v6  ;;  %4957 = vpow2.f32 %v3543_v22  ;;  %v3549_v1 = vmul.f32 1.442695, %v3494_v5  ;;  %v3454_v11 = vpop.f32.mrb[57].mxu0 }
 0x555   : > { %v4940_v14 = vpop.eup %4939  ;;  %3703 = vst [vmem:[%s6278_s30 + $0x40] sm:$0xff] %v3671_v9  ;;  %v3672_v15 = vsel %vm3640_vm9, 0.0, %v4936_v6  ;;  %vm3641_vm10 = vcmp.ne.f32.partialorder %v4938_v8, %v4938_v8  ;;  %4959 = vpow2.f32 %v3545_v4  ;;  %v4334_v50 = vadd.f32 %v3452_v7, %v6255_v49  ;;  %v3456_v17 = vpop.f32.mrb[58].mxu0 }
 0x556   : > { %v4942_v44 = vpop.eup %4941  ;;  %3704 = vst [vmem:[%s6278_s30 + $0x48] sm:$0xff] %v3672_v15  ;;  %v3673_v47 = vsel %vm3641_vm10, 0.0, %v4938_v8  ;;  %vm3642_vm11 = vcmp.ne.f32.partialorder %v4940_v14, %v4940_v14  ;;  %4961 = vpow2.f32 %v3547_v26  ;;  %v4335_v62 = vadd.f32 %v3454_v11, %v6258_v51  ;;  %v3458_v13 = vpop.f32.mrb[59].mxu0 }
 0x557   : > { %v4944_v27 = vpop.eup %4943  ;;  %3705 = vst [vmem:[%s6278_s30 + $0x50] sm:$0xff] %v3673_v47  ;;  %v3674_v16 = vsel %vm3642_vm11, 0.0, %v4940_v14  ;;  %v3583_v54 = vadd.f32 1.0, %v4942_v44  ;;  %4963 = vpow2.f32 %v3549_v1  ;;  %v3495_v28 = vsub.f32 0.0, %v4334_v50 }
 0x558   : > { %v4946_v33 = vpop.eup %4945  ;;  %3706 = vst [vmem:[%s6278_s30 + $0x58] sm:$0xff] %v3674_v16  ;;  %v3584_v24 = vadd.f32 1.0, %v4944_v27  ;;  %v3496_v10 = vsub.f32 0.0, %v4335_v62  ;;  %v4336_v20 = vadd.f32 %v3456_v17, %v6255_v49  ;;  %v4337_v58 = vadd.f32 %v3458_v13, %v6258_v51 }
 0x559   : > { %v4948_v29 = vpop.eup %4947  ;;  %4965 = vrcp.f32 %v3583_v54  ;;  %v3585_v31 = vadd.f32 1.0, %v4946_v33  ;;  %v3551_v32 = vmul.f32 1.442695, %v3495_v28 }
 0x55a   : > { %v4950_v57 = vpop.eup %4949  ;;  %4967 = vrcp.f32 %v3584_v24  ;;  %v3586_v34 = vadd.f32 1.0, %v4948_v29  ;;  %v3553_v35 = vmul.f32 1.442695, %v3496_v10  ;;  %v3497_v36 = vsub.f32 0.0, %v4336_v20 }
 0x55b   : > { %v4952_v38 = vpop.eup %4951  ;;  %vm3643_vm12 = vcmp.ne.f32.partialorder %v4950_v57, %v4950_v57  ;;  %4969 = vrcp.f32 %v3585_v31  ;;  %v3498_v39 = vsub.f32 0.0, %v4337_v58  ;;  %v3462_v40 = vpop.f32.mrb[60].mxu0 }
 0x55c   : > { %v4954_v41 = vpop.eup %4953  ;;  %v3675_v21 = vsel %vm3643_vm12, 0.0, %v4950_v57  ;;  %vm3644_vm13 = vcmp.ne.f32.partialorder %v4952_v38, %v4952_v38  ;;  %4971 = vrcp.f32 %v3586_v34  ;;  %v3555_v42 = vmul.f32 1.442695, %v3497_v36  ;;  %v3464_v18 = vpop.f32.mrb[61].mxu0 }
 0x55d   : > { %v4956_v23 = vpop.eup %4955  ;;  %3707 = vst [vmem:[%s6278_s30 + $0x60] sm:$0xff] %v3675_v21  ;;  %v3676_v43 = vsel %vm3644_vm13, 0.0, %v4952_v38  ;;  %vm3645_vm14 = vcmp.ne.f32.partialorder %v4954_v41, %v4954_v41  ;;  %4973 = vpow2.f32 %v3551_v32  ;;  %v3557_v45 = vmul.f32 1.442695, %v3498_v39  ;;  %v3466_v48 = vpop.f32.mrb[62].mxu0 }
 0x55e   : > { %v4958_v56 = vpop.eup %4957  ;;  %3708 = vst [vmem:[%s6278_s30 + $0x68] sm:$0xff] %v3676_v43  ;;  %v3677_v52 = vsel %vm3645_vm14, 0.0, %v4954_v41  ;;  %vm3646_vm15 = vcmp.ne.f32.partialorder %v4956_v23, %v4956_v23  ;;  %4975 = vpow2.f32 %v3553_v35  ;;  %v4338_v37 = vadd.f32 %v3462_v40, %v6255_v49  ;;  %v3468_v19 = vpop.f32.mrb[63].mxu0 }
 0x55f   : > { %v4960_v53 = vpop.eup %4959  ;;  %3709 = vst [vmem:[%s6278_s30 + $0x70] sm:$0xff] %v3677_v52  ;;  %v3678_v55 = vsel %vm3646_vm15, 0.0, %v4956_v23  ;;  %v3587_v46 = vadd.f32 1.0, %v4958_v56  ;;  %4977 = vpow2.f32 %v3555_v42  ;;  %v4339_v59 = vadd.f32 %v3464_v18, %v6258_v51 }
 0x560   : > { %v4962_v60 = vpop.eup %4961  ;;  %3710 = vst [vmem:[%s6278_s30 + $0x78] sm:$0xff] %v3678_v55  ;;  %v3588_v30 = vadd.f32 1.0, %v4960_v53  ;;  %4979 = vpow2.f32 %v3557_v45  ;;  %v3499_v25 = vsub.f32 0.0, %v4338_v37  ;;  %v4340_v61 = vadd.f32 %v3466_v48, %v6255_v49 }
 0x561   : > { %v4964_v12 = vpop.eup %4963  ;;  %4981 = vrcp.f32 %v3587_v46  ;;  %v3589_v63 = vadd.f32 1.0, %v4962_v60  ;;  %v3500_v0 = vsub.f32 0.0, %v4339_v59  ;;  %v4341_v22 = vadd.f32 %v3468_v19, %v6258_v51 }
 0x562   : > { %4983 = vrcp.f32 %v3588_v30  ;;  %v3590_v2 = vadd.f32 1.0, %v4964_v12  ;;  %v3559_v3 = vmul.f32 1.442695, %v3499_v25  ;;  %v3501_v4 = vsub.f32 0.0, %v4340_v61 }
 0x563   : > { %v4966_v5 = vpop.eup %4965  ;;  %4985 = vrcp.f32 %v3589_v63  ;;  %v3561_v6 = vmul.f32 1.442695, %v3500_v0  ;;  %v3502_v26 = vsub.f32 0.0, %v4341_v22 }
 0x564   : > { %v4968_v7 = vpop.eup %4967  ;;  %vm3647_vm0 = vcmp.ne.f32.partialorder %v4966_v5, %v4966_v5  ;;  %4987 = vrcp.f32 %v3590_v2  ;;  %v3563_v49 = vmul.f32 1.442695, %v3501_v4 }
 0x565   : > { %v4970_v8 = vpop.eup %4969  ;;  %v3679_v9 = vsel %vm3647_vm0, 0.0, %v4966_v5  ;;  %vm3648_vm1 = vcmp.ne.f32.partialorder %v4968_v7, %v4968_v7  ;;  %4989 = vpow2.f32 %v3559_v3  ;;  %v3565_v51 = vmul.f32 1.442695, %v3502_v26 }
 0x566   : > { %v4972_v1 = vpop.eup %4971  ;;  %3711 = vst [vmem:[%s6278_s30 + $0x80] sm:$0xff] %v3679_v9  ;;  %v3680_v11 = vsel %vm3648_vm1, 0.0, %v4968_v7  ;;  %vm3649_vm2 = vcmp.ne.f32.partialorder %v4970_v8, %v4970_v8  ;;  %4991 = vpow2.f32 %v3561_v6 }
 0x567   : > { %v4974_v14 = vpop.eup %4973  ;;  %3712 = vst [vmem:[%s6278_s30 + $0x88] sm:$0xff] %v3680_v11  ;;  %v3681_v15 = vsel %vm3649_vm2, 0.0, %v4970_v8  ;;  %vm3650_vm3 = vcmp.ne.f32.partialorder %v4972_v1, %v4972_v1  ;;  %4993 = vpow2.f32 %v3563_v49 }
 0x568   : > { %v4976_v50 = vpop.eup %4975  ;;  %3713 = vst [vmem:[%s6278_s30 + $0x90] sm:$0xff] %v3681_v15  ;;  %v3682_v17 = vsel %vm3650_vm3, 0.0, %v4972_v1  ;;  %v3591_v44 = vadd.f32 1.0, %v4974_v14  ;;  %4995 = vpow2.f32 %v3565_v51 }
 0x569   : > { %v4978_v47 = vpop.eup %4977  ;;  %3714 = vst [vmem:[%s6278_s30 + $0x98] sm:$0xff] %v3682_v17  ;;  %v3592_v62 = vadd.f32 1.0, %v4976_v50 }
 0x56a   : > { %v4980_v13 = vpop.eup %4979  ;;  %4997 = vrcp.f32 %v3591_v44  ;;  %v3593_v27 = vadd.f32 1.0, %v4978_v47 }
 0x56b   : > { %v4982_v16 = vpop.eup %4981  ;;  %4999 = vrcp.f32 %v3592_v62  ;;  %v3594_v54 = vadd.f32 1.0, %v4980_v13 }
 0x56c   : > { %v4984_v28 = vpop.eup %4983  ;;  %vm3651_vm4 = vcmp.ne.f32.partialorder %v4982_v16, %v4982_v16  ;;  %5001 = vrcp.f32 %v3593_v27 }
 0x56d   : > { %v4986_v33 = vpop.eup %4985  ;;  %v3683_v24 = vsel %vm3651_vm4, 0.0, %v4982_v16  ;;  %vm3652_vm5 = vcmp.ne.f32.partialorder %v4984_v28, %v4984_v28  ;;  %5003 = vrcp.f32 %v3594_v54 }
 0x56e   : > { %v4988_v10 = vpop.eup %4987  ;;  %3715 = vst [vmem:[%s6278_s30 + $0xa0] sm:$0xff] %v3683_v24  ;;  %v3684_v20 = vsel %vm3652_vm5, 0.0, %v4984_v28  ;;  %vm3653_vm6 = vcmp.ne.f32.partialorder %v4986_v33, %v4986_v33 }
 0x56f   : > { %v4990_v58 = vpop.eup %4989  ;;  %3716 = vst [vmem:[%s6278_s30 + $0xa8] sm:$0xff] %v3684_v20  ;;  %v3685_v29 = vsel %vm3653_vm6, 0.0, %v4986_v33  ;;  %vm3654_vm7 = vcmp.ne.f32.partialorder %v4988_v10, %v4988_v10 }
 0x570   : > { %v4992_v31 = vpop.eup %4991  ;;  %3717 = vst [vmem:[%s6278_s30 + $0xb0] sm:$0xff] %v3685_v29  ;;  %v3686_v32 = vsel %vm3654_vm7, 0.0, %v4988_v10  ;;  %v3595_v57 = vadd.f32 1.0, %v4990_v58 }
 0x571   : > { %v4994_v34 = vpop.eup %4993  ;;  %3718 = vst [vmem:[%s6278_s30 + $0xb8] sm:$0xff] %v3686_v32  ;;  %v3596_v35 = vadd.f32 1.0, %v4992_v31 }
 0x572   : > { %v4996_v36 = vpop.eup %4995  ;;  %5005 = vrcp.f32 %v3595_v57  ;;  %v3597_v38 = vadd.f32 1.0, %v4994_v34 }
 0x573   : > { %5007 = vrcp.f32 %v3596_v35  ;;  %v3598_v39 = vadd.f32 1.0, %v4996_v36 }
 0x574   : > { %v4998_v40 = vpop.eup %4997  ;;  %5009 = vrcp.f32 %v3597_v38 }
 0x575   : > { %v5000_v41 = vpop.eup %4999  ;;  %vm3655_vm8 = vcmp.ne.f32.partialorder %v4998_v40, %v4998_v40  ;;  %5011 = vrcp.f32 %v3598_v39 }
 0x576   : > { %v5002_v21 = vpop.eup %5001  ;;  %v3687_v42 = vsel %vm3655_vm8, 0.0, %v4998_v40  ;;  %vm3656_vm9 = vcmp.ne.f32.partialorder %v5000_v41, %v5000_v41 }
 0x577   : > { %v5004_v18 = vpop.eup %5003  ;;  %3719 = vst [vmem:[%s6278_s30 + $0xc0] sm:$0xff] %v3687_v42  ;;  %v3688_v23 = vsel %vm3656_vm9, 0.0, %v5000_v41  ;;  %vm3657_vm10 = vcmp.ne.f32.partialorder %v5002_v21, %v5002_v21 }
 0x578   : > { %3720 = vst [vmem:[%s6278_s30 + $0xc8] sm:$0xff] %v3688_v23  ;;  %v3689_v43 = vsel %vm3657_vm10, 0.0, %v5002_v21  ;;  %vm3658_vm11 = vcmp.ne.f32.partialorder %v5004_v18, %v5004_v18 }
 0x579   : > { %3721 = vst [vmem:[%s6278_s30 + $0xd0] sm:$0xff] %v3689_v43  ;;  %v3690_v45 = vsel %vm3658_vm11, 0.0, %v5004_v18 }
 0x57a   : > { %3722 = vst [vmem:[%s6278_s30 + $0xd8] sm:$0xff] %v3690_v45 }
 0x57c   : > { %v5006_v48 = vpop.eup %5005 }
 0x57d   : > { %v5008_v56 = vpop.eup %5007  ;;  %vm3659_vm12 = vcmp.ne.f32.partialorder %v5006_v48, %v5006_v48 }
 0x57e   : > { %v5010_v52 = vpop.eup %5009  ;;  %v3691_v37 = vsel %vm3659_vm12, 0.0, %v5006_v48  ;;  %vm3660_vm13 = vcmp.ne.f32.partialorder %v5008_v56, %v5008_v56 }
 0x57f   : > { %v5012_v19 = vpop.eup %5011  ;;  %3723 = vst [vmem:[%s6278_s30 + $0xe0] sm:$0xff] %v3691_v37  ;;  %v3692_v53 = vsel %vm3660_vm13, 0.0, %v5008_v56  ;;  %vm3661_vm14 = vcmp.ne.f32.partialorder %v5010_v52, %v5010_v52 }
 0x580   : > { %3724 = vst [vmem:[%s6278_s30 + $0xe8] sm:$0xff] %v3692_v53  ;;  %v3693_v55 = vsel %vm3661_vm14, 0.0, %v5010_v52  ;;  %vm3662_vm15 = vcmp.ne.f32.partialorder %v5012_v19, %v5012_v19 }
 0x581   : > { %3725 = vst [vmem:[%s6278_s30 + $0xf0] sm:$0xff] %v3693_v55  ;;  %v3694_v46 = vsel %vm3662_vm15, 0.0, %v5012_v19 }
 0x582   : > { %3726 = vst [vmem:[%s6278_s30 + $0xf8] sm:$0xff] %v3694_v46 }
 0x583   : > { %5254 = shalt.err (!%p5251_p13)
}
 0x584   : > { %s5255_s8 = scalar_lea.hbm %s6330_s16, 4096  ;;  %s5259_s19 = scalar_lea.hbm %s6448_s27, 8192 }
 0x585   : > { %p5256_p0 = scmp.ne.s32.totalorder %s6330_s16, %s5255_s8  ;;  %p5260_p10 = scmp.lt.u32.totalorder %s6330_s16, %s6448_s27 }
 0x586   : > { %p5261_p5 = scmp.lt.u32.totalorder %s5259_s19, %s5255_s8  ;;  %p5263_p4 = scmp.lt.u32.totalorder %s5255_s8, %s6330_s16 }
 0x587   : > { %p5257_p6 = pnand %p5256_p0, %p5592_p3 }
 0x588   : > { %p5262_p9 = por %p5261_p5, %p5260_p10 }
 0x589   : > { %p5258_p8 = pneg %p5257_p6 }
 0x58a   : > { %p5264_p11 = por %p5263_p4, %p5262_p9 }
 0x58c   : > { %p5265_p7 = pnand %p5264_p11, %p5258_p8 }
 0x58e   : > { %5268 = shalt.err (!%p5265_p7)
}
 0x58f   : > { %s5345_s0 = smov 256   ;;  %s5346_s30 = smov 16  }
 0x590   : > { %4426 = dma.vmem_to_hbm [thread:$0]  (%p5592_p3), %s6332_s4, 4096, %s6330_s16, %s3760_s25, %s5345_s0, %s5345_s0, %s5346_s30  }
 0x591 PF: > { %s6449_s15 = sld [smem:[#allocation24_spill]]  ;;  %s6450_s20 = sld [smem:[#allocation25_spill]] }
 0x592   : > { %p6452_p1 = scmp.ge.s32.totalorder %s5327_s24, 2 }
 0x597   : > { %s3831_s18 = sand.u32 1, %s6449_s15   ;;  %p6451_p12 = scmp.ne.s32.totalorder %s6450_s20, 0 }
 0x598   : > { %s3832_s6 = scalar_lea.sflag [#allocation4], %s3831_s18 }
 0x599   : > { %p4453_p2 = pnand %p6452_p1, %p6451_p12 }
 0x59b   : > { %5306 = dma.done.wait (!%p4453_p2), %s3832_s6, 4096  }
 0x59c   : > { %5308 = vsyncadd (!%p4453_p2), %s3832_s6, 4294963200  ;;  %s6453_s21 = sadd.s32 4294967294, %s5327_s24  }
 0x59d   : > { %s3840_s12 = sand.u32 1, %s6453_s21  }
 0x59e   : > { %s3841_s14 = scalar_lea.sflag [#allocation15], %s3840_s12 }
 0x59f   : > { %5310 = dma.done.wait (!%p4453_p2), %s3841_s14, 4096  }
 0x5a0   : > { %5312 = vsyncadd (!%p4453_p2), %s3841_s14, 4294963200  ;;  %s6454_s13 = sld [smem:[#allocation26_spill]]  ;;  %p34_p3 = scmp.ge.s32.totalorder %s5579_s26, 4  }
 0x5a1   : > { %s6455_s21 = smov %s5319_s22  ;;  %s6456_s22 = smov %s5323_s23 }
 0x5a2   : > { %s6458_s24 = smov %s5579_s26  ;;  %36 = sbr.rel (!%p34_p3) target bundleno = 20 (0x14), region = 166 }
 0x5a6   : > { %s6457_s23 = smov %s6454_s13 }
 0x5a9   :  { %3855 = vsyncpa [#allocation3], 1 }
 0x5aa   :  { %3857 = vsyncpa [#allocation3 + $0x1], 1 }
 0x5ab   :  { %3858 = vsyncpa [#allocation6], 1 }
 0x5ac   :  { %3860 = vsyncpa [#allocation6 + $0x1], 1 }
 0x5ad   :  { %3861 = vsyncpa [#allocation9], 1 }
 0x5ae   :  { %3862 = vsyncpa [#allocation12], 1 }
 0x5af   :  { %3863 = vsyncpa [#allocation4], 1 }
 0x5b0   :  { %3865 = vsyncpa [#allocation4 + $0x1], 1 }
 0x5b1   :  { %3866 = vsyncpa [#allocation15], 1 }
 0x5b2   :  { %3868 = vsyncpa [#allocation15 + $0x1], 1 }

</bundles_post_ra>
